<compile_context>
chip_gen: v5e
topology: v5e:2x2
jax: 0.10.0
libtpu: 0.0.40
codegen_flags: <defaults>
</compile_context>

<pallas_src>
import math

import jax
import jax.numpy as jnp
import numpy as np
from jax.experimental import pallas as pl
from jax.experimental.pallas import tpu as pltpu

GROUPS = 32
EPS = 1e-6
LPAD = 8                        # left pad of the slab W axis (multiple of 8 -> aligned stores)
VMEM_LIMIT = 64 * 1024 * 1024   # explicit scoped-VMEM budget (<= v7x physical 64 MiB)


def _row_block(h):
    """Largest row tile in (32, 16, 8) that divides H and leaves >= 2 row blocks."""
    for tr in (32, 16, 8):
        if h % tr == 0 and h // tr >= 2:
            return tr
    return h


# -----------------------------------------------------------------------------
# Pass 1: per-(batch, channel) sum and sum-of-squares (GroupNorm statistics).
# Grid (N, R); the output block index is fixed across the row axis, so it stays
# resident in VMEM and accumulates (init at r == 0).
# -----------------------------------------------------------------------------
def _gn_stats_kernel(x_ref, s1_ref, s2_ref):
    @pl.when(pl.program_id(1) == 0)
    def _():
        s1_ref[...] = jnp.zeros(s1_ref.shape, s1_ref.dtype)
        s2_ref[...] = jnp.zeros(s2_ref.shape, s2_ref.dtype)

    x = x_ref[0].astype(jnp.float32)                                    # (TR, W, C)
    s1_ref[0] += jnp.sum(jnp.sum(x, axis=0), axis=0, keepdims=True)     # (1, C)
    s2_ref[0] += jnp.sum(jnp.sum(x * x, axis=0), axis=0, keepdims=True)


def _gn_stats(x):
    n, h, w, c = x.shape
    tr = _row_block(h)
    return pl.pallas_call(
        _gn_stats_kernel,
        out_shape=(jax.ShapeDtypeStruct((n, 1, c), jnp.float32),
                   jax.ShapeDtypeStruct((n, 1, c), jnp.float32)),
        grid=(n, h // tr),
        in_specs=[pl.BlockSpec((1, tr, w, c), lambda i, r: (i, r, 0, 0))],
        out_specs=(pl.BlockSpec((1, 1, c), lambda i, r: (i, 0, 0)),
                   pl.BlockSpec((1, 1, c), lambda i, r: (i, 0, 0))),
        compiler_params=pltpu.CompilerParams(
            dimension_semantics=("parallel", "arbitrary"),
            vmem_limit_bytes=VMEM_LIMIT),
    )(x)


def _gn_scale_shift(s1, s2, gamma, beta, count):
    """Tiny (N, C)-sized plain-JAX glue: channel sums -> per-channel affine scale/shift."""
    n = s1.shape[0]
    c = s1.shape[-1]
    cpg = c // GROUPS
    g_sum = s1.reshape(n, GROUPS, cpg).sum(-1)
    g_sumsq = s2.reshape(n, GROUPS, cpg).sum(-1)
    mean = g_sum / count
    var = jnp.maximum(g_sumsq / count - mean * mean, 0.0)   # clamp: no negative variance
    inv = jax.lax.rsqrt(var + EPS)
    mean_c = jnp.repeat(mean, cpg, axis=1)                  # (N, C)
    inv_c = jnp.repeat(inv, cpg, axis=1)
    scale = inv_c * gamma[None, :].astype(jnp.float32)
    shift = beta[None, :].astype(jnp.float32) - mean_c * scale
    return scale.reshape(n, 1, c), shift.reshape(n, 1, c)


# -----------------------------------------------------------------------------
# Pass 2: fused normalize + swish + 3x3 conv (+ residual). Grid (N, row-blocks).
#  - x is image-resident per batch (same block index across the row axis -> one DMA per image);
#    output / residual are row-tiled so the pipeline has N*R stages.
#  - the 1-pixel halo is assembled in a zeroed VMEM scratch slab; interior stores land on
#    8-aligned sublane offsets (LPAD = 8).
#  - the 9 taps are (TR*W, C) x (C, C) bf16 matmuls with f32 accumulation (residual seeds acc).
# Note: for images too large to keep one (H, W, C) block in VMEM, switch the x input to a
# manual halo'd row DMA (pl.ANY + make_async_copy); not needed at these shapes.
# -----------------------------------------------------------------------------
def _make_gn_swish_conv_kernel(add_residual):
    def kernel(*refs):
        if add_residual:
            scale_ref, shift_ref, x_ref, w_ref, res_ref, o_ref, slab_ref = refs
        else:
            scale_ref, shift_ref, x_ref, w_ref, o_ref, slab_ref = refs
        _, tr, w, c = o_ref.shape
        r = pl.program_id(1)
        nr = pl.num_programs(1)
        start = r * tr

        scale = scale_ref[0].astype(jnp.float32)     # (1, C)
        shift = shift_ref[0].astype(jnp.float32)     # (1, C)

        def norm_swish(rows):                        # rows: (k, W, C)
            y = rows.astype(jnp.float32) * scale[None] + shift[None]
            return y * jax.nn.sigmoid(y)             # keep elementwise math in f32 (v5e-safe)

        # Build the halo'd slab in VMEM scratch (zero pad rows/cols, normalized interior).
        slab_ref[...] = jnp.zeros(slab_ref.shape, slab_ref.dtype)
        slab_ref[1:tr + 1, LPAD:LPAD + w, :] = norm_swish(x_ref[0, pl.ds(start, tr), :, :])

        @pl.when(r > 0)
        def _():
            slab_ref[0:1, LPAD:LPAD + w, :] = norm_swish(
                x_ref[0, pl.ds(start - 1, 1), :, :])

        @pl.when(r < nr - 1)
        def _():
            slab_ref[tr + 1:tr + 2, LPAD:LPAD + w, :] = norm_swish(
                x_ref[0, pl.ds(start + tr, 1), :, :])

        # 3x3 conv as 9 shifted bf16 MXU matmuls, f32 accumulation, residual fused into acc.
        if add_residual:
            acc = res_ref[0].astype(jnp.float32).reshape(tr * w, c)
        else:
            acc = jnp.zeros((tr * w, c), jnp.float32)
        for dy in range(3):
            for dx in range(3):
                c0 = LPAD + dx - 1
                patch = slab_ref[dy:dy + tr, c0:c0 + w, :].astype(jnp.bfloat16)
                acc = acc + jnp.dot(patch.reshape(tr * w, c), w_ref[dy, dx],
                                    preferred_element_type=jnp.float32)
        o_ref[0] = acc.reshape(tr, w, c).astype(o_ref.dtype)

    return kernel


def _gn_swish_conv3x3(x, scale, shift, w_hwio_bf16, residual=None):
    n, h, w, c = x.shape
    tr = _row_block(h)
    add_res = residual is not None
    in_specs = [
        pl.BlockSpec((1, 1, c), lambda i, r: (i, 0, 0)),          # scale
        pl.BlockSpec((1, 1, c), lambda i, r: (i, 0, 0)),          # shift
        pl.BlockSpec((1, h, w, c), lambda i, r: (i, 0, 0, 0)),    # x, image-resident per batch
        pl.BlockSpec((3, 3, c, c), lambda i, r: (0, 0, 0, 0)),    # weights (bf16, HWIO)
    ]
    args = [scale, shift, x, w_hwio_bf16]
    if add_res:
        in_specs.append(pl.BlockSpec((1, tr, w, c), lambda i, r: (i, r, 0, 0)))
        args.append(residual)
    return pl.pallas_call(
        _make_gn_swish_conv_kernel(add_res),
        out_shape=jax.ShapeDtypeStruct((n, h, w, c), x.dtype),
        grid=(n, h // tr),
        in_specs=in_specs,
        out_specs=pl.BlockSpec((1, tr, w, c), lambda i, r: (i, r, 0, 0)),
        scratch_shapes=[pltpu.VMEM((tr + 2, LPAD + w + LPAD, c), jnp.float32)],
        compiler_params=pltpu.CompilerParams(
            dimension_semantics=("parallel", "parallel"),
            vmem_limit_bytes=VMEM_LIMIT),
    )(*args)


# -----------------------------------------------------------------------------
# ResBlock forward
# -----------------------------------------------------------------------------
def resblock_forward_nhwc(x, params):
    """Fused ResBlock forward; NHWC activations end-to-end (no full-tensor relayouts)."""
    n, h, w, c = x.shape
    assert c % GROUPS == 0
    count = h * w * (c // GROUPS)
    w1 = jnp.transpose(params["conv1_w"], (2, 3, 1, 0)).astype(jnp.bfloat16)  # OIHW -> HWIO
    w2 = jnp.transpose(params["conv2_w"], (2, 3, 1, 0)).astype(jnp.bfloat16)

    s1, s2 = _gn_stats(x)
    sc, sh = _gn_scale_shift(s1, s2, params["norm1_w"], params["norm1_b"], count)
    hid = _gn_swish_conv3x3(x, sc, sh, w1)

    s1, s2 = _gn_stats(hid)
    sc, sh = _gn_scale_shift(s1, s2, params["norm2_w"], params["norm2_b"], count)
    return _gn_swish_conv3x3(hid, sc, sh, w2, residual=x)   # residual add fused in kernel


def resblock_forward(x_nchw, params):
    """NCHW wrapper for drop-in parity with the PyTorch module (boundary transposes only)."""
    x = jnp.transpose(x_nchw, (0, 2, 3, 1))
    return jnp.transpose(resblock_forward_nhwc(x, params), (0, 3, 1, 2))


# -----------------------------------------------------------------------------
# Pure-JAX reference (PyTorch semantics) for verification
# -----------------------------------------------------------------------------
def resblock_ref(x, params):
    def gn(x, g, b):
        n, c, h, w = x.shape
        xg = x.reshape(n, GROUPS, c // GROUPS, h, w)
        mean = xg.mean(axis=(2, 3, 4), keepdims=True)
        var = ((xg - mean) ** 2).mean(axis=(2, 3, 4), keepdims=True)
        xn = ((xg - mean) / jnp.sqrt(var + EPS)).reshape(n, c, h, w)
        return xn * g[None, :, None, None] + b[None, :, None, None]

    def conv(x, w):
        return jax.lax.conv_general_dilated(
            x, w, (1, 1), "SAME", dimension_numbers=("NCHW", "OIHW", "NCHW"))

    def sw(x):
        return x * jax.nn.sigmoid(x)

    h = conv(sw(gn(x, params["norm1_w"], params["norm1_b"])), params["conv1_w"])
    h = conv(sw(gn(h, params["norm2_w"], params["norm2_b"])), params["conv2_w"])
    return x + h


if __name__ == "__main__":
    # dim must be a multiple of 32 (GroupNorm(32, dim)); C=128 keeps matmuls / stores 128-lane dense.
    N, C, H, W = 2, 128, 16, 16
    key = jax.random.PRNGKey(0)
    ks = jax.random.split(key, 7)
    x = jax.random.normal(ks[0], (N, C, H, W), jnp.float32)
    bound = 1.0 / math.sqrt(9 * C)
    params = {
        "norm1_w": 1.0 + 0.1 * jax.random.normal(ks[1], (C,), jnp.float32),
        "norm1_b": 0.1 * jax.random.normal(ks[2], (C,), jnp.float32),
        "norm2_w": 1.0 + 0.1 * jax.random.normal(ks[3], (C,), jnp.float32),
        "norm2_b": 0.1 * jax.random.normal(ks[4], (C,), jnp.float32),
        "conv1_w": jax.random.uniform(ks[5], (C, C, 3, 3), jnp.float32, -bound, bound),
        "conv2_w": jax.random.uniform(ks[6], (C, C, 3, 3), jnp.float32, -bound, bound),
    }

    fwd = jax.jit(resblock_forward)
    out = jax.block_until_ready(fwd(x, params))
    ref = jax.block_until_ready(resblock_ref(x, params))
    # bf16 MXU operands (with f32 accumulation) -> small drift vs the f32 reference.
    np.testing.assert_allclose(np.asarray(out), np.asarray(ref), rtol=2e-2, atol=2e-2)
    print("KERNEL_OK")
</pallas_src>

<mosaic_0001>
module attributes {stable_mosaic.version = 11 : i64} {
  func.func @_gn_stats_kernel(%arg0: i32, %arg1: i32, %arg2: memref<1x8x16x128xf32, #tpu.memory_space<vmem>>, %arg3: memref<1x1x128xf32, #tpu.memory_space<vmem>>, %arg4: memref<1x1x128xf32, #tpu.memory_space<vmem>>) attributes {dimension_semantics = [#tpu.dimension_semantics<parallel>, #tpu.dimension_semantics<arbitrary>], iteration_bounds = array<i64: 2, 2>, scalar_prefetch = 0 : i64, scratch_operands = 0 : i64, tpu.core_type = #tpu.core_type<tc>, window_params = [{transform_indices = @transform_0, window_bounds = array<i64: 1, 8, 16, 128>}, {transform_indices = @transform_1, window_bounds = array<i64: 1, 1, 128>}, {transform_indices = @transform_2, window_bounds = array<i64: 1, 1, 128>}]} {
    %c0_i32 = arith.constant 0 : i32
    %0 = arith.cmpi eq, %arg1, %c0_i32 : i32
    %1 = arith.extui %0 : i1 to i32
    %c0_i32_0 = arith.constant 0 : i32
    %2 = arith.cmpi ne, %1, %c0_i32_0 : i32
    scf.if %2 {
      %cst_19 = arith.constant 0.000000e+00 : f32
      %24 = vector.broadcast %cst_19 : f32 to vector<1x1x128xf32>
      %c0_20 = arith.constant 0 : index
      %c0_21 = arith.constant 0 : index
      %c0_22 = arith.constant 0 : index
      %25 = vector.load %arg3[%c0_20, %c0_21, %c0_22] : memref<1x1x128xf32, #tpu.memory_space<vmem>>, vector<1x1x128xf32>
      tpu.vector_store %arg3[%c0_20, %c0_21, %c0_22], %24 {strides = array<i32>} : memref<1x1x128xf32, #tpu.memory_space<vmem>>, vector<1x1x128xf32>,
      %cst_23 = arith.constant 0.000000e+00 : f32
      %26 = vector.broadcast %cst_23 : f32 to vector<1x1x128xf32>
      %c0_24 = arith.constant 0 : index
      %c0_25 = arith.constant 0 : index
      %c0_26 = arith.constant 0 : index
      %27 = vector.load %arg4[%c0_24, %c0_25, %c0_26] : memref<1x1x128xf32, #tpu.memory_space<vmem>>, vector<1x1x128xf32>
      tpu.vector_store %arg4[%c0_24, %c0_25, %c0_26], %26 {strides = array<i32>} : memref<1x1x128xf32, #tpu.memory_space<vmem>>, vector<1x1x128xf32>,
    } else {
    }
    %c0 = arith.constant 0 : index
    %c0_1 = arith.constant 0 : index
    %c0_2 = arith.constant 0 : index
    %c0_3 = arith.constant 0 : index
    %3 = vector.load %arg2[%c0, %c0_1, %c0_2, %c0_3] : memref<1x8x16x128xf32, #tpu.memory_space<vmem>>, vector<1x8x16x128xf32>
    %4 = vector.shape_cast %3 : vector<1x8x16x128xf32> to vector<8x16x128xf32>
    %c0_4 = arith.constant 0 : index
    %c0_5 = arith.constant 0 : index
    %c0_6 = arith.constant 0 : index
    %5 = vector.load %arg3[%c0_4, %c0_5, %c0_6] : memref<1x1x128xf32, #tpu.memory_space<vmem>>, vector<1x1x128xf32>
    %6 = vector.shape_cast %5 : vector<1x1x128xf32> to vector<1x128xf32>
    %cst = arith.constant dense<0.000000e+00> : vector<16x128xf32>
    %7 = vector.multi_reduction <add>, %4, %cst [0] : vector<8x16x128xf32> to vector<16x128xf32>
    %cst_7 = arith.constant dense<0.000000e+00> : vector<128xf32>
    %8 = vector.multi_reduction <add>, %7, %cst_7 [0] : vector<16x128xf32> to vector<128xf32>
    %9 = vector.shape_cast %8 : vector<128xf32> to vector<1x128xf32>
    %10 = arith.addf %6, %9 : vector<1x128xf32>
    %c0_8 = arith.constant 0 : index
    %c0_9 = arith.constant 0 : index
    %c0_10 = arith.constant 0 : index
    %11 = vector.load %arg3[%c0_8, %c0_9, %c0_10] : memref<1x1x128xf32, #tpu.memory_space<vmem>>, vector<1x1x128xf32>
    %12 = vector.shape_cast %11 : vector<1x1x128xf32> to vector<1x128xf32>
    %13 = vector.shape_cast %10 : vector<1x128xf32> to vector<1x1x128xf32>
    tpu.vector_store %arg3[%c0_8, %c0_9, %c0_10], %13 {strides = array<i32>} : memref<1x1x128xf32, #tpu.memory_space<vmem>>, vector<1x1x128xf32>,
    %c0_11 = arith.constant 0 : index
    %c0_12 = arith.constant 0 : index
    %c0_13 = arith.constant 0 : index
    %14 = vector.load %arg4[%c0_11, %c0_12, %c0_13] : memref<1x1x128xf32, #tpu.memory_space<vmem>>, vector<1x1x128xf32>
    %15 = vector.shape_cast %14 : vector<1x1x128xf32> to vector<1x128xf32>
    %16 = arith.mulf %4, %4 : vector<8x16x128xf32>
    %cst_14 = arith.constant dense<0.000000e+00> : vector<16x128xf32>
    %17 = vector.multi_reduction <add>, %16, %cst_14 [0] : vector<8x16x128xf32> to vector<16x128xf32>
    %cst_15 = arith.constant dense<0.000000e+00> : vector<128xf32>
    %18 = vector.multi_reduction <add>, %17, %cst_15 [0] : vector<16x128xf32> to vector<128xf32>
    %19 = vector.shape_cast %18 : vector<128xf32> to vector<1x128xf32>
    %20 = arith.addf %15, %19 : vector<1x128xf32>
    %c0_16 = arith.constant 0 : index
    %c0_17 = arith.constant 0 : index
    %c0_18 = arith.constant 0 : index
    %21 = vector.load %arg4[%c0_16, %c0_17, %c0_18] : memref<1x1x128xf32, #tpu.memory_space<vmem>>, vector<1x1x128xf32>
    %22 = vector.shape_cast %21 : vector<1x1x128xf32> to vector<1x128xf32>
    %23 = vector.shape_cast %20 : vector<1x128xf32> to vector<1x1x128xf32>
    tpu.vector_store %arg4[%c0_16, %c0_17, %c0_18], %23 {strides = array<i32>} : memref<1x1x128xf32, #tpu.memory_space<vmem>>, vector<1x1x128xf32>,
    return
  }
  func.func @transform_0(%arg0: i32, %arg1: i32) -> (i32, i32, i32, i32) {
    %c0_i32 = arith.constant 0 : i32
    %c0_i32_0 = arith.constant 0 : i32
    %c0_i32_1 = arith.constant 0 : i32
    return %arg0, %arg1, %c0_i32, %c0_i32_0 : i32, i32, i32, i32
  }
  func.func @transform_1(%arg0: i32, %arg1: i32) -> (i32, i32, i32) {
    %c0_i32 = arith.constant 0 : i32
    %c0_i32_0 = arith.constant 0 : i32
    %c0_i32_1 = arith.constant 0 : i32
    return %arg0, %c0_i32, %c0_i32_0 : i32, i32, i32
  }
  func.func @transform_2(%arg0: i32, %arg1: i32) -> (i32, i32, i32) {
    %c0_i32 = arith.constant 0 : i32
    %c0_i32_0 = arith.constant 0 : i32
    %c0_i32_1 = arith.constant 0 : i32
    return %arg0, %c0_i32, %c0_i32_0 : i32, i32, i32
  }
}

module attributes {stable_mosaic.version = 11 : i64} {
  func.func @_gn_stats_kernel(%arg0: i32, %arg1: i32, %arg2: memref<1x8x16x128xf32, #tpu.memory_space<vmem>>, %arg3: memref<1x1x128xf32, #tpu.memory_space<vmem>>, %arg4: memref<1x1x128xf32, #tpu.memory_space<vmem>>) attributes {dimension_semantics = [#tpu.dimension_semantics<parallel>, #tpu.dimension_semantics<arbitrary>], iteration_bounds = array<i64: 2, 2>, scalar_prefetch = 0 : i64, scratch_operands = 0 : i64, tpu.core_type = #tpu.core_type<tc>, window_params = [{transform_indices = @transform_0, window_bounds = array<i64: 1, 8, 16, 128>}, {transform_indices = @transform_1, window_bounds = array<i64: 1, 1, 128>}, {transform_indices = @transform_2, window_bounds = array<i64: 1, 1, 128>}]} {
    %c0_i32 = arith.constant 0 : i32
    %0 = arith.cmpi eq, %arg1, %c0_i32 : i32
    %1 = arith.extui %0 : i1 to i32
    %c0_i32_0 = arith.constant 0 : i32
    %2 = arith.cmpi ne, %1, %c0_i32_0 : i32
    scf.if %2 {
      %cst_19 = arith.constant 0.000000e+00 : f32
      %24 = vector.broadcast %cst_19 : f32 to vector<1x1x128xf32>
      %c0_20 = arith.constant 0 : index
      %c0_21 = arith.constant 0 : index
      %c0_22 = arith.constant 0 : index
      %25 = vector.load %arg3[%c0_20, %c0_21, %c0_22] : memref<1x1x128xf32, #tpu.memory_space<vmem>>, vector<1x1x128xf32>
      tpu.vector_store %arg3[%c0_20, %c0_21, %c0_22], %24 {strides = array<i32>} : memref<1x1x128xf32, #tpu.memory_space<vmem>>, vector<1x1x128xf32>,
      %cst_23 = arith.constant 0.000000e+00 : f32
      %26 = vector.broadcast %cst_23 : f32 to vector<1x1x128xf32>
      %c0_24 = arith.constant 0 : index
      %c0_25 = arith.constant 0 : index
      %c0_26 = arith.constant 0 : index
      %27 = vector.load %arg4[%c0_24, %c0_25, %c0_26] : memref<1x1x128xf32, #tpu.memory_space<vmem>>, vector<1x1x128xf32>
      tpu.vector_store %arg4[%c0_24, %c0_25, %c0_26], %26 {strides = array<i32>} : memref<1x1x128xf32, #tpu.memory_space<vmem>>, vector<1x1x128xf32>,
    } else {
    }
    %c0 = arith.constant 0 : index
    %c0_1 = arith.constant 0 : index
    %c0_2 = arith.constant 0 : index
    %c0_3 = arith.constant 0 : index
    %3 = vector.load %arg2[%c0, %c0_1, %c0_2, %c0_3] : memref<1x8x16x128xf32, #tpu.memory_space<vmem>>, vector<1x8x16x128xf32>
    %4 = vector.shape_cast %3 : vector<1x8x16x128xf32> to vector<8x16x128xf32>
    %c0_4 = arith.constant 0 : index
    %c0_5 = arith.constant 0 : index
    %c0_6 = arith.constant 0 : index
    %5 = vector.load %arg3[%c0_4, %c0_5, %c0_6] : memref<1x1x128xf32, #tpu.memory_space<vmem>>, vector<1x1x128xf32>
    %6 = vector.shape_cast %5 : vector<1x1x128xf32> to vector<1x128xf32>
    %cst = arith.constant dense<0.000000e+00> : vector<16x128xf32>
    %7 = vector.multi_reduction <add>, %4, %cst [0] : vector<8x16x128xf32> to vector<16x128xf32>
    %cst_7 = arith.constant dense<0.000000e+00> : vector<128xf32>
    %8 = vector.multi_reduction <add>, %7, %cst_7 [0] : vector<16x128xf32> to vector<128xf32>
    %9 = vector.shape_cast %8 : vector<128xf32> to vector<1x128xf32>
    %10 = arith.addf %6, %9 : vector<1x128xf32>
    %c0_8 = arith.constant 0 : index
    %c0_9 = arith.constant 0 : index
    %c0_10 = arith.constant 0 : index
    %11 = vector.load %arg3[%c0_8, %c0_9, %c0_10] : memref<1x1x128xf32, #tpu.memory_space<vmem>>, vector<1x1x128xf32>
    %12 = vector.shape_cast %11 : vector<1x1x128xf32> to vector<1x128xf32>
    %13 = vector.shape_cast %10 : vector<1x128xf32> to vector<1x1x128xf32>
    tpu.vector_store %arg3[%c0_8, %c0_9, %c0_10], %13 {strides = array<i32>} : memref<1x1x128xf32, #tpu.memory_space<vmem>>, vector<1x1x128xf32>,
    %c0_11 = arith.constant 0 : index
    %c0_12 = arith.constant 0 : index
    %c0_13 = arith.constant 0 : index
    %14 = vector.load %arg4[%c0_11, %c0_12, %c0_13] : memref<1x1x128xf32, #tpu.memory_space<vmem>>, vector<1x1x128xf32>
    %15 = vector.shape_cast %14 : vector<1x1x128xf32> to vector<1x128xf32>
    %16 = arith.mulf %4, %4 : vector<8x16x128xf32>
    %cst_14 = arith.constant dense<0.000000e+00> : vector<16x128xf32>
    %17 = vector.multi_reduction <add>, %16, %cst_14 [0] : vector<8x16x128xf32> to vector<16x128xf32>
    %cst_15 = arith.constant dense<0.000000e+00> : vector<128xf32>
    %18 = vector.multi_reduction <add>, %17, %cst_15 [0] : vector<16x128xf32> to vector<128xf32>
    %19 = vector.shape_cast %18 : vector<128xf32> to vector<1x128xf32>
    %20 = arith.addf %15, %19 : vector<1x128xf32>
    %c0_16 = arith.constant 0 : index
    %c0_17 = arith.constant 0 : index
    %c0_18 = arith.constant 0 : index
    %21 = vector.load %arg4[%c0_16, %c0_17, %c0_18] : memref<1x1x128xf32, #tpu.memory_space<vmem>>, vector<1x1x128xf32>
    %22 = vector.shape_cast %21 : vector<1x1x128xf32> to vector<1x128xf32>
    %23 = vector.shape_cast %20 : vector<1x128xf32> to vector<1x1x128xf32>
    tpu.vector_store %arg4[%c0_16, %c0_17, %c0_18], %23 {strides = array<i32>} : memref<1x1x128xf32, #tpu.memory_space<vmem>>, vector<1x1x128xf32>,
    return
  }
  func.func @transform_0(%arg0: i32, %arg1: i32) -> (i32, i32, i32, i32) {
    %c0_i32 = arith.constant 0 : i32
    %c0_i32_0 = arith.constant 0 : i32
    %c0_i32_1 = arith.constant 0 : i32
    return %arg0, %arg1, %c0_i32, %c0_i32_0 : i32, i32, i32, i32
  }
  func.func @transform_1(%arg0: i32, %arg1: i32) -> (i32, i32, i32) {
    %c0_i32 = arith.constant 0 : i32
    %c0_i32_0 = arith.constant 0 : i32
    %c0_i32_1 = arith.constant 0 : i32
    return %arg0, %c0_i32, %c0_i32_0 : i32, i32, i32
  }
  func.func @transform_2(%arg0: i32, %arg1: i32) -> (i32, i32, i32) {
    %c0_i32 = arith.constant 0 : i32
    %c0_i32_0 = arith.constant 0 : i32
    %c0_i32_1 = arith.constant 0 : i32
    return %arg0, %c0_i32, %c0_i32_0 : i32, i32, i32
  }
}

module attributes {stable_mosaic.version = 11 : i64} {
  func.func @kernel(%arg0: i32, %arg1: i32, %arg2: memref<1x1x128xf32, #tpu.memory_space<vmem>>, %arg3: memref<1x1x128xf32, #tpu.memory_space<vmem>>, %arg4: memref<1x16x16x128xf32, #tpu.memory_space<vmem>>, %arg5: memref<3x3x128x128xbf16, #tpu.memory_space<vmem>>, %arg6: memref<1x8x16x128xf32, #tpu.memory_space<vmem>>, %arg7: memref<10x32x128xf32, #tpu.memory_space<vmem>>) attributes {dimension_semantics = [#tpu.dimension_semantics<parallel>, #tpu.dimension_semantics<parallel>], iteration_bounds = array<i64: 2, 2>, scalar_prefetch = 0 : i64, scratch_operands = 1 : i64, tpu.core_type = #tpu.core_type<tc>, window_params = [{transform_indices = @transform_0, window_bounds = array<i64: 1, 1, 128>}, {transform_indices = @transform_1, window_bounds = array<i64: 1, 1, 128>}, {transform_indices = @transform_2, window_bounds = array<i64: 1, 16, 16, 128>}, {pipeline_mode = #tpu.pipeline_mode<synchronous>, transform_indices = @transform_3, window_bounds = array<i64: 3, 3, 128, 128>}, {transform_indices = @transform_4, window_bounds = array<i64: 1, 8, 16, 128>}]} {
    %c8_i32 = arith.constant 8 : i32
    %0 = arith.muli %arg1, %c8_i32 : i32
    %c0 = arith.constant 0 : index
    %c0_0 = arith.constant 0 : index
    %c0_1 = arith.constant 0 : index
    %1 = vector.load %arg2[%c0, %c0_0, %c0_1] : memref<1x1x128xf32, #tpu.memory_space<vmem>>, vector<1x1x128xf32>
    %2 = vector.shape_cast %1 : vector<1x1x128xf32> to vector<1x128xf32>
    %c0_2 = arith.constant 0 : index
    %c0_3 = arith.constant 0 : index
    %c0_4 = arith.constant 0 : index
    %3 = vector.load %arg3[%c0_2, %c0_3, %c0_4] : memref<1x1x128xf32, #tpu.memory_space<vmem>>, vector<1x1x128xf32>
    %4 = vector.shape_cast %3 : vector<1x1x128xf32> to vector<1x128xf32>
    %cst = arith.constant 0.000000e+00 : f32
    %5 = vector.broadcast %cst : f32 to vector<10x32x128xf32>
    %c0_5 = arith.constant 0 : index
    %c0_6 = arith.constant 0 : index
    %c0_7 = arith.constant 0 : index
    %6 = vector.load %arg7[%c0_5, %c0_6, %c0_7] : memref<10x32x128xf32, #tpu.memory_space<vmem>>, vector<10x32x128xf32>
    tpu.vector_store %arg7[%c0_5, %c0_6, %c0_7], %5 {strides = array<i32>} : memref<10x32x128xf32, #tpu.memory_space<vmem>>, vector<10x32x128xf32>,
    %c0_8 = arith.constant 0 : index
    %7 = arith.index_cast %0 : i32 to index
    %c0_9 = arith.constant 0 : index
    %c0_10 = arith.constant 0 : index
    %8 = vector.load %arg4[%c0_8, %7, %c0_9, %c0_10] : memref<1x16x16x128xf32, #tpu.memory_space<vmem>>, vector<1x8x16x128xf32>
    %9 = vector.shape_cast %8 : vector<1x8x16x128xf32> to vector<8x16x128xf32>
    %10 = vector.shape_cast %2 : vector<1x128xf32> to vector<1x1x128xf32>
    %11 = vector.broadcast %10 : vector<1x1x128xf32> to vector<8x16x128xf32>
    %12 = arith.mulf %9, %11 : vector<8x16x128xf32>
    %13 = vector.shape_cast %4 : vector<1x128xf32> to vector<1x1x128xf32>
    %14 = vector.broadcast %13 : vector<1x1x128xf32> to vector<8x16x128xf32>
    %15 = arith.addf %12, %14 : vector<8x16x128xf32>
    %16 = arith.negf %15 : vector<8x16x128xf32>
    %17 = math.exp %16 : vector<8x16x128xf32>
    %cst_11 = arith.constant 1.000000e+00 : f32
    %18 = vector.broadcast %cst_11 : f32 to vector<8x16x128xf32>
    %19 = arith.addf %18, %17 : vector<8x16x128xf32>
    %20 = arith.divf %18, %19 : vector<8x16x128xf32>
    %21 = arith.mulf %15, %20 : vector<8x16x128xf32>
    %c1 = arith.constant 1 : index
    %c8 = arith.constant 8 : index
    %c0_12 = arith.constant 0 : index
    %22 = vector.load %arg7[%c1, %c8, %c0_12] : memref<10x32x128xf32, #tpu.memory_space<vmem>>, vector<8x16x128xf32>
    tpu.vector_store %arg7[%c1, %c8, %c0_12], %21 {strides = array<i32>} : memref<10x32x128xf32, #tpu.memory_space<vmem>>, vector<8x16x128xf32>,
    %c0_i32 = arith.constant 0 : i32
    %23 = arith.cmpi sgt, %arg1, %c0_i32 : i32
    %24 = arith.extui %23 : i1 to i32
    %c0_i32_13 = arith.constant 0 : i32
    %25 = arith.cmpi ne, %24, %c0_i32_13 : i32
    scf.if %25 {
      %c1_i32_89 = arith.constant 1 : i32
      %97 = arith.subi %0, %c1_i32_89 : i32
      %c0_90 = arith.constant 0 : index
      %98 = arith.index_cast %97 : i32 to index
      %c0_91 = arith.constant 0 : index
      %c0_92 = arith.constant 0 : index
      %99 = vector.load %arg4[%c0_90, %98, %c0_91, %c0_92] : memref<1x16x16x128xf32, #tpu.memory_space<vmem>>, vector<1x1x16x128xf32>
      %100 = vector.shape_cast %99 : vector<1x1x16x128xf32> to vector<1x16x128xf32>
      %101 = vector.shape_cast %2 : vector<1x128xf32> to vector<1x1x128xf32>
      %102 = vector.broadcast %101 : vector<1x1x128xf32> to vector<1x16x128xf32>
      %103 = arith.mulf %100, %102 : vector<1x16x128xf32>
      %104 = vector.shape_cast %4 : vector<1x128xf32> to vector<1x1x128xf32>
      %105 = vector.broadcast %104 : vector<1x1x128xf32> to vector<1x16x128xf32>
      %106 = arith.addf %103, %105 : vector<1x16x128xf32>
      %107 = arith.negf %106 : vector<1x16x128xf32>
      %108 = math.exp %107 : vector<1x16x128xf32>
      %cst_93 = arith.constant 1.000000e+00 : f32
      %109 = vector.broadcast %cst_93 : f32 to vector<1x16x128xf32>
      %110 = arith.addf %109, %108 : vector<1x16x128xf32>
      %111 = arith.divf %109, %110 : vector<1x16x128xf32>
      %112 = arith.mulf %106, %111 : vector<1x16x128xf32>
      %c0_94 = arith.constant 0 : index
      %c8_95 = arith.constant 8 : index
      %c0_96 = arith.constant 0 : index
      %113 = vector.load %arg7[%c0_94, %c8_95, %c0_96] : memref<10x32x128xf32, #tpu.memory_space<vmem>>, vector<1x16x128xf32>
      tpu.vector_store %arg7[%c0_94, %c8_95, %c0_96], %112 {strides = array<i32>} : memref<10x32x128xf32, #tpu.memory_space<vmem>>, vector<1x16x128xf32>,
    } else {
    }
    %c1_i32 = arith.constant 1 : i32
    %26 = arith.cmpi slt, %arg1, %c1_i32 : i32
    %27 = arith.extui %26 : i1 to i32
    %c0_i32_14 = arith.constant 0 : i32
    %28 = arith.cmpi ne, %27, %c0_i32_14 : i32
    scf.if %28 {
      %c8_i32_89 = arith.constant 8 : i32
      %97 = arith.addi %0, %c8_i32_89 : i32
      %c0_90 = arith.constant 0 : index
      %98 = arith.index_cast %97 : i32 to index
      %c0_91 = arith.constant 0 : index
      %c0_92 = arith.constant 0 : index
      %99 = vector.load %arg4[%c0_90, %98, %c0_91, %c0_92] : memref<1x16x16x128xf32, #tpu.memory_space<vmem>>, vector<1x1x16x128xf32>
      %100 = vector.shape_cast %99 : vector<1x1x16x128xf32> to vector<1x16x128xf32>
      %101 = vector.shape_cast %2 : vector<1x128xf32> to vector<1x1x128xf32>
      %102 = vector.broadcast %101 : vector<1x1x128xf32> to vector<1x16x128xf32>
      %103 = arith.mulf %100, %102 : vector<1x16x128xf32>
      %104 = vector.shape_cast %4 : vector<1x128xf32> to vector<1x1x128xf32>
      %105 = vector.broadcast %104 : vector<1x1x128xf32> to vector<1x16x128xf32>
      %106 = arith.addf %103, %105 : vector<1x16x128xf32>
      %107 = arith.negf %106 : vector<1x16x128xf32>
      %108 = math.exp %107 : vector<1x16x128xf32>
      %cst_93 = arith.constant 1.000000e+00 : f32
      %109 = vector.broadcast %cst_93 : f32 to vector<1x16x128xf32>
      %110 = arith.addf %109, %108 : vector<1x16x128xf32>
      %111 = arith.divf %109, %110 : vector<1x16x128xf32>
      %112 = arith.mulf %106, %111 : vector<1x16x128xf32>
      %c9_94 = arith.constant 9 : index
      %c8_95 = arith.constant 8 : index
      %c0_96 = arith.constant 0 : index
      %113 = vector.load %arg7[%c9_94, %c8_95, %c0_96] : memref<10x32x128xf32, #tpu.memory_space<vmem>>, vector<1x16x128xf32>
      tpu.vector_store %arg7[%c9_94, %c8_95, %c0_96], %112 {strides = array<i32>} : memref<10x32x128xf32, #tpu.memory_space<vmem>>, vector<1x16x128xf32>,
    } else {
    }
    %cst_15 = arith.constant 0.000000e+00 : f32
    %29 = vector.broadcast %cst_15 : f32 to vector<128x128xf32>
    %c0_16 = arith.constant 0 : index
    %c7 = arith.constant 7 : index
    %c0_17 = arith.constant 0 : index
    %30 = vector.load %arg7[%c0_16, %c7, %c0_17] : memref<10x32x128xf32, #tpu.memory_space<vmem>>, vector<8x16x128xf32>
    %31 = arith.truncf %30 : vector<8x16x128xf32> to vector<8x16x128xbf16>
    %32 = vector.shape_cast %31 : vector<8x16x128xbf16> to vector<128x128xbf16>
    %c0_18 = arith.constant 0 : index
    %c0_19 = arith.constant 0 : index
    %c0_20 = arith.constant 0 : index
    %c0_21 = arith.constant 0 : index
    %33 = vector.load %arg5[%c0_18, %c0_19, %c0_20, %c0_21] : memref<3x3x128x128xbf16, #tpu.memory_space<vmem>>, vector<1x1x128x128xbf16>
    %34 = vector.shape_cast %33 : vector<1x1x128x128xbf16> to vector<128x128xbf16>
    %cst_22 = arith.constant dense<0.000000e+00> : vector<128x128xf32>
    %35 = tpu.matmul %32, %34, %cst_22 {dimension_numbers = #tpu.dot_dimension_numbers<[1], [0], [0], [1], [0, 0, 1, 1], [], []>} : vector<128x128xbf16>, vector<128x128xbf16>, vector<128x128xf32> -> vector<128x128xf32>
    %36 = arith.addf %29, %35 : vector<128x128xf32>
    %c0_23 = arith.constant 0 : index
    %c8_24 = arith.constant 8 : index
    %c0_25 = arith.constant 0 : index
    %37 = vector.load %arg7[%c0_23, %c8_24, %c0_25] : memref<10x32x128xf32, #tpu.memory_space<vmem>>, vector<8x16x128xf32>
    %38 = arith.truncf %37 : vector<8x16x128xf32> to vector<8x16x128xbf16>
    %39 = vector.shape_cast %38 : vector<8x16x128xbf16> to vector<128x128xbf16>
    %c0_26 = arith.constant 0 : index
    %c1_27 = arith.constant 1 : index
    %c0_28 = arith.constant 0 : index
    %c0_29 = arith.constant 0 : index
    %40 = vector.load %arg5[%c0_26, %c1_27, %c0_28, %c0_29] : memref<3x3x128x128xbf16, #tpu.memory_space<vmem>>, vector<1x1x128x128xbf16>
    %41 = vector.shape_cast %40 : vector<1x1x128x128xbf16> to vector<128x128xbf16>
    %cst_30 = arith.constant dense<0.000000e+00> : vector<128x128xf32>
    %42 = tpu.matmul %39, %41, %cst_30 {dimension_numbers = #tpu.dot_dimension_numbers<[1], [0], [0], [1], [0, 0, 1, 1], [], []>} : vector<128x128xbf16>, vector<128x128xbf16>, vector<128x128xf32> -> vector<128x128xf32>
    %43 = arith.addf %36, %42 : vector<128x128xf32>
    %c0_31 = arith.constant 0 : index
    %c9 = arith.constant 9 : index
    %c0_32 = arith.constant 0 : index
    %44 = vector.load %arg7[%c0_31, %c9, %c0_32] : memref<10x32x128xf32, #tpu.memory_space<vmem>>, vector<8x16x128xf32>
    %45 = arith.truncf %44 : vector<8x16x128xf32> to vector<8x16x128xbf16>
    %46 = vector.shape_cast %45 : vector<8x16x128xbf16> to vector<128x128xbf16>
    %c0_33 = arith.constant 0 : index
    %c2 = arith.constant 2 : index
    %c0_34 = arith.constant 0 : index
    %c0_35 = arith.constant 0 : index
    %47 = vector.load %arg5[%c0_33, %c2, %c0_34, %c0_35] : memref<3x3x128x128xbf16, #tpu.memory_space<vmem>>, vector<1x1x128x128xbf16>
    %48 = vector.shape_cast %47 : vector<1x1x128x128xbf16> to vector<128x128xbf16>
    %cst_36 = arith.constant dense<0.000000e+00> : vector<128x128xf32>
    %49 = tpu.matmul %46, %48, %cst_36 {dimension_numbers = #tpu.dot_dimension_numbers<[1], [0], [0], [1], [0, 0, 1, 1], [], []>} : vector<128x128xbf16>, vector<128x128xbf16>, vector<128x128xf32> -> vector<128x128xf32>
    %50 = arith.addf %43, %49 : vector<128x128xf32>
    %c1_37 = arith.constant 1 : index
    %c7_38 = arith.constant 7 : index
    %c0_39 = arith.constant 0 : index
    %51 = vector.load %arg7[%c1_37, %c7_38, %c0_39] : memref<10x32x128xf32, #tpu.memory_space<vmem>>, vector<8x16x128xf32>
    %52 = arith.truncf %51 : vector<8x16x128xf32> to vector<8x16x128xbf16>
    %53 = vector.shape_cast %52 : vector<8x16x128xbf16> to vector<128x128xbf16>
    %c1_40 = arith.constant 1 : index
    %c0_41 = arith.constant 0 : index
    %c0_42 = arith.constant 0 : index
    %c0_43 = arith.constant 0 : index
    %54 = vector.load %arg5[%c1_40, %c0_41, %c0_42, %c0_43] : memref<3x3x128x128xbf16, #tpu.memory_space<vmem>>, vector<1x1x128x128xbf16>
    %55 = vector.shape_cast %54 : vector<1x1x128x128xbf16> to vector<128x128xbf16>
    %cst_44 = arith.constant dense<0.000000e+00> : vector<128x128xf32>
    %56 = tpu.matmul %53, %55, %cst_44 {dimension_numbers = #tpu.dot_dimension_numbers<[1], [0], [0], [1], [0, 0, 1, 1], [], []>} : vector<128x128xbf16>, vector<128x128xbf16>, vector<128x128xf32> -> vector<128x128xf32>
    %57 = arith.addf %50, %56 : vector<128x128xf32>
    %c1_45 = arith.constant 1 : index
    %c8_46 = arith.constant 8 : index
    %c0_47 = arith.constant 0 : index
    %58 = vector.load %arg7[%c1_45, %c8_46, %c0_47] : memref<10x32x128xf32, #tpu.memory_space<vmem>>, vector<8x16x128xf32>
    %59 = arith.truncf %58 : vector<8x16x128xf32> to vector<8x16x128xbf16>
    %60 = vector.shape_cast %59 : vector<8x16x128xbf16> to vector<128x128xbf16>
    %c1_48 = arith.constant 1 : index
    %c1_49 = arith.constant 1 : index
    %c0_50 = arith.constant 0 : index
    %c0_51 = arith.constant 0 : index
    %61 = vector.load %arg5[%c1_48, %c1_49, %c0_50, %c0_51] : memref<3x3x128x128xbf16, #tpu.memory_space<vmem>>, vector<1x1x128x128xbf16>
    %62 = vector.shape_cast %61 : vector<1x1x128x128xbf16> to vector<128x128xbf16>
    %cst_52 = arith.constant dense<0.000000e+00> : vector<128x128xf32>
    %63 = tpu.matmul %60, %62, %cst_52 {dimension_numbers = #tpu.dot_dimension_numbers<[1], [0], [0], [1], [0, 0, 1, 1], [], []>} : vector<128x128xbf16>, vector<128x128xbf16>, vector<128x128xf32> -> vector<128x128xf32>
    %64 = arith.addf %57, %63 : vector<128x128xf32>
    %c1_53 = arith.constant 1 : index
    %c9_54 = arith.constant 9 : index
    %c0_55 = arith.constant 0 : index
    %65 = vector.load %arg7[%c1_53, %c9_54, %c0_55] : memref<10x32x128xf32, #tpu.memory_space<vmem>>, vector<8x16x128xf32>
    %66 = arith.truncf %65 : vector<8x16x128xf32> to vector<8x16x128xbf16>
    %67 = vector.shape_cast %66 : vector<8x16x128xbf16> to vector<128x128xbf16>
    %c1_56 = arith.constant 1 : index
    %c2_57 = arith.constant 2 : index
    %c0_58 = arith.constant 0 : index
    %c0_59 = arith.constant 0 : index
    %68 = vector.load %arg5[%c1_56, %c2_57, %c0_58, %c0_59] : memref<3x3x128x128xbf16, #tpu.memory_space<vmem>>, vector<1x1x128x128xbf16>
    %69 = vector.shape_cast %68 : vector<1x1x128x128xbf16> to vector<128x128xbf16>
    %cst_60 = arith.constant dense<0.000000e+00> : vector<128x128xf32>
    %70 = tpu.matmul %67, %69, %cst_60 {dimension_numbers = #tpu.dot_dimension_numbers<[1], [0], [0], [1], [0, 0, 1, 1], [], []>} : vector<128x128xbf16>, vector<128x128xbf16>, vector<128x128xf32> -> vector<128x128xf32>
    %71 = arith.addf %64, %70 : vector<128x128xf32>
    %c2_61 = arith.constant 2 : index
    %c7_62 = arith.constant 7 : index
    %c0_63 = arith.constant 0 : index
    %72 = vector.load %arg7[%c2_61, %c7_62, %c0_63] : memref<10x32x128xf32, #tpu.memory_space<vmem>>, vector<8x16x128xf32>
    %73 = arith.truncf %72 : vector<8x16x128xf32> to vector<8x16x128xbf16>
    %74 = vector.shape_cast %73 : vector<8x16x128xbf16> to vector<128x128xbf16>
    %c2_64 = arith.constant 2 : index
    %c0_65 = arith.constant 0 : index
    %c0_66 = arith.constant 0 : index
    %c0_67 = arith.constant 0 : index
    %75 = vector.load %arg5[%c2_64, %c0_65, %c0_66, %c0_67] : memref<3x3x128x128xbf16, #tpu.memory_space<vmem>>, vector<1x1x128x128xbf16>
    %76 = vector.shape_cast %75 : vector<1x1x128x128xbf16> to vector<128x128xbf16>
    %cst_68 = arith.constant dense<0.000000e+00> : vector<128x128xf32>
    %77 = tpu.matmul %74, %76, %cst_68 {dimension_numbers = #tpu.dot_dimension_numbers<[1], [0], [0], [1], [0, 0, 1, 1], [], []>} : vector<128x128xbf16>, vector<128x128xbf16>, vector<128x128xf32> -> vector<128x128xf32>
    %78 = arith.addf %71, %77 : vector<128x128xf32>
    %c2_69 = arith.constant 2 : index
    %c8_70 = arith.constant 8 : index
    %c0_71 = arith.constant 0 : index
    %79 = vector.load %arg7[%c2_69, %c8_70, %c0_71] : memref<10x32x128xf32, #tpu.memory_space<vmem>>, vector<8x16x128xf32>
    %80 = arith.truncf %79 : vector<8x16x128xf32> to vector<8x16x128xbf16>
    %81 = vector.shape_cast %80 : vector<8x16x128xbf16> to vector<128x128xbf16>
    %c2_72 = arith.constant 2 : index
    %c1_73 = arith.constant 1 : index
    %c0_74 = arith.constant 0 : index
    %c0_75 = arith.constant 0 : index
    %82 = vector.load %arg5[%c2_72, %c1_73, %c0_74, %c0_75] : memref<3x3x128x128xbf16, #tpu.memory_space<vmem>>, vector<1x1x128x128xbf16>
    %83 = vector.shape_cast %82 : vector<1x1x128x128xbf16> to vector<128x128xbf16>
    %cst_76 = arith.constant dense<0.000000e+00> : vector<128x128xf32>
    %84 = tpu.matmul %81, %83, %cst_76 {dimension_numbers = #tpu.dot_dimension_numbers<[1], [0], [0], [1], [0, 0, 1, 1], [], []>} : vector<128x128xbf16>, vector<128x128xbf16>, vector<128x128xf32> -> vector<128x128xf32>
    %85 = arith.addf %78, %84 : vector<128x128xf32>
    %c2_77 = arith.constant 2 : index
    %c9_78 = arith.constant 9 : index
    %c0_79 = arith.constant 0 : index
    %86 = vector.load %arg7[%c2_77, %c9_78, %c0_79] : memref<10x32x128xf32, #tpu.memory_space<vmem>>, vector<8x16x128xf32>
    %87 = arith.truncf %86 : vector<8x16x128xf32> to vector<8x16x128xbf16>
    %88 = vector.shape_cast %87 : vector<8x16x128xbf16> to vector<128x128xbf16>
    %c2_80 = arith.constant 2 : index
    %c2_81 = arith.constant 2 : index
    %c0_82 = arith.constant 0 : index
    %c0_83 = arith.constant 0 : index
    %89 = vector.load %arg5[%c2_80, %c2_81, %c0_82, %c0_83] : memref<3x3x128x128xbf16, #tpu.memory_space<vmem>>, vector<1x1x128x128xbf16>
    %90 = vector.shape_cast %89 : vector<1x1x128x128xbf16> to vector<128x128xbf16>
    %cst_84 = arith.constant dense<0.000000e+00> : vector<128x128xf32>
    %91 = tpu.matmul %88, %90, %cst_84 {dimension_numbers = #tpu.dot_dimension_numbers<[1], [0], [0], [1], [0, 0, 1, 1], [], []>} : vector<128x128xbf16>, vector<128x128xbf16>, vector<128x128xf32> -> vector<128x128xf32>
    %92 = arith.addf %85, %91 : vector<128x128xf32>
    %93 = vector.shape_cast %92 : vector<128x128xf32> to vector<8x16x128xf32>
    %c0_85 = arith.constant 0 : index
    %c0_86 = arith.constant 0 : index
    %c0_87 = arith.constant 0 : index
    %c0_88 = arith.constant 0 : index
    %94 = vector.load %arg6[%c0_85, %c0_86, %c0_87, %c0_88] : memref<1x8x16x128xf32, #tpu.memory_space<vmem>>, vector<1x8x16x128xf32>
    %95 = vector.shape_cast %94 : vector<1x8x16x128xf32> to vector<8x16x128xf32>
    %96 = vector.shape_cast %93 : vector<8x16x128xf32> to vector<1x8x16x128xf32>
    tpu.vector_store %arg6[%c0_85, %c0_86, %c0_87, %c0_88], %96 {strides = array<i32>} : memref<1x8x16x128xf32, #tpu.memory_space<vmem>>, vector<1x8x16x128xf32>,
    return
  }
  func.func @transform_0(%arg0: i32, %arg1: i32) -> (i32, i32, i32) {
    %c0_i32 = arith.constant 0 : i32
    %c0_i32_0 = arith.constant 0 : i32
    %c0_i32_1 = arith.constant 0 : i32
    return %arg0, %c0_i32, %c0_i32_0 : i32, i32, i32
  }
  func.func @transform_1(%arg0: i32, %arg1: i32) -> (i32, i32, i32) {
    %c0_i32 = arith.constant 0 : i32
    %c0_i32_0 = arith.constant 0 : i32
    %c0_i32_1 = arith.constant 0 : i32
    return %arg0, %c0_i32, %c0_i32_0 : i32, i32, i32
  }
  func.func @transform_2(%arg0: i32, %arg1: i32) -> (i32, i32, i32, i32) {
    %c0_i32 = arith.constant 0 : i32
    %c0_i32_0 = arith.constant 0 : i32
    %c0_i32_1 = arith.constant 0 : i32
    %c0_i32_2 = arith.constant 0 : i32
    return %arg0, %c0_i32, %c0_i32_0, %c0_i32_1 : i32, i32, i32, i32
  }
  func.func @transform_3(%arg0: i32, %arg1: i32) -> (i32, i32, i32, i32) {
    %c0_i32 = arith.constant 0 : i32
    %c0_i32_0 = arith.constant 0 : i32
    %c0_i32_1 = arith.constant 0 : i32
    %c0_i32_2 = arith.constant 0 : i32
    %c0_i32_3 = arith.constant 0 : i32
    return %c0_i32, %c0_i32_0, %c0_i32_1, %c0_i32_2 : i32, i32, i32, i32
  }
  func.func @transform_4(%arg0: i32, %arg1: i32) -> (i32, i32, i32, i32) {
    %c0_i32 = arith.constant 0 : i32
    %c0_i32_0 = arith.constant 0 : i32
    %c0_i32_1 = arith.constant 0 : i32
    return %arg0, %arg1, %c0_i32, %c0_i32_0 : i32, i32, i32, i32
  }
}

module attributes {stable_mosaic.version = 11 : i64} {
  func.func @kernel(%arg0: i32, %arg1: i32, %arg2: memref<1x1x128xf32, #tpu.memory_space<vmem>>, %arg3: memref<1x1x128xf32, #tpu.memory_space<vmem>>, %arg4: memref<1x16x16x128xf32, #tpu.memory_space<vmem>>, %arg5: memref<3x3x128x128xbf16, #tpu.memory_space<vmem>>, %arg6: memref<1x8x16x128xf32, #tpu.memory_space<vmem>>, %arg7: memref<1x8x16x128xf32, #tpu.memory_space<vmem>>, %arg8: memref<10x32x128xf32, #tpu.memory_space<vmem>>) attributes {dimension_semantics = [#tpu.dimension_semantics<parallel>, #tpu.dimension_semantics<parallel>], iteration_bounds = array<i64: 2, 2>, scalar_prefetch = 0 : i64, scratch_operands = 1 : i64, tpu.core_type = #tpu.core_type<tc>, window_params = [{transform_indices = @transform_0, window_bounds = array<i64: 1, 1, 128>}, {transform_indices = @transform_1, window_bounds = array<i64: 1, 1, 128>}, {transform_indices = @transform_2, window_bounds = array<i64: 1, 16, 16, 128>}, {pipeline_mode = #tpu.pipeline_mode<synchronous>, transform_indices = @transform_3, window_bounds = array<i64: 3, 3, 128, 128>}, {transform_indices = @transform_4, window_bounds = array<i64: 1, 8, 16, 128>}, {transform_indices = @transform_5, window_bounds = array<i64: 1, 8, 16, 128>}]} {
    %c8_i32 = arith.constant 8 : i32
    %0 = arith.muli %arg1, %c8_i32 : i32
    %c0 = arith.constant 0 : index
    %c0_0 = arith.constant 0 : index
    %c0_1 = arith.constant 0 : index
    %1 = vector.load %arg2[%c0, %c0_0, %c0_1] : memref<1x1x128xf32, #tpu.memory_space<vmem>>, vector<1x1x128xf32>
    %2 = vector.shape_cast %1 : vector<1x1x128xf32> to vector<1x128xf32>
    %c0_2 = arith.constant 0 : index
    %c0_3 = arith.constant 0 : index
    %c0_4 = arith.constant 0 : index
    %3 = vector.load %arg3[%c0_2, %c0_3, %c0_4] : memref<1x1x128xf32, #tpu.memory_space<vmem>>, vector<1x1x128xf32>
    %4 = vector.shape_cast %3 : vector<1x1x128xf32> to vector<1x128xf32>
    %cst = arith.constant 0.000000e+00 : f32
    %5 = vector.broadcast %cst : f32 to vector<10x32x128xf32>
    %c0_5 = arith.constant 0 : index
    %c0_6 = arith.constant 0 : index
    %c0_7 = arith.constant 0 : index
    %6 = vector.load %arg8[%c0_5, %c0_6, %c0_7] : memref<10x32x128xf32, #tpu.memory_space<vmem>>, vector<10x32x128xf32>
    tpu.vector_store %arg8[%c0_5, %c0_6, %c0_7], %5 {strides = array<i32>} : memref<10x32x128xf32, #tpu.memory_space<vmem>>, vector<10x32x128xf32>,
    %c0_8 = arith.constant 0 : index
    %7 = arith.index_cast %0 : i32 to index
    %c0_9 = arith.constant 0 : index
    %c0_10 = arith.constant 0 : index
    %8 = vector.load %arg4[%c0_8, %7, %c0_9, %c0_10] : memref<1x16x16x128xf32, #tpu.memory_space<vmem>>, vector<1x8x16x128xf32>
    %9 = vector.shape_cast %8 : vector<1x8x16x128xf32> to vector<8x16x128xf32>
    %10 = vector.shape_cast %2 : vector<1x128xf32> to vector<1x1x128xf32>
    %11 = vector.broadcast %10 : vector<1x1x128xf32> to vector<8x16x128xf32>
    %12 = arith.mulf %9, %11 : vector<8x16x128xf32>
    %13 = vector.shape_cast %4 : vector<1x128xf32> to vector<1x1x128xf32>
    %14 = vector.broadcast %13 : vector<1x1x128xf32> to vector<8x16x128xf32>
    %15 = arith.addf %12, %14 : vector<8x16x128xf32>
    %16 = arith.negf %15 : vector<8x16x128xf32>
    %17 = math.exp %16 : vector<8x16x128xf32>
    %cst_11 = arith.constant 1.000000e+00 : f32
    %18 = vector.broadcast %cst_11 : f32 to vector<8x16x128xf32>
    %19 = arith.addf %18, %17 : vector<8x16x128xf32>
    %20 = arith.divf %18, %19 : vector<8x16x128xf32>
    %21 = arith.mulf %15, %20 : vector<8x16x128xf32>
    %c1 = arith.constant 1 : index
    %c8 = arith.constant 8 : index
    %c0_12 = arith.constant 0 : index
    %22 = vector.load %arg8[%c1, %c8, %c0_12] : memref<10x32x128xf32, #tpu.memory_space<vmem>>, vector<8x16x128xf32>
    tpu.vector_store %arg8[%c1, %c8, %c0_12], %21 {strides = array<i32>} : memref<10x32x128xf32, #tpu.memory_space<vmem>>, vector<8x16x128xf32>,
    %c0_i32 = arith.constant 0 : i32
    %23 = arith.cmpi sgt, %arg1, %c0_i32 : i32
    %24 = arith.extui %23 : i1 to i32
    %c0_i32_13 = arith.constant 0 : i32
    %25 = arith.cmpi ne, %24, %c0_i32_13 : i32
    scf.if %25 {
      %c1_i32_92 = arith.constant 1 : i32
      %99 = arith.subi %0, %c1_i32_92 : i32
      %c0_93 = arith.constant 0 : index
      %100 = arith.index_cast %99 : i32 to index
      %c0_94 = arith.constant 0 : index
      %c0_95 = arith.constant 0 : index
      %101 = vector.load %arg4[%c0_93, %100, %c0_94, %c0_95] : memref<1x16x16x128xf32, #tpu.memory_space<vmem>>, vector<1x1x16x128xf32>
      %102 = vector.shape_cast %101 : vector<1x1x16x128xf32> to vector<1x16x128xf32>
      %103 = vector.shape_cast %2 : vector<1x128xf32> to vector<1x1x128xf32>
      %104 = vector.broadcast %103 : vector<1x1x128xf32> to vector<1x16x128xf32>
      %105 = arith.mulf %102, %104 : vector<1x16x128xf32>
      %106 = vector.shape_cast %4 : vector<1x128xf32> to vector<1x1x128xf32>
      %107 = vector.broadcast %106 : vector<1x1x128xf32> to vector<1x16x128xf32>
      %108 = arith.addf %105, %107 : vector<1x16x128xf32>
      %109 = arith.negf %108 : vector<1x16x128xf32>
      %110 = math.exp %109 : vector<1x16x128xf32>
      %cst_96 = arith.constant 1.000000e+00 : f32
      %111 = vector.broadcast %cst_96 : f32 to vector<1x16x128xf32>
      %112 = arith.addf %111, %110 : vector<1x16x128xf32>
      %113 = arith.divf %111, %112 : vector<1x16x128xf32>
      %114 = arith.mulf %108, %113 : vector<1x16x128xf32>
      %c0_97 = arith.constant 0 : index
      %c8_98 = arith.constant 8 : index
      %c0_99 = arith.constant 0 : index
      %115 = vector.load %arg8[%c0_97, %c8_98, %c0_99] : memref<10x32x128xf32, #tpu.memory_space<vmem>>, vector<1x16x128xf32>
      tpu.vector_store %arg8[%c0_97, %c8_98, %c0_99], %114 {strides = array<i32>} : memref<10x32x128xf32, #tpu.memory_space<vmem>>, vector<1x16x128xf32>,
    } else {
    }
    %c1_i32 = arith.constant 1 : i32
    %26 = arith.cmpi slt, %arg1, %c1_i32 : i32
    %27 = arith.extui %26 : i1 to i32
    %c0_i32_14 = arith.constant 0 : i32
    %28 = arith.cmpi ne, %27, %c0_i32_14 : i32
    scf.if %28 {
      %c8_i32_92 = arith.constant 8 : i32
      %99 = arith.addi %0, %c8_i32_92 : i32
      %c0_93 = arith.constant 0 : index
      %100 = arith.index_cast %99 : i32 to index
      %c0_94 = arith.constant 0 : index
      %c0_95 = arith.constant 0 : index
      %101 = vector.load %arg4[%c0_93, %100, %c0_94, %c0_95] : memref<1x16x16x128xf32, #tpu.memory_space<vmem>>, vector<1x1x16x128xf32>
      %102 = vector.shape_cast %101 : vector<1x1x16x128xf32> to vector<1x16x128xf32>
      %103 = vector.shape_cast %2 : vector<1x128xf32> to vector<1x1x128xf32>
      %104 = vector.broadcast %103 : vector<1x1x128xf32> to vector<1x16x128xf32>
      %105 = arith.mulf %102, %104 : vector<1x16x128xf32>
      %106 = vector.shape_cast %4 : vector<1x128xf32> to vector<1x1x128xf32>
      %107 = vector.broadcast %106 : vector<1x1x128xf32> to vector<1x16x128xf32>
      %108 = arith.addf %105, %107 : vector<1x16x128xf32>
      %109 = arith.negf %108 : vector<1x16x128xf32>
      %110 = math.exp %109 : vector<1x16x128xf32>
      %cst_96 = arith.constant 1.000000e+00 : f32
      %111 = vector.broadcast %cst_96 : f32 to vector<1x16x128xf32>
      %112 = arith.addf %111, %110 : vector<1x16x128xf32>
      %113 = arith.divf %111, %112 : vector<1x16x128xf32>
      %114 = arith.mulf %108, %113 : vector<1x16x128xf32>
      %c9_97 = arith.constant 9 : index
      %c8_98 = arith.constant 8 : index
      %c0_99 = arith.constant 0 : index
      %115 = vector.load %arg8[%c9_97, %c8_98, %c0_99] : memref<10x32x128xf32, #tpu.memory_space<vmem>>, vector<1x16x128xf32>
      tpu.vector_store %arg8[%c9_97, %c8_98, %c0_99], %114 {strides = array<i32>} : memref<10x32x128xf32, #tpu.memory_space<vmem>>, vector<1x16x128xf32>,
    } else {
    }
    %c0_15 = arith.constant 0 : index
    %c0_16 = arith.constant 0 : index
    %c0_17 = arith.constant 0 : index
    %c0_18 = arith.constant 0 : index
    %29 = vector.load %arg6[%c0_15, %c0_16, %c0_17, %c0_18] : memref<1x8x16x128xf32, #tpu.memory_space<vmem>>, vector<1x8x16x128xf32>
    %30 = vector.shape_cast %29 : vector<1x8x16x128xf32> to vector<8x16x128xf32>
    %31 = vector.shape_cast %30 : vector<8x16x128xf32> to vector<128x128xf32>
    %c0_19 = arith.constant 0 : index
    %c7 = arith.constant 7 : index
    %c0_20 = arith.constant 0 : index
    %32 = vector.load %arg8[%c0_19, %c7, %c0_20] : memref<10x32x128xf32, #tpu.memory_space<vmem>>, vector<8x16x128xf32>
    %33 = arith.truncf %32 : vector<8x16x128xf32> to vector<8x16x128xbf16>
    %34 = vector.shape_cast %33 : vector<8x16x128xbf16> to vector<128x128xbf16>
    %c0_21 = arith.constant 0 : index
    %c0_22 = arith.constant 0 : index
    %c0_23 = arith.constant 0 : index
    %c0_24 = arith.constant 0 : index
    %35 = vector.load %arg5[%c0_21, %c0_22, %c0_23, %c0_24] : memref<3x3x128x128xbf16, #tpu.memory_space<vmem>>, vector<1x1x128x128xbf16>
    %36 = vector.shape_cast %35 : vector<1x1x128x128xbf16> to vector<128x128xbf16>
    %cst_25 = arith.constant dense<0.000000e+00> : vector<128x128xf32>
    %37 = tpu.matmul %34, %36, %cst_25 {dimension_numbers = #tpu.dot_dimension_numbers<[1], [0], [0], [1], [0, 0, 1, 1], [], []>} : vector<128x128xbf16>, vector<128x128xbf16>, vector<128x128xf32> -> vector<128x128xf32>
    %38 = arith.addf %31, %37 : vector<128x128xf32>
    %c0_26 = arith.constant 0 : index
    %c8_27 = arith.constant 8 : index
    %c0_28 = arith.constant 0 : index
    %39 = vector.load %arg8[%c0_26, %c8_27, %c0_28] : memref<10x32x128xf32, #tpu.memory_space<vmem>>, vector<8x16x128xf32>
    %40 = arith.truncf %39 : vector<8x16x128xf32> to vector<8x16x128xbf16>
    %41 = vector.shape_cast %40 : vector<8x16x128xbf16> to vector<128x128xbf16>
    %c0_29 = arith.constant 0 : index
    %c1_30 = arith.constant 1 : index
    %c0_31 = arith.constant 0 : index
    %c0_32 = arith.constant 0 : index
    %42 = vector.load %arg5[%c0_29, %c1_30, %c0_31, %c0_32] : memref<3x3x128x128xbf16, #tpu.memory_space<vmem>>, vector<1x1x128x128xbf16>
    %43 = vector.shape_cast %42 : vector<1x1x128x128xbf16> to vector<128x128xbf16>
    %cst_33 = arith.constant dense<0.000000e+00> : vector<128x128xf32>
    %44 = tpu.matmul %41, %43, %cst_33 {dimension_numbers = #tpu.dot_dimension_numbers<[1], [0], [0], [1], [0, 0, 1, 1], [], []>} : vector<128x128xbf16>, vector<128x128xbf16>, vector<128x128xf32> -> vector<128x128xf32>
    %45 = arith.addf %38, %44 : vector<128x128xf32>
    %c0_34 = arith.constant 0 : index
    %c9 = arith.constant 9 : index
    %c0_35 = arith.constant 0 : index
    %46 = vector.load %arg8[%c0_34, %c9, %c0_35] : memref<10x32x128xf32, #tpu.memory_space<vmem>>, vector<8x16x128xf32>
    %47 = arith.truncf %46 : vector<8x16x128xf32> to vector<8x16x128xbf16>
    %48 = vector.shape_cast %47 : vector<8x16x128xbf16> to vector<128x128xbf16>
    %c0_36 = arith.constant 0 : index
    %c2 = arith.constant 2 : index
    %c0_37 = arith.constant 0 : index
    %c0_38 = arith.constant 0 : index
    %49 = vector.load %arg5[%c0_36, %c2, %c0_37, %c0_38] : memref<3x3x128x128xbf16, #tpu.memory_space<vmem>>, vector<1x1x128x128xbf16>
    %50 = vector.shape_cast %49 : vector<1x1x128x128xbf16> to vector<128x128xbf16>
    %cst_39 = arith.constant dense<0.000000e+00> : vector<128x128xf32>
    %51 = tpu.matmul %48, %50, %cst_39 {dimension_numbers = #tpu.dot_dimension_numbers<[1], [0], [0], [1], [0, 0, 1, 1], [], []>} : vector<128x128xbf16>, vector<128x128xbf16>, vector<128x128xf32> -> vector<128x128xf32>
    %52 = arith.addf %45, %51 : vector<128x128xf32>
    %c1_40 = arith.constant 1 : index
    %c7_41 = arith.constant 7 : index
    %c0_42 = arith.constant 0 : index
    %53 = vector.load %arg8[%c1_40, %c7_41, %c0_42] : memref<10x32x128xf32, #tpu.memory_space<vmem>>, vector<8x16x128xf32>
    %54 = arith.truncf %53 : vector<8x16x128xf32> to vector<8x16x128xbf16>
    %55 = vector.shape_cast %54 : vector<8x16x128xbf16> to vector<128x128xbf16>
    %c1_43 = arith.constant 1 : index
    %c0_44 = arith.constant 0 : index
    %c0_45 = arith.constant 0 : index
    %c0_46 = arith.constant 0 : index
    %56 = vector.load %arg5[%c1_43, %c0_44, %c0_45, %c0_46] : memref<3x3x128x128xbf16, #tpu.memory_space<vmem>>, vector<1x1x128x128xbf16>
    %57 = vector.shape_cast %56 : vector<1x1x128x128xbf16> to vector<128x128xbf16>
    %cst_47 = arith.constant dense<0.000000e+00> : vector<128x128xf32>
    %58 = tpu.matmul %55, %57, %cst_47 {dimension_numbers = #tpu.dot_dimension_numbers<[1], [0], [0], [1], [0, 0, 1, 1], [], []>} : vector<128x128xbf16>, vector<128x128xbf16>, vector<128x128xf32> -> vector<128x128xf32>
    %59 = arith.addf %52, %58 : vector<128x128xf32>
    %c1_48 = arith.constant 1 : index
    %c8_49 = arith.constant 8 : index
    %c0_50 = arith.constant 0 : index
    %60 = vector.load %arg8[%c1_48, %c8_49, %c0_50] : memref<10x32x128xf32, #tpu.memory_space<vmem>>, vector<8x16x128xf32>
    %61 = arith.truncf %60 : vector<8x16x128xf32> to vector<8x16x128xbf16>
    %62 = vector.shape_cast %61 : vector<8x16x128xbf16> to vector<128x128xbf16>
    %c1_51 = arith.constant 1 : index
    %c1_52 = arith.constant 1 : index
    %c0_53 = arith.constant 0 : index
    %c0_54 = arith.constant 0 : index
    %63 = vector.load %arg5[%c1_51, %c1_52, %c0_53, %c0_54] : memref<3x3x128x128xbf16, #tpu.memory_space<vmem>>, vector<1x1x128x128xbf16>
    %64 = vector.shape_cast %63 : vector<1x1x128x128xbf16> to vector<128x128xbf16>
    %cst_55 = arith.constant dense<0.000000e+00> : vector<128x128xf32>
    %65 = tpu.matmul %62, %64, %cst_55 {dimension_numbers = #tpu.dot_dimension_numbers<[1], [0], [0], [1], [0, 0, 1, 1], [], []>} : vector<128x128xbf16>, vector<128x128xbf16>, vector<128x128xf32> -> vector<128x128xf32>
    %66 = arith.addf %59, %65 : vector<128x128xf32>
    %c1_56 = arith.constant 1 : index
    %c9_57 = arith.constant 9 : index
    %c0_58 = arith.constant 0 : index
    %67 = vector.load %arg8[%c1_56, %c9_57, %c0_58] : memref<10x32x128xf32, #tpu.memory_space<vmem>>, vector<8x16x128xf32>
    %68 = arith.truncf %67 : vector<8x16x128xf32> to vector<8x16x128xbf16>
    %69 = vector.shape_cast %68 : vector<8x16x128xbf16> to vector<128x128xbf16>
    %c1_59 = arith.constant 1 : index
    %c2_60 = arith.constant 2 : index
    %c0_61 = arith.constant 0 : index
    %c0_62 = arith.constant 0 : index
    %70 = vector.load %arg5[%c1_59, %c2_60, %c0_61, %c0_62] : memref<3x3x128x128xbf16, #tpu.memory_space<vmem>>, vector<1x1x128x128xbf16>
    %71 = vector.shape_cast %70 : vector<1x1x128x128xbf16> to vector<128x128xbf16>
    %cst_63 = arith.constant dense<0.000000e+00> : vector<128x128xf32>
    %72 = tpu.matmul %69, %71, %cst_63 {dimension_numbers = #tpu.dot_dimension_numbers<[1], [0], [0], [1], [0, 0, 1, 1], [], []>} : vector<128x128xbf16>, vector<128x128xbf16>, vector<128x128xf32> -> vector<128x128xf32>
    %73 = arith.addf %66, %72 : vector<128x128xf32>
    %c2_64 = arith.constant 2 : index
    %c7_65 = arith.constant 7 : index
    %c0_66 = arith.constant 0 : index
    %74 = vector.load %arg8[%c2_64, %c7_65, %c0_66] : memref<10x32x128xf32, #tpu.memory_space<vmem>>, vector<8x16x128xf32>
    %75 = arith.truncf %74 : vector<8x16x128xf32> to vector<8x16x128xbf16>
    %76 = vector.shape_cast %75 : vector<8x16x128xbf16> to vector<128x128xbf16>
    %c2_67 = arith.constant 2 : index
    %c0_68 = arith.constant 0 : index
    %c0_69 = arith.constant 0 : index
    %c0_70 = arith.constant 0 : index
    %77 = vector.load %arg5[%c2_67, %c0_68, %c0_69, %c0_70] : memref<3x3x128x128xbf16, #tpu.memory_space<vmem>>, vector<1x1x128x128xbf16>
    %78 = vector.shape_cast %77 : vector<1x1x128x128xbf16> to vector<128x128xbf16>
    %cst_71 = arith.constant dense<0.000000e+00> : vector<128x128xf32>
    %79 = tpu.matmul %76, %78, %cst_71 {dimension_numbers = #tpu.dot_dimension_numbers<[1], [0], [0], [1], [0, 0, 1, 1], [], []>} : vector<128x128xbf16>, vector<128x128xbf16>, vector<128x128xf32> -> vector<128x128xf32>
    %80 = arith.addf %73, %79 : vector<128x128xf32>
    %c2_72 = arith.constant 2 : index
    %c8_73 = arith.constant 8 : index
    %c0_74 = arith.constant 0 : index
    %81 = vector.load %arg8[%c2_72, %c8_73, %c0_74] : memref<10x32x128xf32, #tpu.memory_space<vmem>>, vector<8x16x128xf32>
    %82 = arith.truncf %81 : vector<8x16x128xf32> to vector<8x16x128xbf16>
    %83 = vector.shape_cast %82 : vector<8x16x128xbf16> to vector<128x128xbf16>
    %c2_75 = arith.constant 2 : index
    %c1_76 = arith.constant 1 : index
    %c0_77 = arith.constant 0 : index
    %c0_78 = arith.constant 0 : index
    %84 = vector.load %arg5[%c2_75, %c1_76, %c0_77, %c0_78] : memref<3x3x128x128xbf16, #tpu.memory_space<vmem>>, vector<1x1x128x128xbf16>
    %85 = vector.shape_cast %84 : vector<1x1x128x128xbf16> to vector<128x128xbf16>
    %cst_79 = arith.constant dense<0.000000e+00> : vector<128x128xf32>
    %86 = tpu.matmul %83, %85, %cst_79 {dimension_numbers = #tpu.dot_dimension_numbers<[1], [0], [0], [1], [0, 0, 1, 1], [], []>} : vector<128x128xbf16>, vector<128x128xbf16>, vector<128x128xf32> -> vector<128x128xf32>
    %87 = arith.addf %80, %86 : vector<128x128xf32>
    %c2_80 = arith.constant 2 : index
    %c9_81 = arith.constant 9 : index
    %c0_82 = arith.constant 0 : index
    %88 = vector.load %arg8[%c2_80, %c9_81, %c0_82] : memref<10x32x128xf32, #tpu.memory_space<vmem>>, vector<8x16x128xf32>
    %89 = arith.truncf %88 : vector<8x16x128xf32> to vector<8x16x128xbf16>
    %90 = vector.shape_cast %89 : vector<8x16x128xbf16> to vector<128x128xbf16>
    %c2_83 = arith.constant 2 : index
    %c2_84 = arith.constant 2 : index
    %c0_85 = arith.constant 0 : index
    %c0_86 = arith.constant 0 : index
    %91 = vector.load %arg5[%c2_83, %c2_84, %c0_85, %c0_86] : memref<3x3x128x128xbf16, #tpu.memory_space<vmem>>, vector<1x1x128x128xbf16>
    %92 = vector.shape_cast %91 : vector<1x1x128x128xbf16> to vector<128x128xbf16>
    %cst_87 = arith.constant dense<0.000000e+00> : vector<128x128xf32>
    %93 = tpu.matmul %90, %92, %cst_87 {dimension_numbers = #tpu.dot_dimension_numbers<[1], [0], [0], [1], [0, 0, 1, 1], [], []>} : vector<128x128xbf16>, vector<128x128xbf16>, vector<128x128xf32> -> vector<128x128xf32>
    %94 = arith.addf %87, %93 : vector<128x128xf32>
    %95 = vector.shape_cast %94 : vector<128x128xf32> to vector<8x16x128xf32>
    %c0_88 = arith.constant 0 : index
    %c0_89 = arith.constant 0 : index
    %c0_90 = arith.constant 0 : index
    %c0_91 = arith.constant 0 : index
    %96 = vector.load %arg7[%c0_88, %c0_89, %c0_90, %c0_91] : memref<1x8x16x128xf32, #tpu.memory_space<vmem>>, vector<1x8x16x128xf32>
    %97 = vector.shape_cast %96 : vector<1x8x16x128xf32> to vector<8x16x128xf32>
    %98 = vector.shape_cast %95 : vector<8x16x128xf32> to vector<1x8x16x128xf32>
    tpu.vector_store %arg7[%c0_88, %c0_89, %c0_90, %c0_91], %98 {strides = array<i32>} : memref<1x8x16x128xf32, #tpu.memory_space<vmem>>, vector<1x8x16x128xf32>,
    return
  }
  func.func @transform_0(%arg0: i32, %arg1: i32) -> (i32, i32, i32) {
    %c0_i32 = arith.constant 0 : i32
    %c0_i32_0 = arith.constant 0 : i32
    %c0_i32_1 = arith.constant 0 : i32
    return %arg0, %c0_i32, %c0_i32_0 : i32, i32, i32
  }
  func.func @transform_1(%arg0: i32, %arg1: i32) -> (i32, i32, i32) {
    %c0_i32 = arith.constant 0 : i32
    %c0_i32_0 = arith.constant 0 : i32
    %c0_i32_1 = arith.constant 0 : i32
    return %arg0, %c0_i32, %c0_i32_0 : i32, i32, i32
  }
  func.func @transform_2(%arg0: i32, %arg1: i32) -> (i32, i32, i32, i32) {
    %c0_i32 = arith.constant 0 : i32
    %c0_i32_0 = arith.constant 0 : i32
    %c0_i32_1 = arith.constant 0 : i32
    %c0_i32_2 = arith.constant 0 : i32
    return %arg0, %c0_i32, %c0_i32_0, %c0_i32_1 : i32, i32, i32, i32
  }
  func.func @transform_3(%arg0: i32, %arg1: i32) -> (i32, i32, i32, i32) {
    %c0_i32 = arith.constant 0 : i32
    %c0_i32_0 = arith.constant 0 : i32
    %c0_i32_1 = arith.constant 0 : i32
    %c0_i32_2 = arith.constant 0 : i32
    %c0_i32_3 = arith.constant 0 : i32
    return %c0_i32, %c0_i32_0, %c0_i32_1, %c0_i32_2 : i32, i32, i32, i32
  }
  func.func @transform_4(%arg0: i32, %arg1: i32) -> (i32, i32, i32, i32) {
    %c0_i32 = arith.constant 0 : i32
    %c0_i32_0 = arith.constant 0 : i32
    %c0_i32_1 = arith.constant 0 : i32
    return %arg0, %arg1, %c0_i32, %c0_i32_0 : i32, i32, i32, i32
  }
  func.func @transform_5(%arg0: i32, %arg1: i32) -> (i32, i32, i32, i32) {
    %c0_i32 = arith.constant 0 : i32
    %c0_i32_0 = arith.constant 0 : i32
    %c0_i32_1 = arith.constant 0 : i32
    return %arg0, %arg1, %c0_i32, %c0_i32_0 : i32, i32, i32, i32
  }
}

</mosaic_0001>

<bundles_post_ra>
// kernel: resblock_forward.4
= control target key start
LH: loop header
LB: loop body
LE: loop exit
PB: predicated region body
PF: predicated region fallthrough
CT: control target
= control target key end

     0   :  { %8 = vsyncpa [#allocation3], 0  ;;  %s723_s0 = inlined_call_operand.hbm [shape: f32[2,16,16,128], index: 0, kind: input, shape index: {}]   ;;  %s724_s1 = inlined_call_operand.vmem [shape: f32[2,1,128], index: 1, kind: output, shape index: {0}]   ;;  %s725_s2 = inlined_call_operand.vmem [shape: f32[2,1,128], index: 2, kind: output, shape index: {1}]  }
   0x1   :  { %10 = vsyncpa [#allocation3 + $0x1], 0  ;;  %s578_s9 = smov 0   ;;  %s580_s10 = smov 0  }
   0x2   :  { %s582_s11 = smov 0   ;;  %s584_s12 = smov 0  }
   0x3   :  { %s586_s13 = smov 0   ;;  %s588_s14 = smov 0  }
   0x4   :  { %s590_s15 = smov 0   ;;  %s592_s16 = smov 0  }
   0x5 LB: > { %s373_s17 = sadd.s32 4294967295, %s558_s16   ;;  %s25_s18 = sadd.s32 1, %s550_s14  ;;  %s558_s16 = sphi %s592_s16, %s16_s16   ;;  %s554_s15 = sphi %s590_s15, %s734_s15   ;;  %s550_s14 = sphi %s588_s14, %s733_s14   ;;  %s546_s13 = sphi %s586_s13, %s732_s13   ;;  %s542_s12 = sphi %s584_s12, %s731_s12   ;;  %s538_s11 = sphi %s582_s11, %s730_s11   ;;  %s534_s10 = sphi %s580_s10, %s729_s10   ;;  %s530_s9 = sphi %s578_s9, %s728_s9  }
   0x6   : > { %p26_p0 = scmp.ge.s32.totalorder %s25_s18, 2  ;;  %s28_s19 = sadd.s32 1, %s554_s15 }
   0x7   : > { %s37_s20 = sadd.s32 1, %s538_s11  ;;  %p44_p1 = scmp.ne.s32.totalorder %s538_s11, %s534_s10 }
   0x8   : > { %s736_s18 = smov (%p26_p0, %s25_s18), 0  ;;  %s738_s19 = smov (!%p26_p0, %s28_s19), %s554_s15 }
   0x9   : > { %s33_s21 = ssub.s32 %s550_s14, %s736_s18  ;;  %p45_p2 = scmp.eq.s32.totalorder %s558_s16, 0 }
   0xa   : > { %p30_p3 = scmp.ge.s32.totalorder %s738_s19, 2  ;;  %p50_p4 = scmp.ne.s32.totalorder %s534_s10, %s530_s9 }
   0xb   : > { %p629_p5 = por %p45_p2, %p44_p1  ;;  %p51_p6 = scmp.eq.s32.totalorder %s373_s17, 0 }
   0xc   : > { %s740_s19 = smov (%p30_p3, %s738_s19), 0  ;;  %p394_p8 = scmp.lt.s32.totalorder %s558_s16, 4 }
   0xd   : > { %p635_p7 = por %p51_p6, %p50_p4  ;;  %s32_s24 = ssub.s32 %s554_s15, %s740_s19 }
   0xe   : > { %s34_s25 = sor.u32 %s33_s21, %s32_s24  ;;  %s126_s26 = sand.u32 1, %s538_s11  }
   0xf   : > { %p35_p9 = scmp.eq.s32.totalorder %s34_s25, 0  ;;  %s377_s27 = sshll.u32 %s126_s26, 7 }
  0x10   : > { %s387_s28 = sshll.u32 %s550_s14, 4  ;;  %s380_s30 = sshll.u32 %s554_s15, 5 }
  0x11   : > { %s645_s29 = scalar_select %p35_p9, %s538_s11, %s37_s20  }
  0x12   : > { %s136_s3 = sadd.s32 %s387_s28, %s380_s30  ;;  %s130_s4 = scalar_lea.vmem [#allocation2], %s377_s27 }
  0x13   : > { %s141_s5 = sshll.u32 %s130_s4, 4  ;;  %s381_s6 = sshll.u32 %s136_s3, 3  ;;  %s142_s5 = int_to_ptr.vmem [resolvable:$true] %s141_s5 }
  0x14   : > { %s138_s9 = scalar_lea.hbm %s723_s0, %s381_s6  ;;  %p391_p10 = pnand %p394_p8, %p629_p5 }
  0x15   : > { %s139_s17 = sshll.u32 %s138_s9, 4  ;;  %p382_p11 = scmp.ge.s32.totalorder %s558_s16, 1  ;;  %s140_s17 = int_to_ptr.hbm [resolvable:$true] %s139_s17 }
  0x16   : > { %s127_s21 = scalar_lea.sflag [#allocation3], %s126_s26  ;;  %s560_s20 = smov 128  }
  0x17   : > { %s561_s24 = smov 8   ;;  %p149_p12 = scmp.lt.s32.totalorder %s558_s16, 5 }
  0x18   : > { %393 = dma.hbm_to_vmem [thread:$0]  (!%p391_p10), %s140_s17, 2048, %s142_s5, %s127_s21, %s560_s20, %s560_s20, %s561_s24  }
  0x19   : > { %p150_p13 = pnand %p382_p11, %p149_p12 }
  0x1a   : > { %s155_s25 = sand.u32 (!%p150_p13), 1, %s534_s10  }
  0x1b   : > { %153 = sbr.rel (%p150_p13) target bundleno = 78 (0x4e), region = 24  ;;  %s383_s27 = sshll.u32 (!%p150_p13), %s155_s25, 7 }
  0x1c   : > { %s156_s28 = scalar_lea.sflag (!%p150_p13), [#allocation3], %s155_s25  ;;  %s658_s30 = scalar_lea.vmem (!%p150_p13), [#allocation2], %s383_s27 }
  0x20   : > { %525 = dma.done.wait (%p635_p7), %s156_s28, 2048  }
  0x21   : > { %527 = vsyncadd (%p635_p7), %s156_s28, 4294965248  ;;  %p183_p0 = scmp.lt.s32.totalorder %s546_s13, 1  ;;  %p384_p1 = scmp.ne.s32.totalorder %s542_s12, 0 }
  0x23   : > { %s742_s13 = smov (!%p183_p0, %s546_s13), 1  ;;  %192 = sbr.rel (%p384_p1) target bundleno = 43 (0x2b), region = 32 }
  0x24   : > { %s669_s3 = scalar_lea.vmem %s724_s1, %s742_s13  ;;  %s674_s6 = scalar_lea.vmem %s725_s2, %s742_s13 }
  0x28   : > { %v562_v0 = vmov 0.0  }
  0x29   : > { %193 = vst [vmem:[%s669_s3] sm:$0x1] %v562_v0 }
  0x2a   : > { %194 = vst [vmem:[%s674_s6] sm:$0x1] %v562_v0 }
  0x2b PF: > { %v195_v1 = vld [vmem:[%s658_s30] sm:$0xff]  ;;  %v196_v2 = vld [vmem:[%s658_s30 + $0x8] sm:$0xff]  ;;  %v197_v3 = vld [vmem:[%s658_s30 + $0x10] sm:$0xff] }
  0x2c   : > { %v198_v4 = vld [vmem:[%s658_s30 + $0x18] sm:$0xff]  ;;  %v199_v5 = vld [vmem:[%s658_s30 + $0x20] sm:$0xff]  ;;  %v200_v6 = vld [vmem:[%s658_s30 + $0x28] sm:$0xff]  ;;  %v212_v7 = vadd.f32 %v197_v3, %v195_v1  ;;  %v236_v8 = vmul.f32 %v195_v1, %v195_v1  ;;  %v237_v11 = vmul.f32 %v196_v2, %v196_v2  ;;  %v238_v12 = vmul.f32 %v197_v3, %v197_v3 }
  0x2d   : > { %v201_v9 = vld [vmem:[%s658_s30 + $0x30] sm:$0xff]  ;;  %v219_v10 = vadd.f32 %v198_v4, %v196_v2  ;;  %v239_v13 = vmul.f32 %v198_v4, %v198_v4  ;;  %v202_v14 = vld [vmem:[%s658_s30 + $0x38] sm:$0xff]  ;;  %v203_v16 = vld [vmem:[%s658_s30 + $0x40] sm:$0xff]  ;;  %v240_v18 = vmul.f32 %v199_v5, %v199_v5  ;;  %v241_v19 = vmul.f32 %v200_v6, %v200_v6 }
  0x2e   : > { %v213_v15 = vadd.f32 %v212_v7, %v199_v5  ;;  %v204_v20 = vld [vmem:[%s658_s30 + $0x48] sm:$0xff]  ;;  %v242_v22 = vmul.f32 %v201_v9, %v201_v9  ;;  %v205_v23 = vld [vmem:[%s658_s30 + $0x50] sm:$0xff]  ;;  %v243_v25 = vmul.f32 %v202_v14, %v202_v14  ;;  %v252_v26 = vadd.f32 %v238_v12, %v236_v8  ;;  %v206_v28 = vld [vmem:[%s658_s30 + $0x58] sm:$0xff] }
  0x2f   : > { %v220_v17 = vadd.f32 %v219_v10, %v200_v6  ;;  %v259_v27 = vadd.f32 %v239_v13, %v237_v11  ;;  %v244_v30 = vmul.f32 %v203_v16, %v203_v16  ;;  %v207_v31 = vld [vmem:[%s658_s30 + $0x60] sm:$0xff]  ;;  %v245_v33 = vmul.f32 %v204_v20, %v204_v20  ;;  %v208_v36 = vld [vmem:[%s658_s30 + $0x68] sm:$0xff]  ;;  %v209_v39 = vld [vmem:[%s658_s30 + $0x70] sm:$0xff] }
  0x30   : > { %v214_v21 = vadd.f32 %v213_v15, %v201_v9  ;;  %v253_v34 = vadd.f32 %v252_v26, %v240_v18  ;;  %v246_v38 = vmul.f32 %v205_v23, %v205_v23  ;;  %v247_v41 = vmul.f32 %v206_v28, %v206_v28  ;;  %v210_v44 = vld [vmem:[%s658_s30 + $0x78] sm:$0xff]  ;;  %v211_v7 = vld [vmem:[%s669_s3] sm:$0x1] }
  0x31   : > { %v221_v24 = vadd.f32 %v220_v17, %v202_v14  ;;  %v260_v35 = vadd.f32 %v259_v27, %v241_v19  ;;  %v248_v46 = vmul.f32 %v207_v31, %v207_v31  ;;  %v249_v48 = vmul.f32 %v208_v36, %v208_v36  ;;  %v235_v12 = vld [vmem:[%s674_s6] sm:$0x1] }
  0x32   : > { %v215_v29 = vadd.f32 %v214_v21, %v203_v16  ;;  %v254_v42 = vadd.f32 %v253_v34, %v242_v22  ;;  %v250_v52 = vmul.f32 %v209_v39, %v209_v39  ;;  %v251_v54 = vmul.f32 %v210_v44, %v210_v44 }
  0x33   : > { %v222_v32 = vadd.f32 %v221_v24, %v204_v20  ;;  %v261_v43 = vadd.f32 %v260_v35, %v243_v25 }
  0x34   : > { %v216_v37 = vadd.f32 %v215_v29, %v205_v23  ;;  %v255_v49 = vadd.f32 %v254_v42, %v244_v30 }
  0x35   : > { %v223_v40 = vadd.f32 %v222_v32, %v206_v28  ;;  %v262_v50 = vadd.f32 %v261_v43, %v245_v33 }
  0x36   : > { %v217_v45 = vadd.f32 %v216_v37, %v207_v31  ;;  %v256_v55 = vadd.f32 %v255_v49, %v246_v38 }
  0x37   : > { %v224_v47 = vadd.f32 %v223_v40, %v208_v36  ;;  %v263_v56 = vadd.f32 %v262_v50, %v247_v41 }
  0x38   : > { %v218_v51 = vadd.f32 %v217_v45, %v209_v39  ;;  %v257_v58 = vadd.f32 %v256_v55, %v248_v46 }
  0x39   : > { %v225_v53 = vadd.f32 %v224_v47, %v210_v44  ;;  %v264_v59 = vadd.f32 %v263_v56, %v249_v48 }
  0x3a   : > { %v258_v61 = vadd.f32 %v257_v58, %v250_v52 }
  0x3b   : > { %v226_v57 = vadd.f32 %v225_v53, %v218_v51  ;;  %v265_v62 = vadd.f32 %v264_v59, %v251_v54 }
  0x3d   : > { %v227_v60 = vrot.slane %v226_v57, 4  ;;  %v266_v0 = vadd.f32 %v265_v62, %v258_v61 }
  0x3f   : > { %v228_v63 = vadd.f32 %v227_v60, %v226_v57  ;;  %v267_v2 = vrot.slane %v266_v0, 4 }
  0x41   : > { %v229_v1 = vrot.slane %v228_v63, 2  ;;  %v268_v4 = vadd.f32 %v267_v2, %v266_v0 }
  0x43   : > { %v230_v3 = vadd.f32 %v229_v1, %v228_v63  ;;  %v269_v6 = vrot.slane %v268_v4, 2 }
  0x45   : > { %v231_v5 = vrot.slane %v230_v3, 1  ;;  %v270_v9 = vadd.f32 %v269_v6, %v268_v4 }
  0x47   : > { %v232_v8 = vadd.f32 %v231_v5, %v230_v3  ;;  %v271_v11 = vrot.slane %v270_v9, 1 }
  0x49   : > { %v233_v10 = vadd.f32 %v232_v8, %v211_v7  ;;  %v272_v13 = vadd.f32 %v271_v11, %v270_v9 }
  0x4b   : > { %234 = vst [vmem:[%s669_s3] sm:$0x1] %v233_v10  ;;  %v273_v14 = vadd.f32 %v272_v13, %v235_v12 }
  0x4d   : > { %274 = vst [vmem:[%s674_s6] sm:$0x1] %v273_v14 }
  0x4e PF: > { %s16_s16 = sadd.s32 1, %s558_s16   ;;  %s728_s9 = smov %s534_s10 }
  0x4f   : > { %p13_p2 = scmp.ge.s32.totalorder %s16_s16, 6   ;;  %s729_s10 = smov %s538_s11 }
  0x50   : > { %s730_s11 = smov %s645_s29  ;;  %s731_s12 = smov %s550_s14 }
  0x51   : > { %s732_s13 = smov %s554_s15  ;;  %s733_s14 = smov %s736_s18 }
  0x52   : > { %s734_s15 = smov %s740_s19  ;;  %15 = sbr.rel (!%p13_p2) target bundleno = 5 (0x5), region = 80 }
  0x57   :  { %304 = vsyncpa [#allocation3], 1 }
  0x58   :  { %306 = vsyncpa [#allocation3 + $0x1], 1 }

// kernel: resblock_forward.6
= control target key start
LH: loop header
LB: loop body
LE: loop exit
PB: predicated region body
PF: predicated region fallthrough
CT: control target
= control target key end

     0   :  { %s467_s9 = smov 0   ;;  %s469_s10 = smov 0   ;;  %s549_s0 = inlined_call_operand.vmem [shape: f32[2,16,16,128], index: 0, kind: input, shape index: {}]   ;;  %s550_s1 = inlined_call_operand.vmem [shape: f32[2,1,128], index: 1, kind: output, shape index: {0}]   ;;  %s551_s2 = inlined_call_operand.vmem [shape: f32[2,1,128], index: 2, kind: output, shape index: {1}]  }
   0x1   :  { %s471_s11 = smov 0   ;;  %s473_s12 = smov 0  }
   0x2   :  { %s475_s13 = smov 0  }
   0x3 LB: > { %s22_s14 = sadd.s32 1, %s441_s11  ;;  %s25_s15 = sadd.s32 1, %s445_s12  ;;  %s449_s13 = sphi %s475_s13, %s13_s13   ;;  %s445_s12 = sphi %s473_s12, %s555_s12   ;;  %s441_s11 = sphi %s471_s11, %s554_s11   ;;  %s437_s10 = sphi %s469_s10, %s553_s10   ;;  %s433_s9 = sphi %s467_s9, %s552_s9  }
   0x4   : > { %p23_p0 = scmp.ge.s32.totalorder %s22_s14, 2  ;;  %p362_p1 = scmp.ge.s32.totalorder %s449_s13, 1 }
   0x5   : > { %p135_p2 = scmp.lt.s32.totalorder %s449_s13, 5 }
   0x6   : > { %s557_s14 = smov (%p23_p0, %s22_s14), 0  ;;  %s559_s15 = smov (!%p23_p0, %s25_s15), %s445_s12 }
   0x7   : > { %p136_p3 = pnand %p362_p1, %p135_p2  ;;  %p27_p4 = scmp.ge.s32.totalorder %s559_s15, 2 }
   0x8   : > { %s363_s16 = sshll.u32 (!%p136_p3), %s433_s9, 3  ;;  %p164_p5 = scmp.lt.s32.totalorder (!%p136_p3), %s437_s10, 1 }
   0x9   : > { %s561_s15 = smov (%p27_p4, %s559_s15), 0  ;;  %139 = sbr.rel (%p136_p3) target bundleno = 60 (0x3c), region = 24 }
   0xa   : > { %p166_p6 = scmp.lt.s32.totalorder (!%p136_p3), %s363_s16, 15  ;;  %p367_p7 = scmp.ne.s32.totalorder (!%p136_p3), %s433_s9, 0 }
   0xe   : > { %s563_s10 = smov (!%p164_p5, %s437_s10), 1  ;;  %s565_s16 = smov (!%p166_p6, %s363_s16), 15 }
   0xf   : > { %s365_s17 = sshll.u32 %s563_s10, 5  ;;  %s500_s20 = scalar_lea.vmem %s550_s1, %s563_s10 }
  0x10   : > { %s364_s21 = sshll.u32 %s565_s16, 1  ;;  %s505_s24 = scalar_lea.vmem %s551_s2, %s563_s10 }
  0x11   : > { %s170_s25 = sadd.s32 %s365_s17, %s364_s21  ;;  %183 = sbr.rel (%p367_p7) target bundleno = 25 (0x19), region = 28 }
  0x12   : > { %s366_s26 = sshll.u32 %s170_s25, 3 }
  0x13   : > { %s510_s29 = scalar_lea.vmem %s549_s0, %s366_s26 }
  0x16   : > { %v451_v0 = vmov 0.0  }
  0x17   : > { %184 = vst [vmem:[%s500_s20] sm:$0x1] %v451_v0 }
  0x18   : > { %185 = vst [vmem:[%s505_s24] sm:$0x1] %v451_v0 }
  0x19 PF: > { %v186_v1 = vld [vmem:[%s510_s29] sm:$0xff]  ;;  %v187_v2 = vld [vmem:[%s510_s29 + $0x8] sm:$0xff]  ;;  %v188_v3 = vld [vmem:[%s510_s29 + $0x10] sm:$0xff] }
  0x1a   : > { %v189_v4 = vld [vmem:[%s510_s29 + $0x18] sm:$0xff]  ;;  %v190_v5 = vld [vmem:[%s510_s29 + $0x20] sm:$0xff]  ;;  %v191_v6 = vld [vmem:[%s510_s29 + $0x28] sm:$0xff]  ;;  %v203_v7 = vadd.f32 %v188_v3, %v186_v1  ;;  %v227_v8 = vmul.f32 %v186_v1, %v186_v1  ;;  %v228_v11 = vmul.f32 %v187_v2, %v187_v2  ;;  %v229_v12 = vmul.f32 %v188_v3, %v188_v3 }
  0x1b   : > { %v192_v9 = vld [vmem:[%s510_s29 + $0x30] sm:$0xff]  ;;  %v210_v10 = vadd.f32 %v189_v4, %v187_v2  ;;  %v230_v13 = vmul.f32 %v189_v4, %v189_v4  ;;  %v193_v14 = vld [vmem:[%s510_s29 + $0x38] sm:$0xff]  ;;  %v194_v16 = vld [vmem:[%s510_s29 + $0x40] sm:$0xff]  ;;  %v231_v18 = vmul.f32 %v190_v5, %v190_v5  ;;  %v232_v19 = vmul.f32 %v191_v6, %v191_v6 }
  0x1c   : > { %v204_v15 = vadd.f32 %v203_v7, %v190_v5  ;;  %v195_v20 = vld [vmem:[%s510_s29 + $0x48] sm:$0xff]  ;;  %v233_v22 = vmul.f32 %v192_v9, %v192_v9  ;;  %v196_v23 = vld [vmem:[%s510_s29 + $0x50] sm:$0xff]  ;;  %v234_v25 = vmul.f32 %v193_v14, %v193_v14  ;;  %v243_v26 = vadd.f32 %v229_v12, %v227_v8  ;;  %v197_v28 = vld [vmem:[%s510_s29 + $0x58] sm:$0xff] }
  0x1d   : > { %v211_v17 = vadd.f32 %v210_v10, %v191_v6  ;;  %v250_v27 = vadd.f32 %v230_v13, %v228_v11  ;;  %v235_v30 = vmul.f32 %v194_v16, %v194_v16  ;;  %v198_v31 = vld [vmem:[%s510_s29 + $0x60] sm:$0xff]  ;;  %v236_v33 = vmul.f32 %v195_v20, %v195_v20  ;;  %v199_v36 = vld [vmem:[%s510_s29 + $0x68] sm:$0xff]  ;;  %v200_v39 = vld [vmem:[%s510_s29 + $0x70] sm:$0xff] }
  0x1e   : > { %v205_v21 = vadd.f32 %v204_v15, %v192_v9  ;;  %v244_v34 = vadd.f32 %v243_v26, %v231_v18  ;;  %v237_v38 = vmul.f32 %v196_v23, %v196_v23  ;;  %v238_v41 = vmul.f32 %v197_v28, %v197_v28  ;;  %v201_v44 = vld [vmem:[%s510_s29 + $0x78] sm:$0xff]  ;;  %v202_v7 = vld [vmem:[%s500_s20] sm:$0x1] }
  0x1f   : > { %v212_v24 = vadd.f32 %v211_v17, %v193_v14  ;;  %v251_v35 = vadd.f32 %v250_v27, %v232_v19  ;;  %v239_v46 = vmul.f32 %v198_v31, %v198_v31  ;;  %v240_v48 = vmul.f32 %v199_v36, %v199_v36  ;;  %v226_v12 = vld [vmem:[%s505_s24] sm:$0x1] }
  0x20   : > { %v206_v29 = vadd.f32 %v205_v21, %v194_v16  ;;  %v245_v42 = vadd.f32 %v244_v34, %v233_v22  ;;  %v241_v52 = vmul.f32 %v200_v39, %v200_v39  ;;  %v242_v54 = vmul.f32 %v201_v44, %v201_v44 }
  0x21   : > { %v213_v32 = vadd.f32 %v212_v24, %v195_v20  ;;  %v252_v43 = vadd.f32 %v251_v35, %v234_v25 }
  0x22   : > { %v207_v37 = vadd.f32 %v206_v29, %v196_v23  ;;  %v246_v49 = vadd.f32 %v245_v42, %v235_v30 }
  0x23   : > { %v214_v40 = vadd.f32 %v213_v32, %v197_v28  ;;  %v253_v50 = vadd.f32 %v252_v43, %v236_v33 }
  0x24   : > { %v208_v45 = vadd.f32 %v207_v37, %v198_v31  ;;  %v247_v55 = vadd.f32 %v246_v49, %v237_v38 }
  0x25   : > { %v215_v47 = vadd.f32 %v214_v40, %v199_v36  ;;  %v254_v56 = vadd.f32 %v253_v50, %v238_v41 }
  0x26   : > { %v209_v51 = vadd.f32 %v208_v45, %v200_v39  ;;  %v248_v58 = vadd.f32 %v247_v55, %v239_v46 }
  0x27   : > { %v216_v53 = vadd.f32 %v215_v47, %v201_v44  ;;  %v255_v59 = vadd.f32 %v254_v56, %v240_v48 }
  0x28   : > { %v249_v61 = vadd.f32 %v248_v58, %v241_v52 }
  0x29   : > { %v217_v57 = vadd.f32 %v216_v53, %v209_v51  ;;  %v256_v62 = vadd.f32 %v255_v59, %v242_v54 }
  0x2b   : > { %v218_v60 = vrot.slane %v217_v57, 4  ;;  %v257_v0 = vadd.f32 %v256_v62, %v249_v61 }
  0x2d   : > { %v219_v63 = vadd.f32 %v218_v60, %v217_v57  ;;  %v258_v2 = vrot.slane %v257_v0, 4 }
  0x2f   : > { %v220_v1 = vrot.slane %v219_v63, 2  ;;  %v259_v4 = vadd.f32 %v258_v2, %v257_v0 }
  0x31   : > { %v221_v3 = vadd.f32 %v220_v1, %v219_v63  ;;  %v260_v6 = vrot.slane %v259_v4, 2 }
  0x33   : > { %v222_v5 = vrot.slane %v221_v3, 1  ;;  %v261_v9 = vadd.f32 %v260_v6, %v259_v4 }
  0x35   : > { %v223_v8 = vadd.f32 %v222_v5, %v221_v3  ;;  %v262_v11 = vrot.slane %v261_v9, 1 }
  0x37   : > { %v224_v10 = vadd.f32 %v223_v8, %v202_v7  ;;  %v263_v13 = vadd.f32 %v262_v11, %v261_v9 }
  0x39   : > { %225 = vst [vmem:[%s500_s20] sm:$0x1] %v224_v10  ;;  %v264_v14 = vadd.f32 %v263_v13, %v226_v12 }
  0x3b   : > { %265 = vst [vmem:[%s505_s24] sm:$0x1] %v264_v14 }
  0x3c PF: > { %s13_s13 = sadd.s32 1, %s449_s13   ;;  %s552_s9 = smov %s441_s11 }
  0x3d   : > { %p10_p8 = scmp.ge.s32.totalorder %s13_s13, 6   ;;  %s553_s10 = smov %s445_s12 }
  0x3e   : > { %s554_s11 = smov %s557_s14  ;;  %s555_s12 = smov %s561_s15 }
  0x3f   :  { %12 = sbr.rel (!%p10_p8) target bundleno = 3 (0x3), region = 70 }

// kernel: resblock_forward.5
= control target key start
LH: loop header
LB: loop body
LE: loop exit
PB: predicated region body
PF: predicated region fallthrough
CT: control target
= control target key end

     0   :  { %s3535_s15 = smov 0   ;;  %s3537_s16 = smov 0   ;;  %s4472_s0 = inlined_call_operand.vmem [shape: f32[2,1,128], index: 0, kind: input, shape index: {}]   ;;  %s4473_s1 = inlined_call_operand.vmem [shape: f32[2,1,128], index: 1, kind: input, shape index: {}]   ;;  %s4474_s2 = inlined_call_operand.vmem [shape: f32[2,16,16,128], index: 2, kind: input, shape index: {}]   ;;  %s4475_s3 = inlined_call_operand.vmem [shape: bf16[3,3,128,128], index: 3, kind: input, shape index: {}]   ;;  %s4476_s4 = inlined_call_operand.vmem [shape: f32[2,16,16,128], index: 4, kind: output, shape index: {}]  }
   0x1   :  { %s3539_s17 = smov 0   ;;  %s3541_s18 = smov 0  }
   0x2   :  { %s3543_s19 = smov 0  }
   0x3 LB: > { %s23_s20 = sadd.s32 1, %s3499_s17  ;;  %s26_s21 = sadd.s32 1, %s3503_s18  ;;  %s3507_s19 = sphi %s3543_s19, %s14_s19   ;;  %s3503_s18 = sphi %s3541_s18, %s4531_s18   ;;  %s3499_s17 = sphi %s3539_s17, %s4530_s17   ;;  %s3495_s16 = sphi %s3537_s16, %s4529_s16   ;;  %s3491_s15 = sphi %s3535_s15, %s4528_s15  }
   0x4   : > { %p24_p0 = scmp.ge.s32.totalorder %s23_s20, 2  ;;  %p2792_p1 = scmp.ge.s32.totalorder %s3507_s19, 1 }
   0x5   : > { %p192_p2 = scmp.lt.s32.totalorder %s3507_s19, 5 }
   0x6   : > { %s4533_s20 = smov (%p24_p0, %s23_s20), 0  ;;  %s4535_s21 = smov (!%p24_p0, %s26_s21), %s3503_s18 }
   0x7   : > { %p193_p3 = pnand %p2792_p1, %p192_p2  ;;  %p28_p4 = scmp.ge.s32.totalorder %s4535_s21, 2 }
   0x8   : > { %p229_p5 = scmp.lt.s32.totalorder (!%p193_p3), %s3495_s16, 1  ;;  %s3568_s22 = sshll.u32 (!%p193_p3), %s3491_s15, 3 }
   0x9   : > { %s4537_s21 = smov (%p28_p4, %s4535_s21), 0  ;;  %196 = sbr.rel (%p193_p3) target bundleno = 643 (0x283), region = 36 }
   0xa   : > { %p243_p6 = scmp.lt.s32.totalorder (!%p193_p3), %s3568_s22, 15  ;;  %s3248_s23 = sshll.u32 (!%p193_p3), %s3491_s15, 7 }
   0xb   : > { %p2817_p7 = scmp.le.s32.totalorder (!%p193_p3), %s3491_s15, 0 }
   0xe   : > { %v3509_v0 = vmov 0.0   ;;  %s4539_s16 = smov (!%p229_p5, %s3495_s16), 1 }
   0xf   : > { %254 = vst [vmem:[#allocation2] sm:$0xff] %v3509_v0  ;;  %s244_s24 = scalar_select %p243_p6, %s3568_s22, 15 }
  0x10   : > { %255 = vst [vmem:[#allocation2 + $0x8] sm:$0xff] %v3509_v0  ;;  %s231_s27 = scalar_lea.vmem %s4472_s0, %s4539_s16  ;;  %s234_s30 = scalar_lea.vmem %s4473_s1, %s4539_s16 }
  0x11   : > { %256 = vst [vmem:[#allocation2 + $0x10] sm:$0xff] %v3509_v0  ;;  %s3247_s5 = sshll.u32 %s4539_s16, 8  ;;  %s2796_s6 = sshll.u32 %s244_s24, 1  ;;  %v3590_v1 = vld [vmem:[%s231_s27] ss:$0 sm:$0xff] }
  0x12   : > { %257 = vst [vmem:[#allocation2 + $0x18] sm:$0xff] %v3509_v0  ;;  %s3588_s9 = scalar_lea.vmem %s4474_s2, %s3247_s5  ;;  %s2797_s10 = sshll.u32 %s4539_s16, 5  ;;  %v3596_v2 = vld [vmem:[%s234_s30] ss:$0 sm:$0xff] }
  0x13   : > { %258 = vst [vmem:[#allocation2 + $0x20] sm:$0xff] %v3509_v0  ;;  %s247_s11 = sadd.s32 %s2797_s10, %s2796_s6  ;;  %s3594_s12 = scalar_lea.vmem %s3588_s9, %s3248_s23 }
  0x14   : > { %261 = vst [vmem:[#allocation2 + $0x38] sm:$0xff] %v3509_v0  ;;  %s2798_s13 = sshll.u32 %s247_s11, 3  ;;  %v296_v3 = vld [vmem:[%s3594_s12] sm:$0xff]  ;;  %v297_v4 = vld [vmem:[%s3594_s12 + $0x8] sm:$0xff]  ;;  %v298_v5 = vld [vmem:[%s3594_s12 + $0x10] sm:$0xff]  ;;  %s2818_s24 = sadd.s32 (!%p2817_p7), 4294967295, %s3568_s22 }
  0x15   : > { %262 = vst [vmem:[#allocation2 + $0x40] sm:$0xff] %v3509_v0  ;;  %s3606_s23 = scalar_lea.vmem %s4476_s4, %s2798_s13  ;;  %v315_v6 = vmul.f32 %v3590_v1, %v296_v3  ;;  %v316_v7 = vmul.f32 %v3590_v1, %v297_v4  ;;  %v317_v8 = vmul.f32 %v3590_v1, %v298_v5  ;;  %v299_v9 = vld [vmem:[%s3594_s12 + $0x18] sm:$0xff]  ;;  %v300_v10 = vld [vmem:[%s3594_s12 + $0x20] sm:$0xff]  ;;  %v301_v11 = vld [vmem:[%s3594_s12 + $0x28] sm:$0xff]  ;;  %s2819_s25 = sshll.u32 (!%p2817_p7), %s2818_s24, 4 }
  0x16   : > { %265 = vst [vmem:[#allocation2 + $0x58] sm:$0xff] %v3509_v0  ;;  %v318_v12 = vmul.f32 %v3590_v1, %v299_v9  ;;  %v319_v13 = vmul.f32 %v3590_v1, %v300_v10  ;;  %v320_v14 = vmul.f32 %v3590_v1, %v301_v11  ;;  %v302_v15 = vld [vmem:[%s3594_s12 + $0x30] sm:$0xff]  ;;  %v303_v16 = vld [vmem:[%s3594_s12 + $0x38] sm:$0xff]  ;;  %v304_v25 = vld [vmem:[%s3594_s12 + $0x40] sm:$0xff]  ;;  %s693_s26 = scalar_lea.vmem (!%p2817_p7), %s3588_s9, %s2819_s25 }
  0x17   : > { %266 = vst [vmem:[#allocation2 + $0x60] sm:$0xff] %v3509_v0  ;;  %v3622_v17 = vadd.f32 %v3596_v2, %v315_v6  ;;  %v3625_v18 = vadd.f32 %v3596_v2, %v316_v7  ;;  %v3628_v19 = vadd.f32 %v3596_v2, %v317_v8  ;;  %v321_v20 = vmul.f32 %v3590_v1, %v302_v15  ;;  %v305_v28 = vld [vmem:[%s3594_s12 + $0x48] sm:$0xff]  ;;  %v306_v38 = vld [vmem:[%s3594_s12 + $0x50] sm:$0xff]  ;;  %v307_v39 = vld [vmem:[%s3594_s12 + $0x58] sm:$0xff] }
  0x18   : > { %269 = vst [vmem:[#allocation2 + $0x78] sm:$0xff] %v3509_v0  ;;  %v3633_v21 = vadd.f32 %v3596_v2, %v318_v12  ;;  %v3636_v22 = vadd.f32 %v3596_v2, %v319_v13  ;;  %v3639_v23 = vadd.f32 %v3596_v2, %v320_v14  ;;  %v322_v24 = vmul.f32 %v3590_v1, %v303_v16  ;;  %v308_v54 = vld [vmem:[%s3594_s12 + $0x60] sm:$0xff] }
  0x19   : > { %270 = vst [vmem:[#allocation2 + $0x80] sm:$0xff] %v3509_v0  ;;  %v2801_v26 = vmul.f32 -1.442695, %v3622_v17  ;;  %v2802_v27 = vmul.f32 -1.442695, %v3625_v18  ;;  %v3651_v31 = vadd.f32 %v3596_v2, %v321_v20  ;;  %v323_v34 = vmul.f32 %v3590_v1, %v304_v25 }
  0x1a   : > { %273 = vst [vmem:[#allocation2 + $0x98] sm:$0xff] %v3509_v0  ;;  %v2803_v29 = vmul.f32 -1.442695, %v3628_v19  ;;  %v2804_v30 = vmul.f32 -1.442695, %v3633_v21  ;;  %v3656_v33 = vadd.f32 %v3596_v2, %v322_v24  ;;  %v324_v36 = vmul.f32 %v3590_v1, %v305_v28 }
  0x1b   : > { %274 = vst [vmem:[#allocation2 + $0xa0] sm:$0xff] %v3509_v0  ;;  %3389 = vpow2.f32 %v2801_v26  ;;  %v2805_v32 = vmul.f32 -1.442695, %v3636_v22  ;;  %v2806_v35 = vmul.f32 -1.442695, %v3639_v23  ;;  %v3670_v41 = vadd.f32 %v3596_v2, %v323_v34 }
  0x1c   : > { %277 = vst [vmem:[#allocation2 + $0xb8] sm:$0xff] %v3509_v0  ;;  %3391 = vpow2.f32 %v2802_v27  ;;  %v2807_v37 = vmul.f32 -1.442695, %v3651_v31  ;;  %v2808_v40 = vmul.f32 -1.442695, %v3656_v33  ;;  %v3674_v42 = vadd.f32 %v3596_v2, %v324_v36 }
  0x1d   : > { %278 = vst [vmem:[#allocation2 + $0xc0] sm:$0xff] %v3509_v0  ;;  %3393 = vpow2.f32 %v2803_v29  ;;  %v325_v44 = vmul.f32 %v3590_v1, %v306_v38  ;;  %v326_v45 = vmul.f32 %v3590_v1, %v307_v39  ;;  %v2809_v50 = vmul.f32 -1.442695, %v3670_v41 }
  0x1e   : > { %281 = vst [vmem:[#allocation2 + $0xd8] sm:$0xff] %v3509_v0  ;;  %3395 = vpow2.f32 %v2804_v30  ;;  %v3690_v53 = vmul.f32 -1.442695, %v3674_v42  ;;  %v3711_v3 = vmul.f32 %v3590_v1, %v308_v54  ;;  %v309_v30 = vld [vmem:[%s3594_s12 + $0x68] sm:$0xff] }
  0x1f   : > { %282 = vst [vmem:[#allocation2 + $0xe0] sm:$0xff] %v3509_v0  ;;  %3397 = vpow2.f32 %v2805_v32  ;;  %v3696_v57 = vadd.f32 %v3596_v2, %v325_v44  ;;  %v3699_v58 = vadd.f32 %v3596_v2, %v326_v45 }
  0x20   : > { %285 = vst [vmem:[#allocation2 + $0xf8] sm:$0xff] %v3509_v0  ;;  %3399 = vpow2.f32 %v2806_v35  ;;  %v3855_v44 = vadd.f32 %v3596_v2, %v3711_v3 }
  0x21   : > { %286 = vst [vmem:[#allocation2 + $0x100] sm:$0xff] %v3509_v0  ;;  %v3390_v43 = vpop.eup %3389  ;;  %3401 = vpow2.f32 %v2807_v37 }
  0x22   : > { %289 = vst [vmem:[#allocation2 + $0x118] sm:$0xff] %v3509_v0  ;;  %v3392_v46 = vpop.eup %3391  ;;  %v3680_v47 = vadd.f32 1.0, %v3390_v43  ;;  %3403 = vpow2.f32 %v2808_v40 }
  0x23   : > { %290 = vst [vmem:[#allocation2 + $0x120] sm:$0xff] %v3509_v0  ;;  %v3394_v48 = vpop.eup %3393  ;;  %v3683_v49 = vadd.f32 1.0, %v3392_v46 }
  0x24   : > { %291 = vst [vmem:[#allocation2 + $0x128] sm:$0xff] %v3509_v0  ;;  %v3396_v51 = vpop.eup %3395  ;;  %3405 = vrcp.f32 %v3680_v47  ;;  %v425_v52 = vand.u32 2147483648, %v3680_v47  ;;  %v423_v56 = vand.u32 2147483647, %v3680_v47  ;;  %v3703_v62 = vadd.f32 1.0, %v3394_v48 }
  0x25   : > { %292 = vst [vmem:[#allocation2 + $0x130] sm:$0xff] %v3509_v0  ;;  %v3398_v55 = vpop.eup %3397  ;;  %3407 = vrcp.f32 %v3683_v49  ;;  %v438_v60 = vand.u32 2147483647, %v3683_v49  ;;  %v440_v61 = vand.u32 2147483648, %v3683_v49  ;;  %v3705_v63 = vadd.f32 1.0, %v3396_v51 }
  0x26   : > { %293 = vst [vmem:[#allocation2 + $0x138] sm:$0xff] %v3509_v0  ;;  %v3400_v59 = vpop.eup %3399  ;;  %vm419_vm0 = vweird.f32 %v3680_v47  ;;  %v3708_v0 = vadd.f32 1.0, %v3398_v55  ;;  %3409 = vpow2.f32 %v2809_v50  ;;  %v3713_v5 = vor.u32 1.1754944e-38, %v425_v52 }
  0x27   : > { %v3402_v4 = vpop.eup %3401  ;;  %vm434_vm1 = vweird.f32 %v3683_v49  ;;  %3411 = vrcp.f32 %v3703_v62  ;;  %v455_v6 = vand.u32 2147483648, %v3703_v62  ;;  %vm3720_vm2 = vcmp.eq.f32.partialorder %v423_v56, 8.507059e+37 }
  0x28   : > { %v3718_v7 = vpop.eup %3403  ;;  %v453_v9 = vand.u32 2147483647, %v3703_v62  ;;  %3413 = vrcp.f32 %v3705_v63  ;;  %v470_v10 = vand.u32 2147483648, %v3705_v63  ;;  %v3727_v11 = vadd.f32 1.0, %v3400_v59 }
  0x29   : > { %vm3729_vm3 = vcmp.eq.f32.partialorder %v438_v60, 8.507059e+37  ;;  %v441_v14 = vor.u32 1.1754944e-38, %v440_v61  ;;  %v468_v15 = vand.u32 2147483647, %v3705_v63  ;;  %3415 = vrcp.f32 %v3708_v0 }
  0x2a   : > { %v3406_v12 = vpop.eup %3405  ;;  %vm449_vm4 = vweird.f32 %v3703_v62  ;;  %v3737_v24 = vor.u32 1.1754944e-38, %v455_v6  ;;  %vm464_vm5 = vweird.f32 %v3705_v63  ;;  %vm479_vm6 = vweird.f32 %v3708_v0 }
  0x2b   : > { %v3408_v16 = vpop.eup %3407  ;;  %v415_v20 = vmul.f32 %v3406_v12, %v3680_v47  ;;  %v483_v26 = vand.u32 2147483647, %v3708_v0  ;;  %v485_v27 = vand.u32 2147483648, %v3708_v0  ;;  %vm420_vm7 = vweird.f32 %v3406_v12 }
  0x2c   : > { %v430_v25 = vmul.f32 %v3408_v16, %v3683_v49  ;;  %v3410_v28 = vpop.eup %3409  ;;  %vm3744_vm8 = vcmp.eq.f32.partialorder %v453_v9, 8.507059e+37  ;;  %v471_v32 = vor.u32 1.1754944e-38, %v470_v10  ;;  %3417 = vrcp.f32 %v3727_v11  ;;  %vm3764_vm13 = vmor %vm419_vm0, %vm420_vm7 }
  0x2d   : > { %v416_v29 = vsub.f32 1.0, %v415_v20  ;;  %v3412_v34 = vpop.eup %3411  ;;  %vm435_vm9 = vweird.f32 %v3408_v16  ;;  %vm3749_vm10 = vcmp.eq.f32.partialorder %v468_v15, 8.507059e+37  ;;  %v498_v37 = vand.u32 2147483647, %v3727_v11 }
  0x2e   : > { %v431_v35 = vsub.f32 1.0, %v430_v25  ;;  %v500_v38 = vand.u32 2147483648, %v3727_v11  ;;  %v3414_v39 = vpop.eup %3413  ;;  %v445_v43 = vmul.f32 %v3412_v34, %v3703_v62  ;;  %vm3756_vm11 = vcmp.eq.f32.partialorder %v483_v26, 8.507059e+37  ;;  %vm3772_vm15 = vmor %vm434_vm1, %vm435_vm9 }
  0x2f   : > { %v417_v40 = vmul.f32 %v3406_v12, %v416_v29  ;;  %v3416_v45 = vpop.eup %3415  ;;  %vm450_vm14 = vweird.f32 %v3412_v34  ;;  %v460_v50 = vmul.f32 %v3414_v39, %v3705_v63  ;;  %v486_v51 = vor.u32 1.1754944e-38, %v485_v27 }
  0x30   : > { %v432_v48 = vmul.f32 %v3408_v16, %v431_v35  ;;  %v446_v55 = vsub.f32 1.0, %v445_v43  ;;  %vm465_vm12 = vweird.f32 %v3414_v39  ;;  %v475_v47 = vmul.f32 %v3416_v45, %v3708_v0  ;;  %vm3793_vm1 = vmor %vm449_vm4, %vm450_vm14 }
  0x31   : > { %v418_v52 = vadd.f32 %v3406_v12, %v417_v40  ;;  %v461_v59 = vsub.f32 1.0, %v460_v50  ;;  %vm480_vm0 = vweird.f32 %v3416_v45  ;;  %vm3777_vm7 = vcmp.eq.f32.partialorder %v498_v37, 8.507059e+37 }
  0x32   : > { %v433_v56 = vadd.f32 %v3408_v16, %v432_v48  ;;  %v501_v61 = vor.u32 1.1754944e-38, %v500_v38  ;;  %v3418_v6 = vpop.eup %3417  ;;  %v447_v9 = vmul.f32 %v3412_v34, %v446_v55  ;;  %v476_v10 = vsub.f32 1.0, %v475_v47  ;;  %vm3812_vm4 = vmor %vm479_vm6, %vm480_vm0 }
  0x33   : > { %v422_v49 = vsel %vm3764_vm13, %v3406_v12, %v418_v52  ;;  %v3783_v15 = vadd.f32 1.0, %v3402_v4  ;;  %v462_v27 = vmul.f32 %v3414_v39, %v461_v59  ;;  %v490_v12 = vmul.f32 %v3418_v6, %v3727_v11 }
  0x34   : > { %v427_v20 = vsel %vm3720_vm2, %v3713_v5, %v422_v49  ;;  %v437_v25 = vsel %vm3772_vm15, %v3408_v16, %v433_v56  ;;  %v448_v8 = vadd.f32 %v3412_v34, %v447_v9  ;;  %vm3804_vm2 = vmor %vm464_vm5, %vm465_vm12  ;;  %v477_v62 = vmul.f32 %v3416_v45, %v476_v10  ;;  %v310_v56 = vld [vmem:[%s3594_s12 + $0x70] sm:$0xff] }
  0x35   : > { %v654_v4 = vmul.f32 %v427_v20, %v3622_v17  ;;  %v442_v29 = vsel %vm3729_vm3, %v441_v14, %v437_v25  ;;  %v463_v35 = vadd.f32 %v3414_v39, %v462_v27  ;;  %v491_v13 = vsub.f32 1.0, %v490_v12 }
  0x36   : > { %v655_v16 = vmul.f32 %v442_v29, %v3625_v18  ;;  %vm495_vm3 = vweird.f32 %v3418_v6  ;;  %v452_v63 = vsel %vm3793_vm1, %v3412_v34, %v448_v8  ;;  %v478_v14 = vadd.f32 %v3416_v45, %v477_v62 }
  0x37   : > { %671 = vst [vmem:[#allocation2 + $0x28] sm:$0xff] %v654_v4  ;;  %3419 = vrcp.f32 %v3783_v15  ;;  %v3820_v18 = vadd.f32 1.0, %v3718_v7  ;;  %v457_v0 = vsel %vm3744_vm8, %v3737_v24, %v452_v63  ;;  %v467_v37 = vsel %vm3804_vm2, %v3414_v39, %v463_v35 }
  0x38   : > { %672 = vst [vmem:[#allocation2 + $0x30] sm:$0xff] %v655_v16  ;;  %v492_v38 = vmul.f32 %v3418_v6, %v491_v13  ;;  %v3827_v40 = vadd.f32 1.0, %v3410_v28  ;;  %v656_v43 = vmul.f32 %v457_v0, %v3628_v19  ;;  %v472_v34 = vsel %vm3749_vm10, %v471_v32, %v467_v37 }
  0x39   : > { %v482_v7 = vsel %vm3812_vm4, %v3416_v45, %v478_v14  ;;  %vm4499_vm5 = vweird.f32 %v3727_v11  ;;  %v513_v24 = vand.u32 2147483647, %v3783_v15  ;;  %v657_v28 = vmul.f32 %v472_v34, %v3633_v21 }
  0x3a   : > { %vm3836_vm6 = vmor %vm4499_vm5, %vm495_vm3  ;;  %v487_v19 = vsel %vm3756_vm11, %v486_v51, %v482_v7  ;;  %v493_v39 = vadd.f32 %v3418_v6, %v492_v38  ;;  %v515_v32 = vand.u32 2147483648, %v3783_v15  ;;  %673 = vst [vmem:[#allocation2 + $0x48] sm:$0xff] %v656_v43  ;;  %3421 = vrcp.f32 %v3820_v18 }
  0x3b   : > { %v658_v36 = vmul.f32 %v487_v19, %v3636_v22  ;;  %v2811_v11 = vmul.f32 -1.442695, %v3696_v57  ;;  %v2812_v45 = vmul.f32 -1.442695, %v3699_v58  ;;  %674 = vst [vmem:[#allocation2 + $0x50] sm:$0xff] %v657_v28  ;;  %3423 = vrcp.f32 %v3827_v40 }
  0x3c   : > { %v497_v21 = vsel %vm3836_vm6, %v3418_v6, %v493_v39  ;;  %v328_v48 = vmul.f32 %v3590_v1, %v309_v30  ;;  %vm509_vm8 = vweird.f32 %v3783_v15  ;;  %vm3861_vm9 = vcmp.eq.f32.partialorder %v513_v24, 8.507059e+37 }
  0x3d   : > { %v3420_v22 = vpop.eup %3419  ;;  %675 = vst [vmem:[#allocation2 + $0x68] sm:$0xff] %v658_v36  ;;  %v502_v50 = vsel %vm3777_vm7, %v501_v61, %v497_v21  ;;  %v528_v52 = vand.u32 2147483647, %v3820_v18  ;;  %v516_v55 = vor.u32 1.1754944e-38, %v515_v32  ;;  %v530_v47 = vand.u32 2147483648, %v3820_v18  ;;  %v311_v61 = vld [vmem:[%s3594_s12 + $0x78] sm:$0xff] }
  0x3e   : > { %v659_v54 = vmul.f32 %v502_v50, %v3639_v23  ;;  %v505_v3 = vmul.f32 %v3420_v22, %v3783_v15  ;;  %vm510_vm10 = vweird.f32 %v3420_v22  ;;  %vm524_vm11 = vweird.f32 %v3820_v18 }
  0x3f   : > { %vm539_vm12 = vweird.f32 %v3827_v40  ;;  %3425 = vpow2.f32 %v3690_v53  ;;  %v2813_v60 = vmul.f32 -1.442695, %v3855_v44  ;;  %v3875_v23 = vadd.f32 %v3596_v2, %v328_v48  ;;  %vm3889_vm14 = vmor %vm509_vm8, %vm510_vm10 }
  0x40   : > { %676 = vst [vmem:[#allocation2 + $0x70] sm:$0xff] %v659_v54  ;;  %v506_v59 = vsub.f32 1.0, %v505_v3  ;;  %3427 = vpow2.f32 %v2811_v11  ;;  %v3422_v6 = vpop.eup %3421  ;;  %vm3878_vm13 = vcmp.eq.f32.partialorder %v528_v52, 8.507059e+37  ;;  %v543_v9 = vand.u32 2147483647, %v3827_v40 }
  0x41   : > { %v545_v10 = vand.u32 2147483648, %v3827_v40  ;;  %v329_v53 = vmul.f32 %v3590_v1, %v310_v56  ;;  %v3424_v20 = vpop.eup %3423  ;;  %v520_v26 = vmul.f32 %v3422_v6, %v3820_v18  ;;  %v531_v27 = vor.u32 1.1754944e-38, %v530_v47 }
  0x42   : > { %v507_v25 = vmul.f32 %v3420_v22, %v506_v59  ;;  %3429 = vpow2.f32 %v2812_v45  ;;  %v535_v4 = vmul.f32 %v3424_v20, %v3827_v40  ;;  %v2814_v29 = vmul.f32 -1.442695, %v3875_v23 }
  0x43   : > { %v3896_v8 = vadd.f32 %v3596_v2, %v329_v53  ;;  %v330_v5 = vmul.f32 %v3590_v1, %v311_v61  ;;  %v521_v16 = vsub.f32 1.0, %v520_v26  ;;  %vm525_vm15 = vweird.f32 %v3422_v6 }
  0x44   : > { %v508_v62 = vadd.f32 %v3420_v22, %v507_v25  ;;  %3431 = vpow2.f32 %v2813_v60  ;;  %v536_v17 = vsub.f32 1.0, %v535_v4  ;;  %vm540_vm0 = vweird.f32 %v3424_v20  ;;  %vm3906_vm7 = vmor %vm524_vm11, %vm525_vm15 }
  0x45   : > { %v3426_v35 = vpop.eup %3425  ;;  %v546_v15 = vor.u32 1.1754944e-38, %v545_v10  ;;  %v2815_v13 = vmul.f32 -1.442695, %v3896_v8  ;;  %v522_v0 = vmul.f32 %v3422_v6, %v521_v16  ;;  %3433 = vpow2.f32 %v2814_v29  ;;  %vm541_vm1 = vmor %vm539_vm12, %vm540_vm0 }
  0x46   : > { %v3428_v63 = vpop.eup %3427  ;;  %v512_v14 = vsel %vm3889_vm14, %v3420_v22, %v508_v62  ;;  %v407_v37 = vadd.f32 1.0, %v3426_v35  ;;  %v537_v34 = vmul.f32 %v3424_v20, %v536_v17  ;;  %v3915_v28 = vadd.f32 %v3596_v2, %v330_v5 }
  0x47   : > { %v517_v38 = vsel %vm3861_vm9, %v516_v55, %v512_v14  ;;  %v408_v7 = vadd.f32 1.0, %v3428_v63  ;;  %3435 = vpow2.f32 %v2815_v13  ;;  %v523_v30 = vadd.f32 %v3422_v6, %v522_v0 }
  0x48   : > { %v3430_v46 = vpop.eup %3429  ;;  %v660_v24 = vmul.f32 %v517_v38, %v3651_v31  ;;  %3437 = vrcp.f32 %v407_v37  ;;  %v538_v18 = vadd.f32 %v3424_v20, %v537_v34  ;;  %vm544_vm2 = vcmp.eq.f32.partialorder %v543_v9, 8.507059e+37 }
  0x49   : > { %3439 = vrcp.f32 %v408_v7  ;;  %v527_v39 = vsel %vm3906_vm7, %v3422_v6, %v523_v30  ;;  %v558_v45 = vand.u32 2147483647, %v407_v37  ;;  %v2816_v21 = vmul.f32 -1.442695, %v3915_v28 }
  0x4a   : > { %v3432_v19 = vpop.eup %3431  ;;  %677 = vst [vmem:[#allocation2 + $0x88] sm:$0xff] %v660_v24  ;;  %v532_v31 = vsel %vm3878_vm13, %v531_v27, %v527_v39  ;;  %v542_v32 = vsel %vm541_vm1, %v3424_v20, %v538_v18  ;;  %v3924_v50 = vadd.f32 1.0, %v3430_v46  ;;  %vm554_vm4 = vweird.f32 %v407_v37 }
  0x4b   : > { %v3434_v36 = vpop.eup %3433  ;;  %v661_v40 = vmul.f32 %v532_v31, %v3656_v33  ;;  %v547_v11 = vsel %vm544_vm2, %v546_v15, %v542_v32  ;;  %v3926_v51 = vadd.f32 1.0, %v3432_v19  ;;  %v560_v54 = vand.u32 2147483648, %v407_v37 }
  0x4c   : > { %v662_v22 = vmul.f32 %v547_v11, %v3670_v41  ;;  %vm569_vm3 = vweird.f32 %v408_v7  ;;  %v573_v3 = vand.u32 2147483647, %v408_v7  ;;  %v575_v47 = vand.u32 2147483648, %v408_v7 }
  0x4d   : > { %v3436_v48 = vpop.eup %3435  ;;  %678 = vst [vmem:[#allocation2 + $0x90] sm:$0xff] %v661_v40  ;;  %3441 = vrcp.f32 %v3924_v50  ;;  %v3929_v56 = vadd.f32 1.0, %v3434_v36  ;;  %vm3931_vm5 = vcmp.eq.f32.partialorder %v558_v45, 8.507059e+37  ;;  %v588_v6 = vand.u32 2147483647, %v3924_v50 }
  0x4e   : > { %v3438_v52 = vpop.eup %3437  ;;  %679 = vst [vmem:[#allocation2 + $0xa8] sm:$0xff] %v662_v22  ;;  %v3935_v60 = vadd.f32 1.0, %v3436_v48  ;;  %3443 = vpow2.f32 %v2816_v21  ;;  %v590_v9 = vand.u32 2147483648, %v3924_v50  ;;  %v603_v10 = vand.u32 2147483647, %v3926_v51 }
  0x4f   : > { %v3440_v55 = vpop.eup %3439  ;;  %v550_v33 = vmul.f32 %v3438_v52, %v407_v37  ;;  %vm555_vm6 = vweird.f32 %v3438_v52  ;;  %3445 = vrcp.f32 %v3926_v51  ;;  %v561_v20 = vor.u32 1.1754944e-38, %v560_v54 }
  0x50   : > { %v565_v59 = vmul.f32 %v3440_v55, %v408_v7  ;;  %vm570_vm8 = vweird.f32 %v3440_v55  ;;  %v605_v25 = vand.u32 2147483648, %v3926_v51  ;;  %3447 = vrcp.f32 %v3929_v56  ;;  %vm3944_vm9 = vmor %vm554_vm4, %vm555_vm6 }
  0x51   : > { %v551_v61 = vsub.f32 1.0, %v550_v33  ;;  %vm3948_vm10 = vcmp.eq.f32.partialorder %v573_v3, 8.507059e+37  ;;  %v576_v4 = vor.u32 1.1754944e-38, %v575_v47  ;;  %vm584_vm11 = vweird.f32 %v3924_v50  ;;  %vm3954_vm12 = vmor %vm569_vm3, %vm570_vm8 }
  0x52   : > { %v566_v49 = vsub.f32 1.0, %v565_v59  ;;  %vm3958_vm13 = vcmp.eq.f32.partialorder %v588_v6, 8.507059e+37  ;;  %vm599_vm14 = vweird.f32 %v3926_v51  ;;  %3449 = vrcp.f32 %v3935_v60 }
  0x53   : > { %v552_v53 = vmul.f32 %v3438_v52, %v551_v61  ;;  %v3442_v29 = vpop.eup %3441  ;;  %v591_v13 = vor.u32 1.1754944e-38, %v590_v9  ;;  %vm3965_vm15 = vcmp.eq.f32.partialorder %v603_v10, 8.507059e+37  ;;  %v606_v37 = vor.u32 1.1754944e-38, %v605_v25 }
  0x54   : > { %v567_v27 = vmul.f32 %v3440_v55, %v566_v49  ;;  %v3444_v35 = vpop.eup %3443  ;;  %v580_v15 = vmul.f32 %v3442_v29, %v3924_v50  ;;  %vm585_vm0 = vweird.f32 %v3442_v29  ;;  %vm614_vm7 = vweird.f32 %v3929_v56 }
  0x55   : > { %v553_v5 = vadd.f32 %v3438_v52, %v552_v53  ;;  %v3446_v14 = vpop.eup %3445  ;;  %v618_v18 = vand.u32 2147483647, %v3929_v56  ;;  %vm3986_vm2 = vmor %vm584_vm11, %vm585_vm0  ;;  %vm629_vm3 = vweird.f32 %v3935_v60  ;;  %v413_v11 = vadd.f32 1.0, %v3444_v35 }
  0x56   : > { %v568_v17 = vadd.f32 %v3440_v55, %v567_v27  ;;  %v581_v34 = vsub.f32 1.0, %v580_v15  ;;  %v595_v7 = vmul.f32 %v3446_v14, %v3926_v51  ;;  %v3448_v46 = vpop.eup %3447  ;;  %vm600_vm1 = vweird.f32 %v3446_v14 }
  0x57   : > { %v557_v0 = vsel %vm3944_vm9, %v3438_v52, %v553_v5  ;;  %v610_v32 = vmul.f32 %v3448_v46, %v3929_v56  ;;  %vm615_vm4 = vweird.f32 %v3448_v46  ;;  %v633_v50 = vand.u32 2147483647, %v3935_v60 }
  0x58   : > { %v562_v38 = vsel %vm3931_vm5, %v561_v20, %v557_v0  ;;  %v572_v43 = vsel %vm3954_vm12, %v3440_v55, %v568_v17  ;;  %v582_v39 = vmul.f32 %v3442_v29, %v581_v34  ;;  %v596_v31 = vsub.f32 1.0, %v595_v7  ;;  %v3450_v36 = vpop.eup %3449  ;;  %vm3996_vm5 = vmor %vm599_vm14, %vm600_vm1 }
  0x59   : > { %v663_v24 = vmul.f32 %v562_v38, %v3674_v42  ;;  %v577_v30 = vsel %vm3948_vm10, %v576_v4, %v572_v43  ;;  %v620_v42 = vand.u32 2147483648, %v3929_v56  ;;  %v611_v21 = vsub.f32 1.0, %v610_v32  ;;  %vm4009_vm8 = vmor %vm614_vm7, %vm615_vm4 }
  0x5a   : > { %v664_v19 = vmul.f32 %v577_v30, %v3696_v57  ;;  %v583_v57 = vadd.f32 %v3442_v29, %v582_v39  ;;  %v597_v45 = vmul.f32 %v3446_v14, %v596_v31  ;;  %v625_v48 = vmul.f32 %v3450_v36, %v3935_v60 }
  0x5b   : > { %680 = vst [vmem:[#allocation2 + $0xb0] sm:$0xff] %v663_v24  ;;  %vm630_vm6 = vweird.f32 %v3450_v36  ;;  %v635_v52 = vand.u32 2147483648, %v3935_v60  ;;  %3451 = vrcp.f32 %v413_v11  ;;  %v612_v55 = vmul.f32 %v3448_v46, %v611_v21 }
  0x5c   : > { %681 = vst [vmem:[#allocation2 + $0xc8] sm:$0xff] %v664_v19  ;;  %v587_v54 = vsel %vm3986_vm2, %v3442_v29, %v583_v57  ;;  %v598_v3 = vadd.f32 %v3446_v14, %v597_v45  ;;  %v626_v33 = vsub.f32 1.0, %v625_v48  ;;  %vm619_vm9 = vcmp.eq.f32.partialorder %v618_v18, 8.507059e+37  ;;  %vm631_vm10 = vmor %vm629_vm3, %vm630_vm6 }
  0x5d   : > { %v592_v47 = vsel %vm3958_vm13, %v591_v13, %v587_v54  ;;  %v621_v41 = vor.u32 1.1754944e-38, %v620_v42  ;;  %v613_v6 = vadd.f32 %v3448_v46, %v612_v55  ;;  %v636_v56 = vor.u32 1.1754944e-38, %v635_v52 }
  0x5e   : > { %v665_v59 = vmul.f32 %v592_v47, %v3699_v58  ;;  %v602_v61 = vsel %vm3996_vm5, %v3446_v14, %v598_v3  ;;  %v627_v49 = vmul.f32 %v3450_v36, %v626_v33  ;;  %vm634_vm11 = vcmp.eq.f32.partialorder %v633_v50, 8.507059e+37 }
  0x5f   : > { %v607_v9 = vsel %vm3965_vm15, %v606_v37, %v602_v61  ;;  %v617_v53 = vsel %vm4009_vm8, %v3448_v46, %v613_v6  ;;  %vm644_vm12 = vweird.f32 %v413_v11  ;;  %v650_v60 = vand.u32 2147483648, %v413_v11 }
  0x60   : > { %682 = vst [vmem:[#allocation2 + $0xd0] sm:$0xff] %v665_v59  ;;  %v666_v10 = vmul.f32 %v607_v9, %v3855_v44  ;;  %v628_v58 = vadd.f32 %v3450_v36, %v627_v49  ;;  %v622_v25 = vsel %vm619_vm9, %v621_v41, %v617_v53  ;;  %v648_v44 = vand.u32 2147483647, %v413_v11 }
  0x61   : > { %v3452_v20 = vpop.eup %3451  ;;  %v667_v26 = vmul.f32 %v622_v25, %v3875_v23  ;;  %v651_v16 = vor.u32 1.1754944e-38, %v650_v60 }
  0x62   : > { %683 = vst [vmem:[#allocation2 + $0xe8] sm:$0xff] %v666_v10  ;;  %v632_v27 = vsel %vm631_vm10, %v3450_v36, %v628_v58  ;;  %v640_v12 = vmul.f32 %v3452_v20, %v413_v11  ;;  %vm645_vm13 = vweird.f32 %v3452_v20  ;;  %vm649_vm15 = vcmp.eq.f32.partialorder %v648_v44, 8.507059e+37 }
  0x63   : > { %v637_v4 = vsel %vm634_vm11, %v636_v56, %v632_v27  ;;  %684 = vst [vmem:[#allocation2 + $0xf0] sm:$0xff] %v667_v26  ;;  %vm646_vm14 = vmor %vm644_vm12, %vm645_vm13 }
  0x64   : > { %v668_v29 = vmul.f32 %v637_v4, %v3896_v8  ;;  %v641_v5 = vsub.f32 1.0, %v640_v12 }
  0x66   : > { %685 = vst [vmem:[#allocation2 + $0x108] sm:$0xff] %v668_v29  ;;  %v642_v62 = vmul.f32 %v3452_v20, %v641_v5 }
  0x68   : > { %v643_v35 = vadd.f32 %v3452_v20, %v642_v62 }
  0x6a   : > { %v647_v17 = vsel %vm646_vm14, %v3452_v20, %v643_v35  ;;  %690 = sbr.rel (%p2817_p7) target bundleno = 148 (0x94), region = 40 }
  0x6b   : > { %v652_v15 = vsel %vm649_vm15, %v651_v16, %v647_v17 }
  0x6c   : > { %v669_v23 = vmul.f32 %v652_v15, %v3915_v28 }
  0x6e   : > { %686 = vst [vmem:[#allocation2 + $0x110] sm:$0xff] %v669_v23 }
  0x6f   : > { %v694_v8 = vld [vmem:[%s693_s26] sm:$0xff]  ;;  %v695_v13 = vld [vmem:[%s693_s26 + $0x8] sm:$0xff] }
  0x70   : > { %v696_v63 = vmul.f32 %v3590_v1, %v694_v8  ;;  %v697_v14 = vmul.f32 %v3590_v1, %v695_v13 }
  0x72   : > { %v698_v0 = vadd.f32 %v3596_v2, %v696_v63  ;;  %v699_v37 = vadd.f32 %v3596_v2, %v697_v14 }
  0x74   : > { %v2820_v28 = vmul.f32 -1.442695, %v698_v0  ;;  %v2821_v38 = vmul.f32 -1.442695, %v699_v37 }
  0x76   : > { %3453 = vpow2.f32 %v2820_v28 }
  0x77   : > { %3455 = vpow2.f32 %v2821_v38 }
  0x7c   : > { %v3454_v43 = vpop.eup %3453 }
  0x7d   : > { %v3456_v34 = vpop.eup %3455  ;;  %v706_v7 = vadd.f32 1.0, %v3454_v43 }
  0x7e   : > { %v707_v46 = vadd.f32 1.0, %v3456_v34 }
  0x7f   : > { %3457 = vrcp.f32 %v706_v7  ;;  %vm713_vm0 = vweird.f32 %v706_v7  ;;  %v719_v19 = vand.u32 2147483648, %v706_v7  ;;  %v717_v32 = vand.u32 2147483647, %v706_v7 }
  0x80   : > { %3459 = vrcp.f32 %v707_v46  ;;  %v734_v36 = vand.u32 2147483648, %v707_v46  ;;  %vm728_vm1 = vweird.f32 %v707_v46  ;;  %v732_v42 = vand.u32 2147483647, %v707_v46 }
  0x81   : > { %v720_v57 = vor.u32 1.1754944e-38, %v719_v19  ;;  %vm718_vm3 = vcmp.eq.f32.partialorder %v717_v32, 8.507059e+37 }
  0x82   : > { %v735_v48 = vor.u32 1.1754944e-38, %v734_v36  ;;  %vm733_vm6 = vcmp.eq.f32.partialorder %v732_v42, 8.507059e+37 }
  0x85   : > { %v3458_v24 = vpop.eup %3457 }
  0x86   : > { %v3460_v30 = vpop.eup %3459  ;;  %v709_v18 = vmul.f32 %v3458_v24, %v706_v7  ;;  %vm714_vm7 = vweird.f32 %v3458_v24 }
  0x87   : > { %v724_v39 = vmul.f32 %v3460_v30, %v707_v46  ;;  %vm729_vm2 = vweird.f32 %v3460_v30  ;;  %vm715_vm4 = vmor %vm713_vm0, %vm714_vm7 }
  0x88   : > { %v710_v31 = vsub.f32 1.0, %v709_v18  ;;  %vm730_vm5 = vmor %vm728_vm1, %vm729_vm2 }
  0x89   : > { %v725_v40 = vsub.f32 1.0, %v724_v39 }
  0x8a   : > { %v711_v11 = vmul.f32 %v3458_v24, %v710_v31 }
  0x8b   : > { %v726_v45 = vmul.f32 %v3460_v30, %v725_v40 }
  0x8c   : > { %v712_v21 = vadd.f32 %v3458_v24, %v711_v11 }
  0x8d   : > { %v727_v22 = vadd.f32 %v3460_v30, %v726_v45 }
  0x8e   : > { %v716_v50 = vsel %vm715_vm4, %v3458_v24, %v712_v21 }
  0x8f   : > { %v721_v52 = vsel %vm718_vm3, %v720_v57, %v716_v50  ;;  %v731_v54 = vsel %vm730_vm5, %v3460_v30, %v727_v22 }
  0x90   : > { %v738_v3 = vmul.f32 %v721_v52, %v698_v0  ;;  %v736_v55 = vsel %vm733_vm6, %v735_v48, %v731_v54 }
  0x91   : > { %v739_v33 = vmul.f32 %v736_v55, %v699_v37 }
  0x92   : > { %740 = vst [vmem:[#allocation2 + $0x8] sm:$0xff] %v738_v3 }
  0x93   : > { %741 = vst [vmem:[#allocation2 + $0x10] sm:$0xff] %v739_v33 }
  0x94 PF: > { %p2822_p8 = scmp.ge.s32.totalorder %s3491_s15, 1 }
  0x96   : > { %745 = sbr.rel (%p2822_p8) target bundleno = 192 (0xc0), region = 44 }
  0x9b   : > { %v2825_v47 = vld [vmem:[%s3594_s12 + $0x80] sm:$0xff]  ;;  %v2826_v51 = vld [vmem:[%s3594_s12 + $0x88] sm:$0xff] }
  0x9c   : > { %v751_v41 = vmul.f32 %v3590_v1, %v2825_v47  ;;  %v752_v59 = vmul.f32 %v3590_v1, %v2826_v51 }
  0x9e   : > { %v753_v61 = vadd.f32 %v3596_v2, %v751_v41  ;;  %v754_v6 = vadd.f32 %v3596_v2, %v752_v59 }
  0xa0   : > { %v2827_v49 = vmul.f32 -1.442695, %v753_v61  ;;  %v2828_v9 = vmul.f32 -1.442695, %v754_v6 }
  0xa2   : > { %3461 = vpow2.f32 %v2827_v49 }
  0xa3   : > { %3463 = vpow2.f32 %v2828_v9 }
  0xa8   : > { %v3462_v56 = vpop.eup %3461 }
  0xa9   : > { %v3464_v10 = vpop.eup %3463  ;;  %v761_v53 = vadd.f32 1.0, %v3462_v56 }
  0xaa   : > { %v762_v58 = vadd.f32 1.0, %v3464_v10 }
  0xab   : > { %3465 = vrcp.f32 %v761_v53  ;;  %vm768_vm8 = vweird.f32 %v761_v53  ;;  %v774_v27 = vand.u32 2147483648, %v761_v53  ;;  %v772_v4 = vand.u32 2147483647, %v761_v53 }
  0xac   : > { %3467 = vrcp.f32 %v762_v58  ;;  %v789_v2 = vand.u32 2147483648, %v762_v58  ;;  %vm783_vm10 = vweird.f32 %v762_v58  ;;  %v787_v29 = vand.u32 2147483647, %v762_v58 }
  0xad   : > { %v775_v44 = vor.u32 1.1754944e-38, %v774_v27  ;;  %vm773_vm13 = vcmp.eq.f32.partialorder %v772_v4, 8.507059e+37 }
  0xae   : > { %v790_v35 = vor.u32 1.1754944e-38, %v789_v2  ;;  %vm788_vm15 = vcmp.eq.f32.partialorder %v787_v29, 8.507059e+37 }
  0xb1   : > { %v3466_v20 = vpop.eup %3465 }
  0xb2   : > { %v3468_v25 = vpop.eup %3467  ;;  %v764_v26 = vmul.f32 %v3466_v20, %v761_v53  ;;  %vm769_vm9 = vweird.f32 %v3466_v20 }
  0xb3   : > { %v779_v1 = vmul.f32 %v3468_v25, %v762_v58  ;;  %vm784_vm11 = vweird.f32 %v3468_v25  ;;  %vm770_vm12 = vmor %vm768_vm8, %vm769_vm9 }
  0xb4   : > { %v765_v12 = vsub.f32 1.0, %v764_v26  ;;  %vm785_vm14 = vmor %vm783_vm10, %vm784_vm11 }
  0xb5   : > { %v780_v60 = vsub.f32 1.0, %v779_v1 }
  0xb6   : > { %v766_v5 = vmul.f32 %v3466_v20, %v765_v12 }
  0xb7   : > { %v781_v62 = vmul.f32 %v3468_v25, %v780_v60 }
  0xb8   : > { %v767_v16 = vadd.f32 %v3466_v20, %v766_v5 }
  0xb9   : > { %v782_v17 = vadd.f32 %v3468_v25, %v781_v62 }
  0xba   : > { %v771_v15 = vsel %vm770_vm12, %v3466_v20, %v767_v16 }
  0xbb   : > { %v776_v23 = vsel %vm773_vm13, %v775_v44, %v771_v15  ;;  %v786_v8 = vsel %vm785_vm14, %v3468_v25, %v782_v17 }
  0xbc   : > { %v793_v13 = vmul.f32 %v776_v23, %v753_v61  ;;  %v791_v63 = vsel %vm788_vm15, %v790_v35, %v786_v8 }
  0xbd   : > { %v794_v14 = vmul.f32 %v791_v63, %v754_v6 }
  0xbe   : > { %796 = vst [vmem:[#allocation2 + $0x128] sm:$0xff] %v793_v13 }
  0xbf   : > { %797 = vst [vmem:[#allocation2 + $0x130] sm:$0xff] %v794_v14 }
  0xc0 PF: > { %v3265_v0 = vld [vmem:[%s4475_s3 + $0x78] sm:$0xff]  ;;  %v3264_v37 = vld [vmem:[%s4475_s3 + $0x70] sm:$0xff]  ;;  %v3263_v28 = vld [vmem:[%s4475_s3 + $0x68] sm:$0xff] }
  0xc1   : > { %3322 = vmatpush.bf16.msra.mxu1 %v3265_v0  ;;  %3323 = vmatpush.bf16.msra.mxu2 %v3265_v0  ;;  %v3262_v38 = vld [vmem:[%s4475_s3 + $0x60] sm:$0xff]  ;;  %v3261_v43 = vld [vmem:[%s4475_s3 + $0x58] sm:$0xff]  ;;  %v3260_v34 = vld [vmem:[%s4475_s3 + $0x50] sm:$0xff] }
  0xc2   : > { %3324 = vmatpush.bf16.msra.mxu3 %v3265_v0  ;;  %991 = vmatpush.bf16.msra.mxu0 %v3265_v0  ;;  %v850_v7 = vld [vmem:[#allocation2 + $0x48] sm:$0xff]  ;;  %v851_v46 = vld [vmem:[#allocation2 + $0x50] sm:$0xff]  ;;  %v3258_v3 = vld [vmem:[%s4475_s3 + $0x40] sm:$0xff] }
  0xc3   : > { %v854_v24 = vld [vmem:[#allocation2 + $0x88] sm:$0xff]  ;;  %v855_v30 = vld [vmem:[#allocation2 + $0x90] sm:$0xff]  ;;  %v866_v32 = vpack.c.bf16 %v850_v7, %v850_v7  ;;  %v867_v36 = vpack.c.bf16 %v851_v46, %v851_v46  ;;  %v3273_v41 = vld [vmem:[%s4475_s3 + $0xb8] sm:$0xff] }
  0xc4   : > { %v858_v18 = vld [vmem:[#allocation2 + $0xc8] sm:$0xff]  ;;  %v859_v19 = vld [vmem:[#allocation2 + $0xd0] sm:$0xff]  ;;  %v870_v40 = vpack.c.bf16 %v854_v24, %v854_v24  ;;  %v871_v42 = vpack.c.bf16 %v855_v30, %v855_v30  ;;  %v3257_v59 = vld [vmem:[%s4475_s3 + $0x38] sm:$0xff] }
  0xc5   : > { %3325 = vmatpush.bf16.msra.mxu1 %v3264_v37  ;;  %3326 = vmatpush.bf16.msra.mxu2 %v3264_v37  ;;  %v846_v39 = vld [vmem:[#allocation2 + $0x8] sm:$0xff]  ;;  %v847_v31 = vld [vmem:[#allocation2 + $0x10] sm:$0xff]  ;;  %v874_v11 = vpack.c.bf16 %v858_v18, %v858_v18  ;;  %v875_v45 = vpack.c.bf16 %v859_v19, %v859_v19  ;;  %v915_v22 = vunpack.c.l.b16 %v866_v32  ;;  %v916_v50 = vunpack.c.l.b16 %v867_v36  ;;  %v3281_v56 = vld [vmem:[%s4475_s3 + $0xf8] sm:$0xff] }
  0xc6   : > { %3327 = vmatpush.bf16.msra.mxu3 %v3264_v37  ;;  %992 = vmatpush.bf16.msra.mxu0 %v3264_v37  ;;  %v3259_v57 = vld [vmem:[%s4475_s3 + $0x48] sm:$0xff]  ;;  %v862_v21 = vpack.c.bf16 %v846_v39, %v846_v39  ;;  %v863_v48 = vpack.c.bf16 %v847_v31, %v847_v31  ;;  %v919_v52 = vunpack.c.l.b16 %v870_v40  ;;  %v920_v54 = vunpack.c.l.b16 %v871_v42  ;;  %v3289_v10 = vld [vmem:[%s4475_s3 + $0x138] sm:$0xff]  ;;  %v3272_v53 = vld [vmem:[%s4475_s3 + $0xb0] sm:$0xff] }
  0xc7   : > { %v923_v55 = vunpack.c.l.b16 %v874_v11  ;;  %v924_v33 = vunpack.c.l.b16 %v875_v45  ;;  %v4071_v61 = vpack.c.b16 %v916_v50, %v915_v22  ;;  %v3256_v58 = vld [vmem:[%s4475_s3 + $0x30] sm:$0xff]  ;;  %v852_v26 = vld [vmem:[#allocation2 + $0x68] sm:$0xff]  ;;  %v3270_v0 = vld [vmem:[%s4475_s3 + $0xa0] sm:$0xff] }
  0xc8   : > { %v911_v47 = vunpack.c.l.b16 %v862_v21  ;;  %v912_v51 = vunpack.c.l.b16 %v863_v48  ;;  %v4073_v6 = vpack.c.b16 %v920_v54, %v919_v52  ;;  %v3280_v20 = vld [vmem:[%s4475_s3 + $0xf0] sm:$0xff]  ;;  %v856_v1 = vld [vmem:[#allocation2 + $0xa8] sm:$0xff]  ;;  %v868_v62 = vpack.c.bf16 %v852_v26, %v852_v26  ;;  %v3254_v37 = vld [vmem:[%s4475_s3 + $0x20] sm:$0xff] }
  0xc9   : > { %3328 = vmatpush.bf16.msra.mxu1 %v3263_v28  ;;  %3329 = vmatpush.bf16.msra.mxu2 %v3263_v28  ;;  %v4075_v49 = vpack.c.b16 %v924_v33, %v923_v55  ;;  %v3288_v25 = vld [vmem:[%s4475_s3 + $0x130] sm:$0xff]  ;;  %v860_v4 = vld [vmem:[#allocation2 + $0xe8] sm:$0xff]  ;;  %v872_v35 = vpack.c.bf16 %v856_v1, %v856_v1  ;;  %v3278_v18 = vld [vmem:[%s4475_s3 + $0xe0] sm:$0xff] }
  0xca   : > { %3330 = vmatpush.bf16.msra.mxu3 %v3263_v28  ;;  %993 = vmatpush.bf16.msra.mxu0 %v3263_v28  ;;  %v927_v9 = vpack.c.b16 %v912_v51, %v911_v47  ;;  %v853_v27 = vld [vmem:[#allocation2 + $0x70] sm:$0xff]  ;;  %v848_v60 = vld [vmem:[#allocation2 + $0x28] sm:$0xff]  ;;  %v876_v15 = vpack.c.bf16 %v860_v4, %v860_v4  ;;  %v917_v28 = vunpack.c.l.b16 %v868_v62  ;;  %v3286_v19 = vld [vmem:[%s4475_s3 + $0x120] sm:$0xff] }
  0xcb   : > { %v857_v12 = vld [vmem:[#allocation2 + $0xb0] sm:$0xff]  ;;  %v3271_v5 = vld [vmem:[%s4475_s3 + $0xa8] sm:$0xff]  ;;  %v869_v16 = vpack.c.bf16 %v853_v27, %v853_v27  ;;  %v864_v8 = vpack.c.bf16 %v848_v60, %v848_v60  ;;  %v3269_v39 = vld [vmem:[%s4475_s3 + $0x98] sm:$0xff] }
  0xcc   : > { %v861_v2 = vld [vmem:[#allocation2 + $0xf0] sm:$0xff]  ;;  %v3255_v44 = vld [vmem:[%s4475_s3 + $0x28] sm:$0xff]  ;;  %v873_v17 = vpack.c.bf16 %v857_v12, %v857_v12  ;;  %v925_v7 = vunpack.c.l.b16 %v876_v15  ;;  %v3253_v31 = vld [vmem:[%s4475_s3 + $0x18] sm:$0xff] }
  0xcd   : > { %3331 = vmatpush.bf16.msra.mxu1 %v3262_v38  ;;  %3332 = vmatpush.bf16.msra.mxu2 %v3262_v38  ;;  %v849_v29 = vld [vmem:[#allocation2 + $0x30] sm:$0xff]  ;;  %v877_v23 = vpack.c.bf16 %v861_v2, %v861_v2  ;;  %v3279_v63 = vld [vmem:[%s4475_s3 + $0xe8] sm:$0xff]  ;;  %v913_v24 = vunpack.c.l.b16 %v864_v8  ;;  %v3277_v11 = vld [vmem:[%s4475_s3 + $0xd8] sm:$0xff] }
  0xce   : > { %3333 = vmatpush.bf16.msra.mxu3 %v3262_v38  ;;  %994 = vmatpush.bf16.msra.mxu0 %v3262_v38  ;;  %v865_v13 = vpack.c.bf16 %v849_v29, %v849_v29  ;;  %v3287_v14 = vld [vmem:[%s4475_s3 + $0x128] sm:$0xff]  ;;  %v918_v38 = vunpack.c.l.b16 %v869_v16  ;;  %v3268_v45 = vld [vmem:[%s4475_s3 + $0x90] sm:$0xff]  ;;  %v3250_v26 = vld [vmem:[%s4475_s3] sm:$0xff] }
  0xcf   : > { %v926_v46 = vunpack.c.l.b16 %v877_v23  ;;  %v3252_v21 = vld [vmem:[%s4475_s3 + $0x10] sm:$0xff]  ;;  %v798_v22 = vld [vmem:[#allocation2 + $0x7] sm:$0xff]  ;;  %v3305_v2 = vld [vmem:[%s4475_s3 + $0x1b8] sm:$0xff] }
  0xd0   : > { %v914_v30 = vunpack.c.l.b16 %v865_v13  ;;  %v4128_v32 = vpack.c.b16 %v918_v38, %v917_v28  ;;  %v3276_v48 = vld [vmem:[%s4475_s3 + $0xd0] sm:$0xff]  ;;  %v1395_v55 = vld [vmem:[#allocation2 + $0x27] sm:$0xff]  ;;  %v3297_v60 = vld [vmem:[%s4475_s3 + $0x178] sm:$0xff] }
  0xd1   : > { %3334 = vmatpush.bf16.msra.mxu1 %v3261_v43  ;;  %3335 = vmatpush.bf16.msra.mxu2 %v3261_v43  ;;  %v4132_v40 = vpack.c.b16 %v926_v46, %v925_v7  ;;  %v799_v50 = vld [vmem:[#allocation2 + $0xf] sm:$0xff]  ;;  %v3282_v62 = vld [vmem:[%s4475_s3 + $0x100] sm:$0xff]  ;;  %v3313_v16 = vld [vmem:[%s4475_s3 + $0x1f8] sm:$0xff] }
  0xd2   : > { %3336 = vmatpush.bf16.msra.mxu3 %v3261_v43  ;;  %995 = vmatpush.bf16.msra.mxu0 %v3261_v43  ;;  %v921_v43 = vunpack.c.l.b16 %v872_v35  ;;  %v4134_v42 = vpack.c.b16 %v914_v30, %v913_v24  ;;  %v1185_v52 = vld [vmem:[#allocation2 + $0x9] sm:$0xff]  ;;  %v1186_v54 = vld [vmem:[#allocation2 + $0x11] sm:$0xff] }
  0xd3   : > { %v1396_v33 = vld [vmem:[#allocation2 + $0x2f] sm:$0xff]  ;;  %v3321_v35 = vld [vmem:[%s4475_s3 + $0x238] sm:$0xff]  ;;  %v1397_v28 = vld [vmem:[#allocation2 + $0x47] sm:$0xff] }
  0xd4   : > { %v3267_v47 = vld [vmem:[%s4475_s3 + $0x88] sm:$0xff]  ;;  %v3304_v8 = vld [vmem:[%s4475_s3 + $0x1b0] sm:$0xff] }
  0xd5   : > { %3337 = vmatpush.bf16.msra.mxu1 %v3260_v34  ;;  %3338 = vmatpush.bf16.msra.mxu2 %v3260_v34  ;;  %v3251_v51 = vld [vmem:[%s4475_s3 + $0x8] sm:$0xff]  ;;  %v3296_v13 = vld [vmem:[%s4475_s3 + $0x170] sm:$0xff] }
  0xd6   : > { %3339 = vmatpush.bf16.msra.mxu3 %v3260_v34  ;;  %996 = vmatpush.bf16.msra.mxu0 %v3260_v34  ;;  %v922_v34 = vunpack.c.l.b16 %v873_v17  ;;  %v1398_v38 = vld [vmem:[#allocation2 + $0x4f] sm:$0xff] }
  0xd7   : > { %v3311_v7 = vld [vmem:[%s4475_s3 + $0x1e8] sm:$0xff] }
  0xd8   : > { %v4130_v36 = vpack.c.b16 %v922_v34, %v921_v43  ;;  %v3303_v43 = vld [vmem:[%s4475_s3 + $0x1a8] sm:$0xff] }
  0xd9   : > { %3340 = vmatpush.bf16.msra.mxu1 %v3259_v57  ;;  %3341 = vmatpush.bf16.msra.mxu2 %v3259_v57  ;;  %v3295_v34 = vld [vmem:[%s4475_s3 + $0x168] sm:$0xff] }
  0xda   : > { %3342 = vmatpush.bf16.msra.mxu3 %v3259_v57  ;;  %997 = vmatpush.bf16.msra.mxu0 %v3259_v57  ;;  %v3285_v57 = vld [vmem:[%s4475_s3 + $0x118] sm:$0xff]  ;;  %v3319_v46 = vld [vmem:[%s4475_s3 + $0x228] sm:$0xff] }
  0xdd   : > { %3343 = vmatpush.bf16.msra.mxu1 %v3258_v3  ;;  %3344 = vmatpush.bf16.msra.mxu2 %v3258_v3 }
  0xde   : > { %3345 = vmatpush.bf16.msra.mxu3 %v3258_v3  ;;  %998 = vmatpush.bf16.msra.mxu0 %v3258_v3  ;;  %v3284_v3 = vld [vmem:[%s4475_s3 + $0x110] sm:$0xff] }
  0xe0   : > { %1009 = vmatmul.bf16.vlgmr.msra.gmra.mxu1 %v4071_v61  ;;  %1019 = vmatmul.bf16.vlgmr.msra.gmra.mxu2 %v4073_v6 }
  0xe1   : > { %1330 = vmatpush.bf16.msrb.mxu2 %v3273_v41  ;;  %1136 = vmatpush.bf16.msrb.mxu1 %v3257_v59  ;;  %v814_v41 = vpack.c.bf16 %v798_v22, %v798_v22  ;;  %v815_v59 = vpack.c.bf16 %v799_v50, %v799_v50  ;;  %v3302_v22 = vld [vmem:[%s4475_s3 + $0x1a0] sm:$0xff] }
  0xe2   : > { %1029 = vmatmul.bf16.vlgmr.msra.gmra.mxu3 %v4075_v49  ;;  %999 = vmatmul.bf16.vlgmr.msra.gmra.mxu0 %v927_v9  ;;  %v1201_v9 = vpack.c.bf16 %v1185_v52, %v1185_v52  ;;  %v3310_v50 = vld [vmem:[%s4475_s3 + $0x1e0] sm:$0xff] }
  0xe3   : > { %1540 = vmatpush.bf16.msrb.mxu3 %v3281_v56  ;;  %1750 = vmatpush.bf16.msrb.mxu0 %v3289_v10  ;;  %v1202_v56 = vpack.c.bf16 %v1186_v54, %v1186_v54  ;;  %v1411_v10 = vpack.c.bf16 %v1395_v55, %v1395_v55  ;;  %v1056_v27 = vunpack.c.l.b16 %v814_v41  ;;  %v1057_v1 = vunpack.c.l.b16 %v815_v59  ;;  %v3294_v52 = vld [vmem:[%s4475_s3 + $0x160] sm:$0xff] }
  0xe4   : > { %v1250_v12 = vunpack.c.l.b16 %v1201_v9  ;;  %v1399_v54 = vld [vmem:[#allocation2 + $0x67] sm:$0xff] }
  0xe5   : > { %1331 = vmatpush.bf16.msrb.mxu2 %v3272_v53  ;;  %1137 = vmatpush.bf16.msrb.mxu1 %v3256_v58  ;;  %v1412_v53 = vpack.c.bf16 %v1396_v33, %v1396_v33  ;;  %v3275_v58 = vld [vmem:[%s4475_s3 + $0xc8] sm:$0xff]  ;;  %v1251_v4 = vunpack.c.l.b16 %v1202_v56  ;;  %v1460_v29 = vunpack.c.l.b16 %v1411_v10  ;;  %v1072_v17 = vpack.c.b16 %v1057_v1, %v1056_v27  ;;  %v3318_v55 = vld [vmem:[%s4475_s3 + $0x220] sm:$0xff]  ;;  %v3293_v27 = vld [vmem:[%s4475_s3 + $0x158] sm:$0xff] }
  0xe6   : > { %v1401_v1 = vld [vmem:[#allocation2 + $0x87] sm:$0xff] }
  0xe7   : > { %1541 = vmatpush.bf16.msrb.mxu3 %v3280_v20  ;;  %1751 = vmatpush.bf16.msrb.mxu0 %v3288_v25  ;;  %v3283_v20 = vld [vmem:[%s4475_s3 + $0x108] sm:$0xff]  ;;  %v3266_v25 = vld [vmem:[%s4475_s3 + $0x80] sm:$0xff]  ;;  %v1266_v15 = vpack.c.b16 %v1251_v4, %v1250_v12  ;;  %v3317_v4 = vld [vmem:[%s4475_s3 + $0x218] sm:$0xff] }
  0xe8   : > { %v1402_v12 = vld [vmem:[#allocation2 + $0x8f] sm:$0xff] }
  0xe9   : > { %1332 = vmatpush.bf16.msrb.mxu2 %v3271_v5  ;;  %1138 = vmatpush.bf16.msrb.mxu1 %v3255_v44  ;;  %v1461_v5 = vunpack.c.l.b16 %v1412_v53  ;;  %v3274_v44 = vld [vmem:[%s4475_s3 + $0xc0] sm:$0xff] }
  0xeb   : > { %1542 = vmatpush.bf16.msrb.mxu3 %v3279_v63  ;;  %1752 = vmatpush.bf16.msrb.mxu0 %v3287_v14  ;;  %v1476_v23 = vpack.c.b16 %v1461_v5, %v1460_v29  ;;  %v3312_v63 = vld [vmem:[%s4475_s3 + $0x1f0] sm:$0xff]  ;;  %v1418_v29 = vpack.c.bf16 %v1402_v12, %v1402_v12  ;;  %v3314_v12 = vld [vmem:[%s4475_s3 + $0x200] sm:$0xff] }
  0xec   : > { %v3320_v14 = vld [vmem:[%s4475_s3 + $0x230] sm:$0xff] }
  0xed   : > { %1333 = vmatpush.bf16.msrb.mxu2 %v3270_v0  ;;  %1139 = vmatpush.bf16.msrb.mxu1 %v3254_v37  ;;  %v1187_v0 = vld [vmem:[#allocation2 + $0x29] sm:$0xff]  ;;  %v1188_v37 = vld [vmem:[#allocation2 + $0x31] sm:$0xff] }
  0xee   : > { %v1203_v24 = vpack.c.bf16 %v1187_v0, %v1187_v0  ;;  %v1204_v30 = vpack.c.bf16 %v1188_v37, %v1188_v37  ;;  %v1404_v0 = vld [vmem:[#allocation2 + $0xaf] sm:$0xff] }
  0xef   : > { %1543 = vmatpush.bf16.msrb.mxu3 %v3278_v18  ;;  %1753 = vmatpush.bf16.msrb.mxu0 %v3286_v19  ;;  %v1413_v18 = vpack.c.bf16 %v1397_v28, %v1397_v28  ;;  %v1414_v19 = vpack.c.bf16 %v1398_v38, %v1398_v38  ;;  %v3316_v37 = vld [vmem:[%s4475_s3 + $0x210] sm:$0xff] }
  0xf0   : > { %1014 = vmatmul.bf16.gmra.mxu1 %v4128_v32  ;;  %1024 = vmatmul.bf16.gmra.mxu2 %v4130_v36 }
  0xf1   : > { %1334 = vmatpush.bf16.msrb.mxu2 %v3269_v39  ;;  %1140 = vmatpush.bf16.msrb.mxu1 %v3253_v31  ;;  %v1252_v39 = vunpack.c.l.b16 %v1203_v24  ;;  %v1253_v31 = vunpack.c.l.b16 %v1204_v30 }
  0xf2   : > { %1034 = vmatmul.bf16.gmra.mxu3 %v4132_v40  ;;  %1004 = vmatmul.bf16.gmra.mxu0 %v4134_v42 }
  0xf3   : > { %1544 = vmatpush.bf16.msrb.mxu3 %v3277_v11  ;;  %1754 = vmatpush.bf16.msrb.mxu0 %v3285_v57  ;;  %v1463_v11 = vunpack.c.l.b16 %v1414_v19  ;;  %v4219_v57 = vpack.c.b16 %v1253_v31, %v1252_v39  ;;  %v1195_v19 = vld [vmem:[#allocation2 + $0xa9] sm:$0xff]  ;;  %v1196_v39 = vld [vmem:[#allocation2 + $0xb1] sm:$0xff] }
  0xf4   : > { %v3299_v31 = vld [vmem:[%s4475_s3 + $0x188] sm:$0xff] }
  0xf5   : > { %1335 = vmatpush.bf16.msrb.mxu2 %v3268_v45  ;;  %1141 = vmatpush.bf16.msrb.mxu1 %v3252_v21  ;;  %v1189_v21 = vld [vmem:[#allocation2 + $0x49] sm:$0xff] }
  0xf7   : > { %1545 = vmatpush.bf16.msrb.mxu3 %v3276_v48  ;;  %1755 = vmatpush.bf16.msrb.mxu0 %v3284_v3  ;;  %v1190_v48 = vld [vmem:[#allocation2 + $0x51] sm:$0xff] }
  0xf8   : > { %v1400_v3 = vld [vmem:[#allocation2 + $0x6f] sm:$0xff]  ;;  %v1206_v33 = vpack.c.bf16 %v1190_v48, %v1190_v48  ;;  %v1211_v48 = vpack.c.bf16 %v1195_v19, %v1195_v19 }
  0xf9   : > { %1336 = vmatpush.bf16.msrb.mxu2 %v3267_v47  ;;  %1142 = vmatpush.bf16.msrb.mxu1 %v3251_v51  ;;  %v1415_v47 = vpack.c.bf16 %v1399_v54, %v1399_v54  ;;  %v1416_v51 = vpack.c.bf16 %v1400_v3, %v1400_v3  ;;  %v3315_v54 = vld [vmem:[%s4475_s3 + $0x208] sm:$0xff] }
  0xfa   : > { %v1255_v59 = vunpack.c.l.b16 %v1206_v33  ;;  %v1260_v3 = vunpack.c.l.b16 %v1211_v48 }
  0xfb   : > { %1546 = vmatpush.bf16.msrb.mxu3 %v3275_v58  ;;  %1756 = vmatpush.bf16.msrb.mxu0 %v3283_v20  ;;  %v1464_v9 = vunpack.c.l.b16 %v1415_v47  ;;  %v1465_v56 = vunpack.c.l.b16 %v1416_v51  ;;  %v1191_v58 = vld [vmem:[#allocation2 + $0x69] sm:$0xff]  ;;  %v1192_v20 = vld [vmem:[#allocation2 + $0x71] sm:$0xff] }
  0xfd   : > { %1337 = vmatpush.bf16.msrb.mxu2 %v3266_v25  ;;  %1143 = vmatpush.bf16.msrb.mxu1 %v3250_v26  ;;  %v4240_v53 = vpack.c.b16 %v1465_v56, %v1464_v9  ;;  %v3301_v25 = vld [vmem:[%s4475_s3 + $0x198] sm:$0xff]  ;;  %v3298_v9 = vld [vmem:[%s4475_s3 + $0x180] sm:$0xff] }
  0xfe   : > { %v3309_v26 = vld [vmem:[%s4475_s3 + $0x1d8] sm:$0xff]  ;;  %v3306_v56 = vld [vmem:[%s4475_s3 + $0x1c0] sm:$0xff] }
  0xff   : > { %1547 = vmatpush.bf16.msrb.mxu3 %v3274_v44  ;;  %1757 = vmatpush.bf16.msrb.mxu0 %v3282_v62 }
 0x100   : > { %1144 = vmatmul.bf16.vlgmr.msrb.gmra.mxu1 %v1072_v17  ;;  %1338 = vmatmul.bf16.vlgmr.msrb.gmra.mxu2 %v1266_v15  ;;  %v1193_v15 = vld [vmem:[#allocation2 + $0x89] sm:$0xff] }
 0x101   : > { %2171 = vmatpush.bf16.msra.mxu2 %v3305_v2  ;;  %1960 = vmatpush.bf16.msra.mxu1 %v3297_v60  ;;  %v1208_v2 = vpack.c.bf16 %v1192_v20, %v1192_v20  ;;  %v1417_v60 = vpack.c.bf16 %v1401_v1, %v1401_v1  ;;  %v1408_v20 = vld [vmem:[#allocation2 + $0xef] sm:$0xff] }
 0x102   : > { %1548 = vmatmul.bf16.vlgmr.msrb.gmra.mxu3 %v1476_v23  ;;  %1758 = vmatmul.bf16.vlgmr.msrb.gmra.mxu0 %v4134_v42  ;;  %v1462_v42 = vunpack.c.l.b16 %v1413_v18  ;;  %v1424_v1 = vpack.c.bf16 %v1408_v20, %v1408_v20 }
 0x103   : > { %2381 = vmatpush.bf16.msra.mxu3 %v3313_v16  ;;  %2591 = vmatpush.bf16.msra.mxu0 %v3321_v35  ;;  %v1257_v44 = vunpack.c.l.b16 %v1208_v2  ;;  %v1466_v62 = vunpack.c.l.b16 %v1417_v60  ;;  %v1467_v16 = vunpack.c.l.b16 %v1418_v29 }
 0x104   : > { %v4221_v45 = vpack.c.b16 %v1463_v11, %v1462_v42  ;;  %v3307_v42 = vld [vmem:[%s4475_s3 + $0x1c8] sm:$0xff]  ;;  %v1473_v60 = vunpack.c.l.b16 %v1424_v1 }
 0x105   : > { %2172 = vmatpush.bf16.msra.mxu2 %v3304_v8  ;;  %1961 = vmatpush.bf16.msra.mxu1 %v3296_v13  ;;  %v4260_v17 = vpack.c.b16 %v1467_v16, %v1466_v62  ;;  %v3300_v8 = vld [vmem:[%s4475_s3 + $0x190] sm:$0xff]  ;;  %v1405_v11 = vld [vmem:[#allocation2 + $0xc7] sm:$0xff] }
 0x106   : > { %v3308_v13 = vld [vmem:[%s4475_s3 + $0x1d0] sm:$0xff] }
 0x107   : > { %2382 = vmatpush.bf16.msra.mxu3 %v3312_v63  ;;  %2592 = vmatpush.bf16.msra.mxu0 %v3320_v14  ;;  %v3292_v63 = vld [vmem:[%s4475_s3 + $0x150] sm:$0xff]  ;;  %v1403_v14 = vld [vmem:[#allocation2 + $0xa7] sm:$0xff] }
 0x108   : > { %v1419_v38 = vpack.c.bf16 %v1403_v14, %v1403_v14  ;;  %v1199_v16 = vld [vmem:[#allocation2 + $0xe9] sm:$0xff] }
 0x109   : > { %2173 = vmatpush.bf16.msra.mxu2 %v3303_v43  ;;  %1962 = vmatpush.bf16.msra.mxu1 %v3295_v34  ;;  %v1420_v43 = vpack.c.bf16 %v1404_v0, %v1404_v0 }
 0x10b   : > { %2383 = vmatpush.bf16.msra.mxu3 %v3311_v7  ;;  %2593 = vmatpush.bf16.msra.mxu0 %v3319_v46  ;;  %v1468_v46 = vunpack.c.l.b16 %v1419_v38  ;;  %v1469_v24 = vunpack.c.l.b16 %v1420_v43 }
 0x10d   : > { %2174 = vmatpush.bf16.msra.mxu2 %v3302_v22  ;;  %1963 = vmatpush.bf16.msra.mxu1 %v3294_v52  ;;  %v4280_v18 = vpack.c.b16 %v1469_v24, %v1468_v46  ;;  %v1212_v22 = vpack.c.bf16 %v1196_v39, %v1196_v39 }
 0x10f   : > { %2384 = vmatpush.bf16.msra.mxu3 %v3310_v50  ;;  %2594 = vmatpush.bf16.msra.mxu0 %v3318_v55  ;;  %v3291_v50 = vld [vmem:[%s4475_s3 + $0x148] sm:$0xff]  ;;  %v1261_v55 = vunpack.c.l.b16 %v1212_v22 }
 0x110   : > { %1149 = vmatmul.bf16.gmra.mxu1 %v1476_v23  ;;  %1343 = vmatmul.bf16.gmra.mxu2 %v4219_v57  ;;  %v1194_v23 = vld [vmem:[#allocation2 + $0x91] sm:$0xff] }
 0x111   : > { %2175 = vmatpush.bf16.msra.mxu2 %v3301_v25  ;;  %1964 = vmatpush.bf16.msra.mxu1 %v3293_v27  ;;  %v1210_v28 = vpack.c.bf16 %v1194_v23, %v1194_v23  ;;  %v4298_v47 = vpack.c.b16 %v1261_v55, %v1260_v3  ;;  %v3290_v27 = vld [vmem:[%s4475_s3 + $0x140] sm:$0xff]  ;;  %v2237_v3 = vld [vmem:[#allocation2 + $0x50] sm:$0xff] }
 0x112   : > { %1553 = vmatmul.bf16.gmra.mxu3 %v4221_v45  ;;  %1763 = vmatmul.bf16.gmra.mxu0 %v4071_v61  ;;  %v1205_v61 = vpack.c.bf16 %v1189_v21, %v1189_v21  ;;  %v1406_v21 = vld [vmem:[#allocation2 + $0xcf] sm:$0xff]  ;;  %v1409_v23 = vld [vmem:[#allocation2 + $0x107] sm:$0xff] }
 0x113   : > { %2385 = vmatpush.bf16.msra.mxu3 %v3309_v26  ;;  %2595 = vmatpush.bf16.msra.mxu0 %v3317_v4  ;;  %v1259_v7 = vunpack.c.l.b16 %v1210_v28  ;;  %v1422_v52 = vpack.c.bf16 %v1406_v21, %v1406_v21  ;;  %v1425_v38 = vpack.c.bf16 %v1409_v23, %v1409_v23 }
 0x114   : > { %v1254_v41 = vunpack.c.l.b16 %v1205_v61 }
 0x115   : > { %2176 = vmatpush.bf16.msra.mxu2 %v3300_v8  ;;  %1965 = vmatpush.bf16.msra.mxu1 %v3292_v63  ;;  %v1471_v33 = vunpack.c.l.b16 %v1422_v52  ;;  %v1410_v8 = vld [vmem:[#allocation2 + $0x10f] sm:$0xff]  ;;  %v1474_v19 = vunpack.c.l.b16 %v1425_v38 }
 0x116   : > { %v4238_v10 = vpack.c.b16 %v1255_v59, %v1254_v41  ;;  %v1197_v41 = vld [vmem:[#allocation2 + $0xc9] sm:$0xff]  ;;  %v1198_v59 = vld [vmem:[#allocation2 + $0xd1] sm:$0xff]  ;;  %v1426_v43 = vpack.c.bf16 %v1410_v8, %v1410_v8 }
 0x117   : > { %2386 = vmatpush.bf16.msra.mxu3 %v3308_v13  ;;  %2596 = vmatpush.bf16.msra.mxu0 %v3316_v37  ;;  %v1213_v25 = vpack.c.bf16 %v1197_v41, %v1197_v41  ;;  %v1214_v26 = vpack.c.bf16 %v1198_v59, %v1198_v59  ;;  %v1619_v13 = vld [vmem:[#allocation2 + $0x108] sm:$0xff]  ;;  %v1620_v63 = vld [vmem:[#allocation2 + $0x110] sm:$0xff]  ;;  %v1215_v37 = vpack.c.bf16 %v1199_v16, %v1199_v16 }
 0x118   : > { %v1475_v39 = vunpack.c.l.b16 %v1426_v43  ;;  %v2253_v59 = vpack.c.bf16 %v2237_v3, %v2237_v3 }
 0x119   : > { %2177 = vmatpush.bf16.msra.mxu2 %v3299_v31  ;;  %1966 = vmatpush.bf16.msra.mxu1 %v3291_v50  ;;  %v1262_v4 = vunpack.c.l.b16 %v1213_v25 }
 0x11a   : > { %v4342_v50 = vpack.c.b16 %v1475_v39, %v1474_v19  ;;  %v2241_v39 = vld [vmem:[#allocation2 + $0x90] sm:$0xff] }
 0x11b   : > { %2387 = vmatpush.bf16.msra.mxu3 %v3307_v42  ;;  %2597 = vmatpush.bf16.msra.mxu0 %v3315_v54  ;;  %v2236_v54 = vld [vmem:[#allocation2 + $0x48] sm:$0xff] }
 0x11c   : > { %v2252_v41 = vpack.c.bf16 %v2236_v54, %v2236_v54 }
 0x11d   : > { %2178 = vmatpush.bf16.msra.mxu2 %v3298_v9  ;;  %1967 = vmatpush.bf16.msra.mxu1 %v3290_v27 }
 0x11f   : > { %2388 = vmatpush.bf16.msra.mxu3 %v3306_v56  ;;  %2598 = vmatpush.bf16.msra.mxu0 %v3314_v12  ;;  %v2301_v56 = vunpack.c.l.b16 %v2252_v41  ;;  %v2238_v12 = vld [vmem:[#allocation2 + $0x68] sm:$0xff] }
 0x120   : > { %1154 = vmatmul.bf16.gmra.mxu1 %v4221_v45  ;;  %1348 = vmatmul.bf16.gmra.mxu2 %v4238_v10 }
 0x122   : > { %1558 = vmatmul.bf16.gmra.mxu3 %v4240_v53  ;;  %1768 = vmatmul.bf16.gmra.mxu0 %v4128_v32  ;;  %v1207_v32 = vpack.c.bf16 %v1191_v58, %v1191_v58  ;;  %v1407_v58 = vld [vmem:[#allocation2 + $0xe7] sm:$0xff] }
 0x124   : > { %v1256_v5 = vunpack.c.l.b16 %v1207_v32  ;;  %v1263_v32 = vunpack.c.l.b16 %v1214_v26 }
 0x126   : > { %v4258_v35 = vpack.c.b16 %v1257_v44, %v1256_v5  ;;  %v4318_v29 = vpack.c.b16 %v1263_v32, %v1262_v4  ;;  %v2239_v4 = vld [vmem:[#allocation2 + $0x70] sm:$0xff] }
 0x127   : > { %v2255_v23 = vpack.c.bf16 %v2239_v4, %v2239_v4 }
 0x130   : > { %1159 = vmatmul.bf16.gmra.mxu1 %v4240_v53  ;;  %1353 = vmatmul.bf16.gmra.mxu2 %v4258_v35 }
 0x132   : > { %1563 = vmatmul.bf16.gmra.mxu3 %v4260_v17  ;;  %1773 = vmatmul.bf16.gmra.mxu0 %v4073_v6  ;;  %v1209_v6 = vpack.c.bf16 %v1193_v15, %v1193_v15  ;;  %v1200_v15 = vld [vmem:[#allocation2 + $0xf1] sm:$0xff] }
 0x134   : > { %v1258_v34 = vunpack.c.l.b16 %v1209_v6  ;;  %v1216_v6 = vpack.c.bf16 %v1200_v15, %v1200_v15  ;;  %v2254_v15 = vpack.c.bf16 %v2238_v12, %v2238_v12 }
 0x136   : > { %v4278_v30 = vpack.c.b16 %v1259_v7, %v1258_v34  ;;  %v1635_v34 = vpack.c.bf16 %v1619_v13, %v1619_v13  ;;  %v1636_v7 = vpack.c.bf16 %v1620_v63, %v1620_v63  ;;  %v1265_v24 = vunpack.c.l.b16 %v1216_v6 }
 0x138   : > { %v1684_v31 = vunpack.c.l.b16 %v1635_v34  ;;  %v1685_v42 = vunpack.c.l.b16 %v1636_v7 }
 0x140   : > { %1164 = vmatmul.bf16.gmra.mxu1 %v4260_v17  ;;  %1358 = vmatmul.bf16.gmra.mxu2 %v4278_v30 }
 0x142   : > { %1568 = vmatmul.bf16.gmra.mxu3 %v4280_v18  ;;  %1778 = vmatmul.bf16.gmra.mxu0 %v4130_v36  ;;  %v1421_v36 = vpack.c.bf16 %v1405_v11, %v1405_v11 }
 0x144   : > { %v1470_v61 = vunpack.c.l.b16 %v1421_v36  ;;  %v4344_v36 = vpack.c.b16 %v1685_v42, %v1684_v31 }
 0x146   : > { %v4300_v51 = vpack.c.b16 %v1471_v33, %v1470_v61 }
 0x150   : > { %1169 = vmatmul.bf16.gmra.mxu1 %v4280_v18  ;;  %1363 = vmatmul.bf16.gmra.mxu2 %v4298_v47 }
 0x152   : > { %1573 = vmatmul.bf16.gmra.mxu3 %v4300_v51  ;;  %1783 = vmatmul.bf16.gmra.mxu0 %v4075_v49  ;;  %v1423_v49 = vpack.c.bf16 %v1407_v58, %v1407_v58  ;;  %v2302_v58 = vunpack.c.l.b16 %v2253_v59  ;;  %v2257_v59 = vpack.c.bf16 %v2241_v39, %v2241_v39 }
 0x154   : > { %v1472_v2 = vunpack.c.l.b16 %v1423_v49  ;;  %v2317_v27 = vpack.c.b16 %v2302_v58, %v2301_v56 }
 0x156   : > { %v4322_v44 = vpack.c.b16 %v1473_v60, %v1472_v2 }
 0x15d   : > { %v4320_v5 = vpop.f32.mrf.mxu1 }
 0x15f   : > { %v1000_v62 = vpop.f32.mrf.mxu0 }
 0x160   : > { %1174 = vmatmul.bf16.gmra.mxu1 %v4300_v51  ;;  %1368 = vmatmul.bf16.gmra.mxu2 %v4318_v29 }
 0x162   : > { %1578 = vmatmul.bf16.gmra.mxu3 %v4322_v44  ;;  %1788 = vmatmul.bf16.gmra.mxu0 %v4132_v40  ;;  %v1264_v40 = vunpack.c.l.b16 %v1215_v37  ;;  %v2303_v37 = vunpack.c.l.b16 %v2254_v15  ;;  %v2243_v15 = vld [vmem:[#allocation2 + $0xb0] sm:$0xff] }
 0x163   : > { %v4328_v14 = vpop.f32.mrf.mxu2 }
 0x164   : > { %v4338_v48 = vpack.c.b16 %v1265_v24, %v1264_v40 }
 0x165   : > { %v4330_v0 = vpop.f32.mrf.mxu3  ;;  %v4332_v28 = vpop.f32.mrf.mxu1 }
 0x167   : > { %v1002_v46 = vpop.f32.mrf.mxu0 }
 0x16b   : > { %v4334_v11 = vpop.f32.mrf.mxu2 }
 0x16d   : > { %v4336_v21 = vpop.f32.mrf.mxu3  ;;  %v4340_v22 = vpop.f32.mrf.mxu1 }
 0x16f   : > { %v1005_v52 = vpop.f32.mrf.mxu0 }
 0x170   : > { %1179 = vmatmul.bf16.gmra.mxu1 %v4322_v44  ;;  %1373 = vmatmul.bf16.gmra.mxu2 %v4338_v48 }
 0x172   : > { %1583 = vmatmul.bf16.gmra.mxu3 %v4342_v50  ;;  %1793 = vmatmul.bf16.gmra.mxu0 %v4344_v36 }
 0x173   : > { %v4350_v55 = vpop.f32.mrf.mxu2 }
 0x175   : > { %v4352_v61 = vpop.f32.mrf.mxu3  ;;  %v4354_v33 = vpop.f32.mrf.mxu1 }
 0x177   : > { %v1007_v9 = vpop.f32.mrf.mxu0 }
 0x17b   : > { %v4356_v20 = vpop.f32.mrf.mxu2 }
 0x17d   : > { %v4358_v25 = vpop.f32.mrf.mxu3  ;;  %v1145_v26 = vpop.f32.mrf.mxu1 }
 0x17e   : > { %v1146_v49 = vadd.f32 %v1145_v26, %v1000_v62 }
 0x17f   : > { %v1759_v1 = vpop.f32.mrf.mxu0 }
 0x180   : > { %1968 = vmatmul.bf16.vlgmr.msra.gmra.mxu1 %v4219_v57  ;;  %2179 = vmatmul.bf16.vlgmr.msra.gmra.mxu2 %v4221_v45  ;;  %v2304_v57 = vunpack.c.l.b16 %v2255_v23 }
 0x182   : > { %2389 = vmatmul.bf16.vlgmr.msra.gmra.mxu3 %v2317_v27  ;;  %2599 = vmatmul.bf16.vlgmr.msra.gmra.mxu0 %v4238_v10  ;;  %v2318_v34 = vpack.c.b16 %v2304_v57, %v2303_v37  ;;  %v2259_v57 = vpack.c.bf16 %v2243_v15, %v2243_v15  ;;  %v2246_v15 = vld [vmem:[#allocation2 + $0xe8] sm:$0xff] }
 0x183   : > { %v1339_v32 = vpop.f32.mrf.mxu2 }
 0x184   : > { %v1379_v2 = vadd.f32 %v1339_v32, %v1146_v49 }
 0x185   : > { %v1549_v60 = vpop.f32.mrf.mxu3  ;;  %v1147_v16 = vpop.f32.mrf.mxu1 }
 0x186   : > { %v1589_v8 = vadd.f32 %v1549_v60, %v1379_v2  ;;  %v1148_v13 = vadd.f32 %v1147_v16, %v1002_v46  ;;  %v2240_v46 = vld [vmem:[#allocation2 + $0x88] sm:$0xff] }
 0x187   : > { %v1761_v63 = vpop.f32.mrf.mxu0  ;;  %v2256_v41 = vpack.c.bf16 %v2240_v46, %v2240_v46 }
 0x188   : > { %v4363_v62 = vadd.f32 %v1759_v1, %v1589_v8 }
 0x18b   : > { %v1341_v6 = vpop.f32.mrf.mxu2 }
 0x18c   : > { %v1380_v45 = vadd.f32 %v1341_v6, %v1148_v13 }
 0x18d   : > { %v1551_v38 = vpop.f32.mrf.mxu3  ;;  %v1150_v43 = vpop.f32.mrf.mxu1 }
 0x18e   : > { %v1590_v7 = vadd.f32 %v1551_v38, %v1380_v45  ;;  %v1151_v40 = vadd.f32 %v1150_v43, %v1005_v52  ;;  %v2308_v38 = vunpack.c.l.b16 %v2259_v57  ;;  %v2262_v57 = vpack.c.bf16 %v2246_v15, %v2246_v15  ;;  %v2251_v15 = vld [vmem:[#allocation2 + $0x130] sm:$0xff] }
 0x18f   : > { %v1764_v24 = vpop.f32.mrf.mxu0 }
 0x190   : > { %1973 = vmatmul.bf16.gmra.mxu1 %v4238_v10  ;;  %2184 = vmatmul.bf16.gmra.mxu2 %v4240_v53  ;;  %v4367_v19 = vadd.f32 %v1761_v63, %v1590_v7  ;;  %v2305_v10 = vunpack.c.l.b16 %v2256_v41  ;;  %v2306_v53 = vunpack.c.l.b16 %v2257_v59 }
 0x192   : > { %2394 = vmatmul.bf16.gmra.mxu3 %v2318_v34  ;;  %2604 = vmatmul.bf16.gmra.mxu0 %v4258_v35  ;;  %v2319_v4 = vpack.c.b16 %v2306_v53, %v2305_v10 }
 0x193   : > { %v1344_v31 = vpop.f32.mrf.mxu2 }
 0x194   : > { %v1381_v42 = vadd.f32 %v1344_v31, %v1151_v40 }
 0x195   : > { %v1554_v54 = vpop.f32.mrf.mxu3  ;;  %v1152_v3 = vpop.f32.mrf.mxu1 }
 0x196   : > { %v1591_v56 = vadd.f32 %v1554_v54, %v1381_v42  ;;  %v1153_v52 = vadd.f32 %v1152_v3, %v1007_v9  ;;  %v2242_v9 = vld [vmem:[#allocation2 + $0xa8] sm:$0xff]  ;;  %v2245_v54 = vld [vmem:[#allocation2 + $0xd0] sm:$0xff] }
 0x197   : > { %v1766_v58 = vpop.f32.mrf.mxu0  ;;  %v2258_v37 = vpack.c.bf16 %v2242_v9, %v2242_v9 }
 0x198   : > { %v4370_v26 = vadd.f32 %v1764_v24, %v1591_v56 }
 0x19b   : > { %v1346_v27 = vpop.f32.mrf.mxu2 }
 0x19c   : > { %v1382_v49 = vadd.f32 %v1346_v27, %v1153_v52 }
 0x19d   : > { %v1556_v1 = vpop.f32.mrf.mxu3  ;;  %v1155_v12 = vpop.f32.mrf.mxu1 }
 0x19e   : > { %v1592_v32 = vadd.f32 %v1556_v1, %v1382_v49  ;;  %v1156_v2 = vadd.f32 %v1155_v12, %v4320_v5 }
 0x19f   : > { %v1769_v60 = vpop.f32.mrf.mxu0 }
 0x1a0   : > { %1978 = vmatmul.bf16.gmra.mxu1 %v4258_v35  ;;  %2189 = vmatmul.bf16.gmra.mxu2 %v4260_v17  ;;  %v4375_v16 = vadd.f32 %v1766_v58, %v1592_v32  ;;  %v2307_v17 = vunpack.c.l.b16 %v2258_v37  ;;  %v2261_v58 = vpack.c.bf16 %v2245_v54, %v2245_v54 }
 0x1a2   : > { %2399 = vmatmul.bf16.gmra.mxu3 %v2319_v4  ;;  %2609 = vmatmul.bf16.gmra.mxu0 %v4278_v30  ;;  %v2320_v24 = vpack.c.b16 %v2308_v38, %v2307_v17  ;;  %v2310_v27 = vunpack.c.l.b16 %v2261_v58 }
 0x1a3   : > { %v1349_v23 = vpop.f32.mrf.mxu2 }
 0x1a4   : > { %v1383_v8 = vadd.f32 %v1349_v23, %v1156_v2  ;;  %v2247_v23 = vld [vmem:[#allocation2 + $0xf0] sm:$0xff] }
 0x1a5   : > { %v1559_v13 = vpop.f32.mrf.mxu3  ;;  %v1157_v63 = vpop.f32.mrf.mxu1 }
 0x1a6   : > { %v1593_v6 = vadd.f32 %v1559_v13, %v1383_v8  ;;  %v1158_v5 = vadd.f32 %v1157_v63, %v4332_v28  ;;  %v2244_v28 = vld [vmem:[#allocation2 + $0xc8] sm:$0xff] }
 0x1a7   : > { %v1771_v45 = vpop.f32.mrf.mxu0  ;;  %v2260_v52 = vpack.c.bf16 %v2244_v28, %v2244_v28  ;;  %v2458_v28 = vld [vmem:[#allocation2 + $0x109] sm:$0xff] }
 0x1a8   : > { %v4379_v35 = vadd.f32 %v1769_v60, %v1593_v6  ;;  %v2263_v6 = vpack.c.bf16 %v2247_v23, %v2247_v23  ;;  %v2460_v23 = vld [vmem:[#allocation2 + $0x129] sm:$0xff] }
 0x1aa   : > { %v2312_v17 = vunpack.c.l.b16 %v2263_v6 }
 0x1ab   : > { %v1351_v43 = vpop.f32.mrf.mxu2 }
 0x1ac   : > { %v1384_v34 = vadd.f32 %v1351_v43, %v1158_v5 }
 0x1ad   : > { %v1561_v7 = vpop.f32.mrf.mxu3  ;;  %v1160_v40 = vpop.f32.mrf.mxu1 }
 0x1ae   : > { %v1594_v46 = vadd.f32 %v1561_v7, %v1384_v34  ;;  %v1161_v39 = vadd.f32 %v1160_v40, %v4340_v22 }
 0x1af   : > { %v1774_v31 = vpop.f32.mrf.mxu0 }
 0x1b0   : > { %1983 = vmatmul.bf16.gmra.mxu1 %v4278_v30  ;;  %2194 = vmatmul.bf16.gmra.mxu2 %v4280_v18  ;;  %v4384_v42 = vadd.f32 %v1771_v45, %v1594_v46  ;;  %v2309_v18 = vunpack.c.l.b16 %v2260_v52 }
 0x1b2   : > { %2404 = vmatmul.bf16.gmra.mxu3 %v2320_v24  ;;  %2614 = vmatmul.bf16.gmra.mxu0 %v4298_v47  ;;  %v2321_v32 = vpack.c.b16 %v2310_v27, %v2309_v18 }
 0x1b3   : > { %v1354_v3 = vpop.f32.mrf.mxu2 }
 0x1b4   : > { %v1385_v41 = vadd.f32 %v1354_v3, %v1161_v39 }
 0x1b5   : > { %v1564_v59 = vpop.f32.mrf.mxu3  ;;  %v1162_v56 = vpop.f32.mrf.mxu1 }
 0x1b6   : > { %v1595_v10 = vadd.f32 %v1564_v59, %v1385_v41  ;;  %v1163_v22 = vadd.f32 %v1162_v56, %v4354_v33  ;;  %v2474_v56 = vpack.c.bf16 %v2458_v28, %v2458_v28 }
 0x1b7   : > { %v1776_v53 = vpop.f32.mrf.mxu0 }
 0x1b8   : > { %v4388_v30 = vadd.f32 %v1774_v31, %v1595_v10 }
 0x1bb   : > { %v1356_v49 = vpop.f32.mrf.mxu2 }
 0x1bc   : > { %v1386_v1 = vadd.f32 %v1356_v49, %v1163_v22 }
 0x1bd   : > { %v1566_v12 = vpop.f32.mrf.mxu3  ;;  %v1165_v4 = vpop.f32.mrf.mxu1 }
 0x1be   : > { %v1596_v2 = vadd.f32 %v1566_v12, %v1386_v1  ;;  %v1166_v33 = vadd.f32 %v1165_v4, %v4328_v14 }
 0x1bf   : > { %v1779_v60 = vpop.f32.mrf.mxu0 }
 0x1c0   : > { %1988 = vmatmul.bf16.gmra.mxu1 %v4298_v47  ;;  %2199 = vmatmul.bf16.gmra.mxu2 %v4300_v51  ;;  %v4392_v9 = vadd.f32 %v1776_v53, %v1596_v2  ;;  %v2311_v51 = vunpack.c.l.b16 %v2262_v57  ;;  %v2040_v2 = vld [vmem:[#allocation2 + $0x127] sm:$0xff] }
 0x1c1   : > { %v2056_v57 = vpack.c.bf16 %v2040_v2, %v2040_v2 }
 0x1c2   : > { %2409 = vmatmul.bf16.gmra.mxu3 %v2321_v32  ;;  %2619 = vmatmul.bf16.gmra.mxu0 %v4318_v29  ;;  %v2322_v40 = vpack.c.b16 %v2312_v17, %v2311_v51 }
 0x1c3   : > { %v1359_v8 = vpop.f32.mrf.mxu2 }
 0x1c4   : > { %v1387_v13 = vadd.f32 %v1359_v8, %v1166_v33  ;;  %v2250_v33 = vld [vmem:[#allocation2 + $0x128] sm:$0xff]  ;;  %v2461_v8 = vld [vmem:[#allocation2 + $0x131] sm:$0xff] }
 0x1c5   : > { %v1569_v63 = vpop.f32.mrf.mxu3  ;;  %v1167_v37 = vpop.f32.mrf.mxu1  ;;  %v2477_v51 = vpack.c.bf16 %v2461_v8, %v2461_v8 }
 0x1c6   : > { %v1597_v5 = vadd.f32 %v1569_v63, %v1387_v13  ;;  %v1168_v38 = vadd.f32 %v1167_v37, %v4334_v11  ;;  %v2459_v11 = vld [vmem:[#allocation2 + $0x111] sm:$0xff] }
 0x1c7   : > { %v1781_v45 = vpop.f32.mrf.mxu0  ;;  %v2475_v52 = vpack.c.bf16 %v2459_v11, %v2459_v11 }
 0x1c8   : > { %v4396_v47 = vadd.f32 %v1779_v60, %v1597_v5  ;;  %v2041_v60 = vld [vmem:[#allocation2 + $0x12f] sm:$0xff]  ;;  %v2267_v5 = vpack.c.bf16 %v2251_v15, %v2251_v15 }
 0x1c9   : > { %v2524_v22 = vunpack.c.l.b16 %v2475_v52 }
 0x1cb   : > { %v1361_v43 = vpop.f32.mrf.mxu2 }
 0x1cc   : > { %v1388_v34 = vadd.f32 %v1361_v43, %v1168_v38  ;;  %v2105_v38 = vunpack.c.l.b16 %v2056_v57 }
 0x1cd   : > { %v1571_v7 = vpop.f32.mrf.mxu3  ;;  %v1170_v14 = vpop.f32.mrf.mxu1 }
 0x1ce   : > { %v1598_v24 = vadd.f32 %v1571_v7, %v1388_v34  ;;  %v1171_v31 = vadd.f32 %v1170_v14, %v4350_v55  ;;  %v2316_v7 = vunpack.c.l.b16 %v2267_v5 }
 0x1cf   : > { %v1784_v46 = vpop.f32.mrf.mxu0 }
 0x1d0   : > { %1993 = vmatmul.bf16.gmra.mxu1 %v4318_v29  ;;  %2204 = vmatmul.bf16.gmra.mxu2 %v4322_v44  ;;  %v4401_v39 = vadd.f32 %v1781_v45, %v1598_v24  ;;  %v2523_v44 = vunpack.c.l.b16 %v2474_v56  ;;  %v2476_v45 = vpack.c.bf16 %v2460_v23, %v2460_v23 }
 0x1d2   : > { %2414 = vmatmul.bf16.gmra.mxu3 %v2322_v40  ;;  %2624 = vmatmul.bf16.gmra.mxu0 %v4338_v48  ;;  %v2533_v1 = vpack.c.b16 %v2524_v22, %v2523_v44  ;;  %v2525_v14 = vunpack.c.l.b16 %v2476_v45  ;;  %v2526_v40 = vunpack.c.l.b16 %v2477_v51 }
 0x1d3   : > { %v1364_v54 = vpop.f32.mrf.mxu2 }
 0x1d4   : > { %v1389_v3 = vadd.f32 %v1364_v54, %v1171_v31 }
 0x1d5   : > { %v1574_v41 = vpop.f32.mrf.mxu3  ;;  %v1172_v59 = vpop.f32.mrf.mxu1 }
 0x1d6   : > { %v1599_v58 = vadd.f32 %v1574_v41, %v1389_v3  ;;  %v1173_v53 = vadd.f32 %v1172_v59, %v4356_v20  ;;  %v2534_v41 = vpack.c.b16 %v2526_v40, %v2525_v14 }
 0x1d7   : > { %v1786_v10 = vpop.f32.mrf.mxu0 }
 0x1d8   : > { %v4405_v29 = vadd.f32 %v1784_v46, %v1599_v58 }
 0x1db   : > { %v1366_v18 = vpop.f32.mrf.mxu2 }
 0x1dc   : > { %v1390_v27 = vadd.f32 %v1366_v18, %v1173_v53 }
 0x1dd   : > { %v1576_v49 = vpop.f32.mrf.mxu3  ;;  %v1175_v55 = vpop.f32.mrf.mxu1 }
 0x1de   : > { %v1600_v12 = vadd.f32 %v1576_v49, %v1390_v27  ;;  %v1176_v20 = vadd.f32 %v1175_v55, %v4330_v0 }
 0x1df   : > { %v1789_v4 = vpop.f32.mrf.mxu0 }
 0x1e0   : > { %1998 = vmatmul.bf16.gmra.mxu1 %v4338_v48  ;;  %2209 = vmatmul.bf16.gmra.mxu2 %v4342_v50  ;;  %v4410_v32 = vadd.f32 %v1786_v10, %v1600_v12  ;;  %v2057_v48 = vpack.c.bf16 %v2041_v60, %v2041_v60  ;;  %v2266_v50 = vpack.c.bf16 %v2250_v33, %v2250_v33 }
 0x1e2   : > { %2419 = vmatmul.bf16.gmra.mxu3 %v4344_v36  ;;  %2629 = vmatmul.bf16.gmra.mxu0 %v2533_v1  ;;  %v2106_v43 = vunpack.c.l.b16 %v2057_v48  ;;  %v2315_v0 = vunpack.c.l.b16 %v2266_v50 }
 0x1e3   : > { %v1369_v13 = vpop.f32.mrf.mxu2 }
 0x1e4   : > { %v1391_v63 = vadd.f32 %v1369_v13, %v1176_v20  ;;  %v2114_v11 = vpack.c.b16 %v2106_v43, %v2105_v38  ;;  %v2324_v3 = vpack.c.b16 %v2316_v7, %v2315_v0 }
 0x1e5   : > { %v1579_v37 = vpop.f32.mrf.mxu3  ;;  %v1177_v6 = vpop.f32.mrf.mxu1 }
 0x1e6   : > { %v1601_v36 = vadd.f32 %v1579_v37, %v1391_v63  ;;  %v1178_v24 = vadd.f32 %v1177_v6, %v4336_v21 }
 0x1e7   : > { %v1791_v17 = vpop.f32.mrf.mxu0 }
 0x1e8   : > { %v4414_v34 = vadd.f32 %v1789_v4, %v1601_v36 }
 0x1eb   : > { %v1371_v46 = vpop.f32.mrf.mxu2 }
 0x1ec   : > { %v1392_v31 = vadd.f32 %v1371_v46, %v1178_v24 }
 0x1ed   : > { %v1581_v28 = vpop.f32.mrf.mxu3  ;;  %v1180_v54 = vpop.f32.mrf.mxu1 }
 0x1ee   : > { %v1602_v59 = vadd.f32 %v1581_v28, %v1392_v31  ;;  %v1181_v58 = vadd.f32 %v1180_v54, %v4352_v61 }
 0x1ef   : > { %v1794_v56 = vpop.f32.mrf.mxu0 }
 0x1f0   : > { %2003 = vmatmul.bf16.gmra.mxu1 %v2533_v1  ;;  %2214 = vmatmul.bf16.gmra.mxu2 %v2114_v11  ;;  %v4417_v52 = vadd.f32 %v1791_v17, %v1602_v59 }
 0x1f2   : > { %2424 = vmatmul.bf16.gmra.mxu3 %v2324_v3  ;;  %2634 = vmatmul.bf16.gmra.mxu0 %v2534_v41 }
 0x1f3   : > { %v1374_v10 = vpop.f32.mrf.mxu2 }
 0x1f4   : > { %v1393_v44 = vadd.f32 %v1374_v10, %v1181_v58 }
 0x1f5   : > { %v1584_v21 = vpop.f32.mrf.mxu3  ;;  %v1182_v22 = vpop.f32.mrf.mxu1 }
 0x1f6   : > { %v1603_v53 = vadd.f32 %v1584_v21, %v1393_v44  ;;  %v1183_v49 = vadd.f32 %v1182_v22, %v4358_v25 }
 0x1f7   : > { %v1796_v18 = vpop.f32.mrf.mxu0 }
 0x1f8   : > { %v4420_v27 = vadd.f32 %v1794_v56, %v1603_v53 }
 0x1fb   : > { %v1376_v55 = vpop.f32.mrf.mxu2 }
 0x1fc   : > { %v1394_v1 = vadd.f32 %v1376_v55, %v1183_v49 }
 0x1fd   : > { %v1586_v12 = vpop.f32.mrf.mxu3  ;;  %v1969_v4 = vpop.f32.mrf.mxu1 }
 0x1fe   : > { %v1604_v2 = vadd.f32 %v1586_v12, %v1394_v1  ;;  %v2009_v61 = vadd.f32 %v1969_v4, %v4363_v62 }
 0x1ff   : > { %v2600_v60 = vpop.f32.mrf.mxu0 }
 0x200   : > { %v4423_v33 = vadd.f32 %v1796_v18, %v1604_v2 }
 0x203   : > { %v2180_v20 = vpop.f32.mrf.mxu2 }
 0x204   : > { %v2220_v15 = vadd.f32 %v2180_v20, %v2009_v61 }
 0x205   : > { %v2390_v23 = vpop.f32.mrf.mxu3  ;;  %v1971_v8 = vpop.f32.mrf.mxu1 }
 0x206   : > { %v2430_v13 = vadd.f32 %v2390_v23, %v2220_v15  ;;  %v2010_v25 = vadd.f32 %v1971_v8, %v4367_v19 }
 0x207   : > { %v2602_v63 = vpop.f32.mrf.mxu0 }
 0x208   : > { %v2640_v37 = vadd.f32 %v2600_v60, %v2430_v13 }
 0x20a   : > { %2656 = vst [vmem:[%s3606_s23] sm:$0xff] %v2640_v37 }
 0x20b   : > { %v2182_v57 = vpop.f32.mrf.mxu2 }
 0x20c   : > { %v2221_v48 = vadd.f32 %v2182_v57, %v2010_v25 }
 0x20d   : > { %v2392_v6 = vpop.f32.mrf.mxu3  ;;  %v1974_v50 = vpop.f32.mrf.mxu1 }
 0x20e   : > { %v2431_v5 = vadd.f32 %v2392_v6, %v2221_v48  ;;  %v2011_v62 = vadd.f32 %v1974_v50, %v4370_v26 }
 0x20f   : > { %v2605_v45 = vpop.f32.mrf.mxu0 }
 0x210   : > { %v2641_v51 = vadd.f32 %v2602_v63, %v2431_v5 }
 0x212   : > { %2657 = vst [vmem:[%s3606_s23 + $0x8] sm:$0xff] %v2641_v51 }
 0x213   : > { %v2185_v36 = vpop.f32.mrf.mxu2 }
 0x214   : > { %v2222_v17 = vadd.f32 %v2185_v36, %v2011_v62 }
 0x215   : > { %v2395_v38 = vpop.f32.mrf.mxu3  ;;  %v1976_v43 = vpop.f32.mrf.mxu1 }
 0x216   : > { %v2432_v0 = vadd.f32 %v2395_v38, %v2222_v17  ;;  %v2012_v19 = vadd.f32 %v1976_v43, %v4375_v16 }
 0x217   : > { %v2607_v7 = vpop.f32.mrf.mxu0 }
 0x218   : > { %v2642_v14 = vadd.f32 %v2605_v45, %v2432_v0 }
 0x21a   : > { %2658 = vst [vmem:[%s3606_s23 + $0x10] sm:$0xff] %v2642_v14 }
 0x21b   : > { %v2187_v40 = vpop.f32.mrf.mxu2 }
 0x21c   : > { %v2223_v24 = vadd.f32 %v2187_v40, %v2012_v19 }
 0x21d   : > { %v2397_v46 = vpop.f32.mrf.mxu3  ;;  %v1979_v31 = vpop.f32.mrf.mxu1 }
 0x21e   : > { %v2433_v28 = vadd.f32 %v2397_v46, %v2223_v24  ;;  %v2013_v26 = vadd.f32 %v1979_v31, %v4379_v35 }
 0x21f   : > { %v2610_v11 = vpop.f32.mrf.mxu0 }
 0x220   : > { %v2643_v54 = vadd.f32 %v2607_v7, %v2433_v28 }
 0x222   : > { %2659 = vst [vmem:[%s3606_s23 + $0x18] sm:$0xff] %v2643_v54 }
 0x223   : > { %v2190_v3 = vpop.f32.mrf.mxu2 }
 0x224   : > { %v2224_v41 = vadd.f32 %v2190_v3, %v2013_v26 }
 0x225   : > { %v2400_v59 = vpop.f32.mrf.mxu3  ;;  %v1981_v56 = vpop.f32.mrf.mxu1 }
 0x226   : > { %v2434_v58 = vadd.f32 %v2400_v59, %v2224_v41  ;;  %v2014_v16 = vadd.f32 %v1981_v56, %v4384_v42 }
 0x227   : > { %v2612_v10 = vpop.f32.mrf.mxu0 }
 0x228   : > { %v2644_v44 = vadd.f32 %v2610_v11, %v2434_v58 }
 0x22a   : > { %2660 = vst [vmem:[%s3606_s23 + $0x20] sm:$0xff] %v2644_v44 }
 0x22b   : > { %v2192_v21 = vpop.f32.mrf.mxu2 }
 0x22c   : > { %v2225_v22 = vadd.f32 %v2192_v21, %v2014_v16 }
 0x22d   : > { %v2402_v53 = vpop.f32.mrf.mxu3  ;;  %v1984_v18 = vpop.f32.mrf.mxu1 }
 0x22e   : > { %v2435_v49 = vadd.f32 %v2402_v53, %v2225_v22  ;;  %v2015_v35 = vadd.f32 %v1984_v18, %v4388_v30 }
 0x22f   : > { %v2615_v55 = vpop.f32.mrf.mxu0 }
 0x230   : > { %v2645_v1 = vadd.f32 %v2612_v10, %v2435_v49 }
 0x232   : > { %2661 = vst [vmem:[%s3606_s23 + $0x28] sm:$0xff] %v2645_v1 }
 0x233   : > { %v2195_v12 = vpop.f32.mrf.mxu2 }
 0x234   : > { %v2226_v4 = vadd.f32 %v2195_v12, %v2015_v35 }
 0x235   : > { %v2405_v2 = vpop.f32.mrf.mxu3  ;;  %v1986_v60 = vpop.f32.mrf.mxu1 }
 0x236   : > { %v2436_v61 = vadd.f32 %v2405_v2, %v2226_v4  ;;  %v2016_v42 = vadd.f32 %v1986_v60, %v4392_v9 }
 0x237   : > { %v2617_v20 = vpop.f32.mrf.mxu0 }
 0x238   : > { %v2646_v15 = vadd.f32 %v2615_v55, %v2436_v61 }
 0x23a   : > { %2662 = vst [vmem:[%s3606_s23 + $0x30] sm:$0xff] %v2646_v15 }
 0x23b   : > { %v2197_v23 = vpop.f32.mrf.mxu2 }
 0x23c   : > { %v2227_v8 = vadd.f32 %v2197_v23, %v2016_v42 }
 0x23d   : > { %v2407_v13 = vpop.f32.mrf.mxu3  ;;  %v1989_v63 = vpop.f32.mrf.mxu1 }
 0x23e   : > { %v2437_v37 = vadd.f32 %v2407_v13, %v2227_v8  ;;  %v2017_v30 = vadd.f32 %v1989_v63, %v4396_v47 }
 0x23f   : > { %v2620_v25 = vpop.f32.mrf.mxu0 }
 0x240   : > { %v2647_v57 = vadd.f32 %v2617_v20, %v2437_v37 }
 0x242   : > { %2663 = vst [vmem:[%s3606_s23 + $0x38] sm:$0xff] %v2647_v57 }
 0x243   : > { %v2200_v48 = vpop.f32.mrf.mxu2 }
 0x244   : > { %v2228_v6 = vadd.f32 %v2200_v48, %v2017_v30 }
 0x245   : > { %v2410_v50 = vpop.f32.mrf.mxu3  ;;  %v1991_v5 = vpop.f32.mrf.mxu1 }
 0x246   : > { %v2438_v45 = vadd.f32 %v2410_v50, %v2228_v6  ;;  %v2018_v9 = vadd.f32 %v1991_v5, %v4401_v39 }
 0x247   : > { %v2622_v51 = vpop.f32.mrf.mxu0 }
 0x248   : > { %v2648_v62 = vadd.f32 %v2620_v25, %v2438_v45 }
 0x24a   : > { %2664 = vst [vmem:[%s3606_s23 + $0x40] sm:$0xff] %v2648_v62 }
 0x24b   : > { %v2202_v36 = vpop.f32.mrf.mxu2 }
 0x24c   : > { %v2229_v17 = vadd.f32 %v2202_v36, %v2018_v9 }
 0x24d   : > { %v2412_v38 = vpop.f32.mrf.mxu3  ;;  %v1994_v43 = vpop.f32.mrf.mxu1 }
 0x24e   : > { %v2439_v0 = vadd.f32 %v2412_v38, %v2229_v17  ;;  %v2019_v47 = vadd.f32 %v1994_v43, %v4405_v29 }
 0x24f   : > { %v2625_v7 = vpop.f32.mrf.mxu0 }
 0x250   : > { %v2649_v14 = vadd.f32 %v2622_v51, %v2439_v0 }
 0x252   : > { %2665 = vst [vmem:[%s3606_s23 + $0x48] sm:$0xff] %v2649_v14 }
 0x253   : > { %v2205_v19 = vpop.f32.mrf.mxu2 }
 0x254   : > { %v2230_v40 = vadd.f32 %v2205_v19, %v2019_v47 }
 0x255   : > { %v2415_v24 = vpop.f32.mrf.mxu3  ;;  %v1996_v46 = vpop.f32.mrf.mxu1 }
 0x256   : > { %v2440_v31 = vadd.f32 %v2415_v24, %v2230_v40  ;;  %v2020_v39 = vadd.f32 %v1996_v46, %v4410_v32 }
 0x257   : > { %v2627_v28 = vpop.f32.mrf.mxu0 }
 0x258   : > { %v2650_v11 = vadd.f32 %v2625_v7, %v2440_v31 }
 0x25a   : > { %2666 = vst [vmem:[%s3606_s23 + $0x50] sm:$0xff] %v2650_v11 }
 0x25b   : > { %v2207_v54 = vpop.f32.mrf.mxu2 }
 0x25c   : > { %v2231_v26 = vadd.f32 %v2207_v54, %v2020_v39 }
 0x25d   : > { %v2417_v3 = vpop.f32.mrf.mxu3  ;;  %v1999_v41 = vpop.f32.mrf.mxu1 }
 0x25e   : > { %v2441_v59 = vadd.f32 %v2417_v3, %v2231_v26  ;;  %v2021_v29 = vadd.f32 %v1999_v41, %v4414_v34 }
 0x25f   : > { %v2630_v58 = vpop.f32.mrf.mxu0 }
 0x260   : > { %v2651_v56 = vadd.f32 %v2627_v28, %v2441_v59 }
 0x262   : > { %2667 = vst [vmem:[%s3606_s23 + $0x58] sm:$0xff] %v2651_v56 }
 0x263   : > { %v2210_v10 = vpop.f32.mrf.mxu2 }
 0x264   : > { %v2232_v44 = vadd.f32 %v2210_v10, %v2021_v29 }
 0x265   : > { %v2420_v16 = vpop.f32.mrf.mxu3  ;;  %v2001_v21 = vpop.f32.mrf.mxu1 }
 0x266   : > { %v2442_v22 = vadd.f32 %v2420_v16, %v2232_v44  ;;  %v2022_v32 = vadd.f32 %v2001_v21, %v4417_v52 }
 0x267   : > { %v2632_v18 = vpop.f32.mrf.mxu0 }
 0x268   : > { %v2652_v53 = vadd.f32 %v2630_v58, %v2442_v22 }
 0x26a   : > { %2668 = vst [vmem:[%s3606_s23 + $0x60] sm:$0xff] %v2652_v53 }
 0x26b   : > { %v2212_v49 = vpop.f32.mrf.mxu2 }
 0x26c   : > { %v2233_v55 = vadd.f32 %v2212_v49, %v2022_v32 }
 0x26d   : > { %v2422_v1 = vpop.f32.mrf.mxu3  ;;  %v2004_v35 = vpop.f32.mrf.mxu1 }
 0x26e   : > { %v2443_v12 = vadd.f32 %v2422_v1, %v2233_v55  ;;  %v2023_v34 = vadd.f32 %v2004_v35, %v4420_v27 }
 0x26f   : > { %v2635_v20 = vpop.f32.mrf.mxu0 }
 0x270   : > { %v2653_v4 = vadd.f32 %v2632_v18, %v2443_v12 }
 0x272   : > { %2669 = vst [vmem:[%s3606_s23 + $0x68] sm:$0xff] %v2653_v4 }
 0x273   : > { %v2215_v2 = vpop.f32.mrf.mxu2 }
 0x274   : > { %v2234_v60 = vadd.f32 %v2215_v2, %v2023_v34 }
 0x275   : > { %v2425_v61 = vpop.f32.mrf.mxu3  ;;  %v2006_v42 = vpop.f32.mrf.mxu1 }
 0x276   : > { %v2444_v15 = vadd.f32 %v2425_v61, %v2234_v60  ;;  %v2024_v52 = vadd.f32 %v2006_v42, %v4423_v33 }
 0x277   : > { %v2637_v25 = vpop.f32.mrf.mxu0 }
 0x278   : > { %v2654_v23 = vadd.f32 %v2635_v20, %v2444_v15 }
 0x27a   : > { %2670 = vst [vmem:[%s3606_s23 + $0x70] sm:$0xff] %v2654_v23 }
 0x27b   : > { %v2217_v8 = vpop.f32.mrf.mxu2 }
 0x27c   : > { %v2235_v13 = vadd.f32 %v2217_v8, %v2024_v52 }
 0x27d   : > { %v2427_v63 = vpop.f32.mrf.mxu3 }
 0x27e   : > { %v2445_v37 = vadd.f32 %v2427_v63, %v2235_v13 }
 0x280   : > { %v2655_v57 = vadd.f32 %v2637_v25, %v2445_v37 }
 0x282   : > { %2671 = vst [vmem:[%s3606_s23 + $0x78] sm:$0xff] %v2655_v57 }
 0x283 PF: > { %s14_s19 = sadd.s32 1, %s3507_s19   ;;  %s4528_s15 = smov %s3499_s17 }
 0x284   : > { %p11_p9 = scmp.ge.s32.totalorder %s14_s19, 6   ;;  %s4529_s16 = smov %s3503_s18 }
 0x285   : > { %s4530_s17 = smov %s4533_s20  ;;  %s4531_s18 = smov %s4537_s21 }
 0x286   :  { %13 = sbr.rel (!%p11_p9) target bundleno = 3 (0x3), region = 94 }

// kernel: resblock_forward.7
= control target key start
LH: loop header
LB: loop body
LE: loop exit
PB: predicated region body
PF: predicated region fallthrough
CT: control target
= control target key end

     0   :  { %10 = vsyncpa [#allocation4], 0  ;;  %s4799_s0 = inlined_call_operand.vmem [shape: f32[2,1,128], index: 0, kind: input, shape index: {}]   ;;  %s4800_s1 = inlined_call_operand.vmem [shape: f32[2,1,128], index: 1, kind: input, shape index: {}]   ;;  %s4801_s2 = inlined_call_operand.vmem [shape: f32[2,16,16,128], index: 2, kind: input, shape index: {}]   ;;  %s4802_s3 = inlined_call_operand.vmem [shape: bf16[3,3,128,128], index: 3, kind: input, shape index: {}]   ;;  %s4803_s4 = inlined_call_operand.vmem [shape: f32[2,16,16,128], index: 4, kind: input, shape index: {}]   ;;  %s4804_s5 = inlined_call_operand.hbm [shape: f32[2,16,16,128], index: 5, kind: output, shape index: {}]  }
   0x1   :  { %12 = vsyncpa [#allocation4 + $0x1], 0  ;;  %s3766_s18 = smov 0   ;;  %s3768_s19 = smov 0  }
   0x2   :  { %s3770_s20 = smov 0   ;;  %s3772_s21 = smov 0  }
   0x3   :  { %s3774_s22 = smov 0   ;;  %s3776_s23 = smov 0  }
   0x4   :  { %s3778_s24 = smov 0   ;;  %s3780_s25 = smov 0  }
   0x5 LB: > { %4810 = sst [smem:[#allocation6_spill]] %s3723_s23  ;;  %s2916_s26 = sadd.s32 4294967295, %s3731_s25   ;;  %s3731_s25 = sphi %s3780_s25, %s18_s25   ;;  %s3727_s24 = sphi %s3778_s24, %s4871_s24   ;;  %s3723_s23 = sphi %s3776_s23, %s4870_s23   ;;  %s3719_s22 = sphi %s3774_s22, %s4869_s22   ;;  %s3715_s21 = sphi %s3772_s21, %s4868_s21   ;;  %s3711_s20 = sphi %s3770_s20, %s4874_s20   ;;  %s3707_s19 = sphi %s3768_s19, %s4873_s19   ;;  %s3703_s18 = sphi %s3766_s18, %s4872_s18  }
   0x6   : > { %4811 = sst [smem:[#allocation7_spill]] %s3727_s24  ;;  %s2917_s27 = sadd.s32 4294967294, %s3731_s25  }
   0x7   : > { %s27_s28 = sadd.s32 1, %s3723_s23  ;;  %s30_s29 = sadd.s32 1, %s3727_s24 }
   0x8   : > { %p28_p0 = scmp.ge.s32.totalorder %s27_s28, 2  ;;  %p176_p1 = scmp.ne.s32.totalorder %s3711_s20, %s3707_s19 }
   0x9   : > { %p177_p2 = scmp.eq.s32.totalorder %s2916_s26, 3  ;;  %p182_p5 = scmp.ne.s32.totalorder %s3707_s19, %s3703_s18 }
   0xa   : > { %s4876_s28 = smov (%p28_p0, %s27_s28), 0  ;;  %s4878_s29 = smov (!%p28_p0, %s30_s29), %s3727_s24 }
   0xb   : > { %4812 = sst [smem:[#allocation8_spill]] %s4876_s28  ;;  %s162_s30 = ssub.s32 %s3723_s23, %s4876_s28 }
   0xc   : > { %p3817_p3 = por %p177_p2, %p176_p1  ;;  %p32_p4 = scmp.ge.s32.totalorder %s4878_s29, 2 }
   0xd   : > { %p183_p6 = scmp.eq.s32.totalorder %s2917_s27, 3  ;;  %p2920_p7 = scmp.ge.s32.totalorder %s3731_s25, 1 }
   0xe   : > { %s4880_s29 = smov (%p32_p4, %s4878_s29), 0  ;;  %p238_p9 = scmp.lt.s32.totalorder %s3731_s25, 5 }
   0xf   : > { %4814 = sst [smem:[#allocation9_spill]] %s4880_s29  ;;  %p3826_p8 = por %p183_p6, %p182_p5 }
  0x10   : > { %s161_s8 = ssub.s32 %s3727_s24, %s4880_s29  ;;  %s166_s9 = sadd.s32 1, %s3711_s20 }
  0x11   : > { %s163_s10 = sor.u32 %s162_s30, %s161_s8  ;;  %p239_p10 = pnand %p2920_p7, %p238_p9 }
  0x12   : > { %p164_p11 = scmp.eq.s32.totalorder %s163_s10, 0  ;;  %s4805_s12 = sand.u32 (!%p239_p10), 1, %s3707_s19  }
  0x13   : > { %242 = sbr.rel (%p239_p10) target bundleno = 656 (0x290), region = 40  ;;  %p282_p12 = scmp.lt.s32.totalorder (!%p239_p10), %s3719_s22, 1 }
  0x14   : > { %s3835_s11 = scalar_select %p164_p11, %s3711_s20, %s166_s9  }
  0x15   : > { %s3842_s13 = sshll.u32 (!%p239_p10), %s4805_s12, 7  ;;  %s3845_s14 = sshll.u32 (!%p239_p10), %s3715_s21, 3 }
  0x16   : > { %p296_p13 = scmp.lt.s32.totalorder (!%p239_p10), %s3845_s14, 15  ;;  %s3382_s26 = sshll.u32 (!%p239_p10), %s3715_s21, 7 }
  0x17   : > { %p2946_p0 = scmp.le.s32.totalorder (!%p239_p10), %s3715_s21, 0 }
  0x18   : > { %v3733_v0 = vmov 0.0   ;;  %s283_s15 = scalar_select %p282_p12, %s3719_s22, 1 }
  0x19   : > { %308 = vst [vmem:[#allocation2] sm:$0xff] %v3733_v0  ;;  %s297_s16 = scalar_select %p296_p13, %s3845_s14, 15 }
  0x1a   : > { %309 = vst [vmem:[#allocation2 + $0x8] sm:$0xff] %v3733_v0  ;;  %s284_s27 = scalar_lea.vmem %s4799_s0, %s283_s15  ;;  %s287_s9 = scalar_lea.vmem %s4800_s1, %s283_s15 }
  0x1b   : > { %310 = vst [vmem:[#allocation2 + $0x10] sm:$0xff] %v3733_v0  ;;  %s3381_s10 = sshll.u32 %s283_s15, 8  ;;  %s2925_s12 = sshll.u32 %s297_s16, 1  ;;  %v3867_v1 = vld [vmem:[%s284_s27] ss:$0 sm:$0xff] }
  0x1c   : > { %311 = vst [vmem:[#allocation2 + $0x18] sm:$0xff] %v3733_v0  ;;  %s3865_s24 = scalar_lea.vmem %s4801_s2, %s3381_s10  ;;  %s2926_s23 = sshll.u32 %s283_s15, 5  ;;  %v3875_v2 = vld [vmem:[%s287_s9] ss:$0 sm:$0xff] }
  0x1d   : > { %312 = vst [vmem:[#allocation2 + $0x20] sm:$0xff] %v3733_v0  ;;  %s300_s17 = sadd.s32 %s2926_s23, %s2925_s12  ;;  %s3873_s8 = scalar_lea.vmem %s3865_s24, %s3382_s26 }
  0x1e   : > { %315 = vst [vmem:[#allocation2 + $0x38] sm:$0xff] %v3733_v0  ;;  %s2927_s30 = sshll.u32 %s300_s17, 3  ;;  %v350_v3 = vld [vmem:[%s3873_s8] sm:$0xff]  ;;  %v351_v4 = vld [vmem:[%s3873_s8 + $0x8] sm:$0xff]  ;;  %v352_v5 = vld [vmem:[%s3873_s8 + $0x10] sm:$0xff]  ;;  %s4305_s12 = scalar_lea.vmem [#allocation3], %s3842_s13 }
  0x1f   : > { %316 = vst [vmem:[#allocation2 + $0x40] sm:$0xff] %v3733_v0  ;;  %s3881_s23 = scalar_lea.vmem %s4803_s4, %s2927_s30  ;;  %v369_v6 = vmul.f32 %v3867_v1, %v350_v3  ;;  %v370_v7 = vmul.f32 %v3867_v1, %v351_v4  ;;  %v371_v8 = vmul.f32 %v3867_v1, %v352_v5  ;;  %v353_v9 = vld [vmem:[%s3873_s8 + $0x18] sm:$0xff]  ;;  %v354_v10 = vld [vmem:[%s3873_s8 + $0x20] sm:$0xff]  ;;  %v355_v11 = vld [vmem:[%s3873_s8 + $0x28] sm:$0xff]  ;;  %s2947_s15 = sadd.s32 (!%p2946_p0), 4294967295, %s3845_s14 }
  0x20   : > { %319 = vst [vmem:[#allocation2 + $0x58] sm:$0xff] %v3733_v0  ;;  %v372_v12 = vmul.f32 %v3867_v1, %v353_v9  ;;  %v373_v13 = vmul.f32 %v3867_v1, %v354_v10  ;;  %v374_v14 = vmul.f32 %v3867_v1, %v355_v11  ;;  %v356_v15 = vld [vmem:[%s3873_s8 + $0x30] sm:$0xff]  ;;  %v357_v16 = vld [vmem:[%s3873_s8 + $0x38] sm:$0xff]  ;;  %v358_v25 = vld [vmem:[%s3873_s8 + $0x40] sm:$0xff]  ;;  %s2948_s16 = sshll.u32 (!%p2946_p0), %s2947_s15, 4 }
  0x21   : > { %320 = vst [vmem:[#allocation2 + $0x60] sm:$0xff] %v3733_v0  ;;  %v3901_v17 = vadd.f32 %v3875_v2, %v369_v6  ;;  %v3904_v18 = vadd.f32 %v3875_v2, %v370_v7  ;;  %v3907_v19 = vadd.f32 %v3875_v2, %v371_v8  ;;  %v375_v20 = vmul.f32 %v3867_v1, %v356_v15  ;;  %v359_v28 = vld [vmem:[%s3873_s8 + $0x48] sm:$0xff]  ;;  %v360_v38 = vld [vmem:[%s3873_s8 + $0x50] sm:$0xff]  ;;  %v361_v39 = vld [vmem:[%s3873_s8 + $0x58] sm:$0xff]  ;;  %s747_s27 = scalar_lea.vmem (!%p2946_p0), %s3865_s24, %s2948_s16 }
  0x22   : > { %323 = vst [vmem:[#allocation2 + $0x78] sm:$0xff] %v3733_v0  ;;  %v3912_v21 = vadd.f32 %v3875_v2, %v372_v12  ;;  %v3915_v22 = vadd.f32 %v3875_v2, %v373_v13  ;;  %v3918_v23 = vadd.f32 %v3875_v2, %v374_v14  ;;  %v376_v24 = vmul.f32 %v3867_v1, %v357_v16  ;;  %v362_v54 = vld [vmem:[%s3873_s8 + $0x60] sm:$0xff] }
  0x23   : > { %324 = vst [vmem:[#allocation2 + $0x80] sm:$0xff] %v3733_v0  ;;  %v2930_v26 = vmul.f32 -1.442695, %v3901_v17  ;;  %v2931_v27 = vmul.f32 -1.442695, %v3904_v18  ;;  %v3930_v31 = vadd.f32 %v3875_v2, %v375_v20  ;;  %v377_v34 = vmul.f32 %v3867_v1, %v358_v25 }
  0x24   : > { %327 = vst [vmem:[#allocation2 + $0x98] sm:$0xff] %v3733_v0  ;;  %v2932_v29 = vmul.f32 -1.442695, %v3907_v19  ;;  %v2933_v30 = vmul.f32 -1.442695, %v3912_v21  ;;  %v3935_v33 = vadd.f32 %v3875_v2, %v376_v24  ;;  %v378_v36 = vmul.f32 %v3867_v1, %v359_v28 }
  0x25   : > { %328 = vst [vmem:[#allocation2 + $0xa0] sm:$0xff] %v3733_v0  ;;  %3557 = vpow2.f32 %v2930_v26  ;;  %v2934_v32 = vmul.f32 -1.442695, %v3915_v22  ;;  %v2935_v35 = vmul.f32 -1.442695, %v3918_v23  ;;  %v3949_v41 = vadd.f32 %v3875_v2, %v377_v34 }
  0x26   : > { %331 = vst [vmem:[#allocation2 + $0xb8] sm:$0xff] %v3733_v0  ;;  %3559 = vpow2.f32 %v2931_v27  ;;  %v2936_v37 = vmul.f32 -1.442695, %v3930_v31  ;;  %v2937_v40 = vmul.f32 -1.442695, %v3935_v33  ;;  %v3953_v42 = vadd.f32 %v3875_v2, %v378_v36 }
  0x27   : > { %332 = vst [vmem:[#allocation2 + $0xc0] sm:$0xff] %v3733_v0  ;;  %3561 = vpow2.f32 %v2932_v29  ;;  %v379_v44 = vmul.f32 %v3867_v1, %v360_v38  ;;  %v380_v45 = vmul.f32 %v3867_v1, %v361_v39  ;;  %v2938_v50 = vmul.f32 -1.442695, %v3949_v41 }
  0x28   : > { %335 = vst [vmem:[#allocation2 + $0xd8] sm:$0xff] %v3733_v0  ;;  %3563 = vpow2.f32 %v2933_v30  ;;  %v3967_v53 = vmul.f32 -1.442695, %v3953_v42  ;;  %v3988_v3 = vmul.f32 %v3867_v1, %v362_v54  ;;  %v363_v30 = vld [vmem:[%s3873_s8 + $0x68] sm:$0xff] }
  0x29   : > { %336 = vst [vmem:[#allocation2 + $0xe0] sm:$0xff] %v3733_v0  ;;  %3565 = vpow2.f32 %v2934_v32  ;;  %v3973_v57 = vadd.f32 %v3875_v2, %v379_v44  ;;  %v3976_v58 = vadd.f32 %v3875_v2, %v380_v45 }
  0x2a   : > { %339 = vst [vmem:[#allocation2 + $0xf8] sm:$0xff] %v3733_v0  ;;  %3567 = vpow2.f32 %v2935_v35  ;;  %v4132_v44 = vadd.f32 %v3875_v2, %v3988_v3 }
  0x2b   : > { %340 = vst [vmem:[#allocation2 + $0x100] sm:$0xff] %v3733_v0  ;;  %v3558_v43 = vpop.eup %3557  ;;  %3569 = vpow2.f32 %v2936_v37 }
  0x2c   : > { %343 = vst [vmem:[#allocation2 + $0x118] sm:$0xff] %v3733_v0  ;;  %v3560_v46 = vpop.eup %3559  ;;  %v3959_v47 = vadd.f32 1.0, %v3558_v43  ;;  %3571 = vpow2.f32 %v2937_v40 }
  0x2d   : > { %344 = vst [vmem:[#allocation2 + $0x120] sm:$0xff] %v3733_v0  ;;  %v3562_v48 = vpop.eup %3561  ;;  %v3961_v49 = vadd.f32 1.0, %v3560_v46 }
  0x2e   : > { %345 = vst [vmem:[#allocation2 + $0x128] sm:$0xff] %v3733_v0  ;;  %v3564_v51 = vpop.eup %3563  ;;  %3573 = vrcp.f32 %v3959_v47  ;;  %v479_v52 = vand.u32 2147483648, %v3959_v47  ;;  %v477_v56 = vand.u32 2147483647, %v3959_v47  ;;  %v3980_v62 = vadd.f32 1.0, %v3562_v48 }
  0x2f   : > { %346 = vst [vmem:[#allocation2 + $0x130] sm:$0xff] %v3733_v0  ;;  %v3566_v55 = vpop.eup %3565  ;;  %3575 = vrcp.f32 %v3961_v49  ;;  %v492_v60 = vand.u32 2147483647, %v3961_v49  ;;  %v494_v61 = vand.u32 2147483648, %v3961_v49  ;;  %v3982_v63 = vadd.f32 1.0, %v3564_v51 }
  0x30   : > { %347 = vst [vmem:[#allocation2 + $0x138] sm:$0xff] %v3733_v0  ;;  %v3568_v59 = vpop.eup %3567  ;;  %vm473_vm0 = vweird.f32 %v3959_v47  ;;  %v3985_v0 = vadd.f32 1.0, %v3566_v55  ;;  %3577 = vpow2.f32 %v2938_v50  ;;  %v3990_v5 = vor.u32 1.1754944e-38, %v479_v52 }
  0x31   : > { %v3570_v4 = vpop.eup %3569  ;;  %vm488_vm1 = vweird.f32 %v3961_v49  ;;  %3579 = vrcp.f32 %v3980_v62  ;;  %v509_v6 = vand.u32 2147483648, %v3980_v62  ;;  %vm3997_vm2 = vcmp.eq.f32.partialorder %v477_v56, 8.507059e+37 }
  0x32   : > { %v3995_v7 = vpop.eup %3571  ;;  %v507_v9 = vand.u32 2147483647, %v3980_v62  ;;  %3581 = vrcp.f32 %v3982_v63  ;;  %v524_v10 = vand.u32 2147483648, %v3982_v63  ;;  %v4004_v11 = vadd.f32 1.0, %v3568_v59 }
  0x33   : > { %vm4006_vm3 = vcmp.eq.f32.partialorder %v492_v60, 8.507059e+37  ;;  %v495_v14 = vor.u32 1.1754944e-38, %v494_v61  ;;  %v522_v15 = vand.u32 2147483647, %v3982_v63  ;;  %3583 = vrcp.f32 %v3985_v0 }
  0x34   : > { %v3574_v12 = vpop.eup %3573  ;;  %vm503_vm4 = vweird.f32 %v3980_v62  ;;  %v4014_v24 = vor.u32 1.1754944e-38, %v509_v6  ;;  %vm518_vm5 = vweird.f32 %v3982_v63  ;;  %vm533_vm6 = vweird.f32 %v3985_v0 }
  0x35   : > { %v3576_v16 = vpop.eup %3575  ;;  %v469_v20 = vmul.f32 %v3574_v12, %v3959_v47  ;;  %v537_v26 = vand.u32 2147483647, %v3985_v0  ;;  %v539_v27 = vand.u32 2147483648, %v3985_v0  ;;  %vm474_vm7 = vweird.f32 %v3574_v12 }
  0x36   : > { %v484_v25 = vmul.f32 %v3576_v16, %v3961_v49  ;;  %v3578_v28 = vpop.eup %3577  ;;  %vm4021_vm8 = vcmp.eq.f32.partialorder %v507_v9, 8.507059e+37  ;;  %v525_v32 = vor.u32 1.1754944e-38, %v524_v10  ;;  %3585 = vrcp.f32 %v4004_v11  ;;  %vm4041_vm13 = vmor %vm473_vm0, %vm474_vm7 }
  0x37   : > { %v470_v29 = vsub.f32 1.0, %v469_v20  ;;  %v3580_v34 = vpop.eup %3579  ;;  %vm489_vm9 = vweird.f32 %v3576_v16  ;;  %vm4026_vm10 = vcmp.eq.f32.partialorder %v522_v15, 8.507059e+37  ;;  %v552_v37 = vand.u32 2147483647, %v4004_v11 }
  0x38   : > { %v485_v35 = vsub.f32 1.0, %v484_v25  ;;  %v554_v38 = vand.u32 2147483648, %v4004_v11  ;;  %v3582_v39 = vpop.eup %3581  ;;  %v499_v43 = vmul.f32 %v3580_v34, %v3980_v62  ;;  %vm4033_vm11 = vcmp.eq.f32.partialorder %v537_v26, 8.507059e+37  ;;  %vm4049_vm15 = vmor %vm488_vm1, %vm489_vm9 }
  0x39   : > { %v471_v40 = vmul.f32 %v3574_v12, %v470_v29  ;;  %v3584_v45 = vpop.eup %3583  ;;  %vm504_vm14 = vweird.f32 %v3580_v34  ;;  %v514_v50 = vmul.f32 %v3582_v39, %v3982_v63  ;;  %v540_v51 = vor.u32 1.1754944e-38, %v539_v27 }
  0x3a   : > { %v486_v48 = vmul.f32 %v3576_v16, %v485_v35  ;;  %v500_v55 = vsub.f32 1.0, %v499_v43  ;;  %vm519_vm12 = vweird.f32 %v3582_v39  ;;  %v529_v47 = vmul.f32 %v3584_v45, %v3985_v0  ;;  %vm4070_vm1 = vmor %vm503_vm4, %vm504_vm14 }
  0x3b   : > { %v472_v52 = vadd.f32 %v3574_v12, %v471_v40  ;;  %v515_v59 = vsub.f32 1.0, %v514_v50  ;;  %vm534_vm0 = vweird.f32 %v3584_v45  ;;  %vm4054_vm7 = vcmp.eq.f32.partialorder %v552_v37, 8.507059e+37 }
  0x3c   : > { %v487_v56 = vadd.f32 %v3576_v16, %v486_v48  ;;  %v555_v61 = vor.u32 1.1754944e-38, %v554_v38  ;;  %v3586_v6 = vpop.eup %3585  ;;  %v501_v9 = vmul.f32 %v3580_v34, %v500_v55  ;;  %v530_v10 = vsub.f32 1.0, %v529_v47  ;;  %vm4089_vm4 = vmor %vm533_vm6, %vm534_vm0 }
  0x3d   : > { %v476_v49 = vsel %vm4041_vm13, %v3574_v12, %v472_v52  ;;  %v4060_v15 = vadd.f32 1.0, %v3570_v4  ;;  %v516_v27 = vmul.f32 %v3582_v39, %v515_v59  ;;  %v544_v12 = vmul.f32 %v3586_v6, %v4004_v11 }
  0x3e   : > { %v481_v20 = vsel %vm3997_vm2, %v3990_v5, %v476_v49  ;;  %v491_v25 = vsel %vm4049_vm15, %v3576_v16, %v487_v56  ;;  %v502_v8 = vadd.f32 %v3580_v34, %v501_v9  ;;  %vm4081_vm2 = vmor %vm518_vm5, %vm519_vm12  ;;  %v531_v62 = vmul.f32 %v3584_v45, %v530_v10  ;;  %v364_v56 = vld [vmem:[%s3873_s8 + $0x70] sm:$0xff] }
  0x3f   : > { %v708_v4 = vmul.f32 %v481_v20, %v3901_v17  ;;  %v496_v29 = vsel %vm4006_vm3, %v495_v14, %v491_v25  ;;  %v517_v35 = vadd.f32 %v3582_v39, %v516_v27  ;;  %v545_v13 = vsub.f32 1.0, %v544_v12 }
  0x40   : > { %v709_v16 = vmul.f32 %v496_v29, %v3904_v18  ;;  %vm549_vm3 = vweird.f32 %v3586_v6  ;;  %v506_v63 = vsel %vm4070_vm1, %v3580_v34, %v502_v8  ;;  %v532_v14 = vadd.f32 %v3584_v45, %v531_v62 }
  0x41   : > { %725 = vst [vmem:[#allocation2 + $0x28] sm:$0xff] %v708_v4  ;;  %3587 = vrcp.f32 %v4060_v15  ;;  %v4097_v18 = vadd.f32 1.0, %v3995_v7  ;;  %v511_v0 = vsel %vm4021_vm8, %v4014_v24, %v506_v63  ;;  %v521_v37 = vsel %vm4081_vm2, %v3582_v39, %v517_v35 }
  0x42   : > { %726 = vst [vmem:[#allocation2 + $0x30] sm:$0xff] %v709_v16  ;;  %v546_v38 = vmul.f32 %v3586_v6, %v545_v13  ;;  %v4104_v40 = vadd.f32 1.0, %v3578_v28  ;;  %v710_v43 = vmul.f32 %v511_v0, %v3907_v19  ;;  %v526_v34 = vsel %vm4026_vm10, %v525_v32, %v521_v37 }
  0x43   : > { %v536_v7 = vsel %vm4089_vm4, %v3584_v45, %v532_v14  ;;  %vm4838_vm5 = vweird.f32 %v4004_v11  ;;  %v567_v24 = vand.u32 2147483647, %v4060_v15  ;;  %v711_v28 = vmul.f32 %v526_v34, %v3912_v21 }
  0x44   : > { %vm4113_vm6 = vmor %vm4838_vm5, %vm549_vm3  ;;  %v541_v19 = vsel %vm4033_vm11, %v540_v51, %v536_v7  ;;  %v547_v39 = vadd.f32 %v3586_v6, %v546_v38  ;;  %v569_v32 = vand.u32 2147483648, %v4060_v15  ;;  %727 = vst [vmem:[#allocation2 + $0x48] sm:$0xff] %v710_v43  ;;  %3589 = vrcp.f32 %v4097_v18 }
  0x45   : > { %v712_v36 = vmul.f32 %v541_v19, %v3915_v22  ;;  %v2940_v11 = vmul.f32 -1.442695, %v3973_v57  ;;  %v2941_v45 = vmul.f32 -1.442695, %v3976_v58  ;;  %728 = vst [vmem:[#allocation2 + $0x50] sm:$0xff] %v711_v28  ;;  %3591 = vrcp.f32 %v4104_v40 }
  0x46   : > { %v551_v21 = vsel %vm4113_vm6, %v3586_v6, %v547_v39  ;;  %v382_v48 = vmul.f32 %v3867_v1, %v363_v30  ;;  %vm563_vm8 = vweird.f32 %v4060_v15  ;;  %vm4138_vm9 = vcmp.eq.f32.partialorder %v567_v24, 8.507059e+37 }
  0x47   : > { %v3588_v22 = vpop.eup %3587  ;;  %729 = vst [vmem:[#allocation2 + $0x68] sm:$0xff] %v712_v36  ;;  %v556_v50 = vsel %vm4054_vm7, %v555_v61, %v551_v21  ;;  %v582_v52 = vand.u32 2147483647, %v4097_v18  ;;  %v570_v55 = vor.u32 1.1754944e-38, %v569_v32  ;;  %v584_v47 = vand.u32 2147483648, %v4097_v18  ;;  %v365_v61 = vld [vmem:[%s3873_s8 + $0x78] sm:$0xff] }
  0x48   : > { %v713_v54 = vmul.f32 %v556_v50, %v3918_v23  ;;  %v559_v3 = vmul.f32 %v3588_v22, %v4060_v15  ;;  %vm564_vm10 = vweird.f32 %v3588_v22  ;;  %vm578_vm11 = vweird.f32 %v4097_v18 }
  0x49   : > { %vm593_vm12 = vweird.f32 %v4104_v40  ;;  %3593 = vpow2.f32 %v3967_v53  ;;  %v2942_v60 = vmul.f32 -1.442695, %v4132_v44  ;;  %v4152_v23 = vadd.f32 %v3875_v2, %v382_v48  ;;  %vm4166_vm14 = vmor %vm563_vm8, %vm564_vm10 }
  0x4a   : > { %730 = vst [vmem:[#allocation2 + $0x70] sm:$0xff] %v713_v54  ;;  %v560_v59 = vsub.f32 1.0, %v559_v3  ;;  %3595 = vpow2.f32 %v2940_v11  ;;  %v3590_v6 = vpop.eup %3589  ;;  %vm4155_vm13 = vcmp.eq.f32.partialorder %v582_v52, 8.507059e+37  ;;  %v597_v9 = vand.u32 2147483647, %v4104_v40 }
  0x4b   : > { %v599_v10 = vand.u32 2147483648, %v4104_v40  ;;  %v383_v53 = vmul.f32 %v3867_v1, %v364_v56  ;;  %v3592_v20 = vpop.eup %3591  ;;  %v574_v26 = vmul.f32 %v3590_v6, %v4097_v18  ;;  %v585_v27 = vor.u32 1.1754944e-38, %v584_v47 }
  0x4c   : > { %v561_v25 = vmul.f32 %v3588_v22, %v560_v59  ;;  %3597 = vpow2.f32 %v2941_v45  ;;  %v589_v4 = vmul.f32 %v3592_v20, %v4104_v40  ;;  %v2943_v29 = vmul.f32 -1.442695, %v4152_v23 }
  0x4d   : > { %v4173_v8 = vadd.f32 %v3875_v2, %v383_v53  ;;  %v384_v5 = vmul.f32 %v3867_v1, %v365_v61  ;;  %v575_v16 = vsub.f32 1.0, %v574_v26  ;;  %vm579_vm15 = vweird.f32 %v3590_v6 }
  0x4e   : > { %v562_v62 = vadd.f32 %v3588_v22, %v561_v25  ;;  %3599 = vpow2.f32 %v2942_v60  ;;  %v590_v17 = vsub.f32 1.0, %v589_v4  ;;  %vm594_vm0 = vweird.f32 %v3592_v20  ;;  %vm4183_vm7 = vmor %vm578_vm11, %vm579_vm15 }
  0x4f   : > { %v3594_v35 = vpop.eup %3593  ;;  %v600_v15 = vor.u32 1.1754944e-38, %v599_v10  ;;  %v2944_v13 = vmul.f32 -1.442695, %v4173_v8  ;;  %v576_v0 = vmul.f32 %v3590_v6, %v575_v16  ;;  %3601 = vpow2.f32 %v2943_v29  ;;  %vm595_vm1 = vmor %vm593_vm12, %vm594_vm0 }
  0x50   : > { %v3596_v63 = vpop.eup %3595  ;;  %v566_v14 = vsel %vm4166_vm14, %v3588_v22, %v562_v62  ;;  %v461_v37 = vadd.f32 1.0, %v3594_v35  ;;  %v591_v34 = vmul.f32 %v3592_v20, %v590_v17  ;;  %v4192_v28 = vadd.f32 %v3875_v2, %v384_v5 }
  0x51   : > { %v571_v38 = vsel %vm4138_vm9, %v570_v55, %v566_v14  ;;  %v462_v7 = vadd.f32 1.0, %v3596_v63  ;;  %3603 = vpow2.f32 %v2944_v13  ;;  %v577_v30 = vadd.f32 %v3590_v6, %v576_v0 }
  0x52   : > { %v3598_v46 = vpop.eup %3597  ;;  %v714_v24 = vmul.f32 %v571_v38, %v3930_v31  ;;  %3605 = vrcp.f32 %v461_v37  ;;  %v592_v18 = vadd.f32 %v3592_v20, %v591_v34  ;;  %vm598_vm2 = vcmp.eq.f32.partialorder %v597_v9, 8.507059e+37 }
  0x53   : > { %3607 = vrcp.f32 %v462_v7  ;;  %v581_v39 = vsel %vm4183_vm7, %v3590_v6, %v577_v30  ;;  %v612_v45 = vand.u32 2147483647, %v461_v37  ;;  %v2945_v21 = vmul.f32 -1.442695, %v4192_v28 }
  0x54   : > { %v3600_v19 = vpop.eup %3599  ;;  %731 = vst [vmem:[#allocation2 + $0x88] sm:$0xff] %v714_v24  ;;  %v586_v31 = vsel %vm4155_vm13, %v585_v27, %v581_v39  ;;  %v596_v32 = vsel %vm595_vm1, %v3592_v20, %v592_v18  ;;  %v4201_v50 = vadd.f32 1.0, %v3598_v46  ;;  %vm608_vm4 = vweird.f32 %v461_v37 }
  0x55   : > { %v3602_v36 = vpop.eup %3601  ;;  %v715_v40 = vmul.f32 %v586_v31, %v3935_v33  ;;  %v601_v11 = vsel %vm598_vm2, %v600_v15, %v596_v32  ;;  %v4203_v51 = vadd.f32 1.0, %v3600_v19  ;;  %v614_v54 = vand.u32 2147483648, %v461_v37 }
  0x56   : > { %v716_v22 = vmul.f32 %v601_v11, %v3949_v41  ;;  %vm623_vm3 = vweird.f32 %v462_v7  ;;  %v627_v3 = vand.u32 2147483647, %v462_v7  ;;  %v629_v47 = vand.u32 2147483648, %v462_v7 }
  0x57   : > { %v3604_v48 = vpop.eup %3603  ;;  %732 = vst [vmem:[#allocation2 + $0x90] sm:$0xff] %v715_v40  ;;  %3609 = vrcp.f32 %v4201_v50  ;;  %v4206_v56 = vadd.f32 1.0, %v3602_v36  ;;  %vm4208_vm5 = vcmp.eq.f32.partialorder %v612_v45, 8.507059e+37  ;;  %v642_v6 = vand.u32 2147483647, %v4201_v50 }
  0x58   : > { %v3606_v52 = vpop.eup %3605  ;;  %733 = vst [vmem:[#allocation2 + $0xa8] sm:$0xff] %v716_v22  ;;  %v4212_v60 = vadd.f32 1.0, %v3604_v48  ;;  %3611 = vpow2.f32 %v2945_v21  ;;  %v644_v9 = vand.u32 2147483648, %v4201_v50  ;;  %v657_v10 = vand.u32 2147483647, %v4203_v51 }
  0x59   : > { %v3608_v55 = vpop.eup %3607  ;;  %v604_v33 = vmul.f32 %v3606_v52, %v461_v37  ;;  %vm609_vm6 = vweird.f32 %v3606_v52  ;;  %3613 = vrcp.f32 %v4203_v51  ;;  %v615_v20 = vor.u32 1.1754944e-38, %v614_v54 }
  0x5a   : > { %v619_v59 = vmul.f32 %v3608_v55, %v462_v7  ;;  %vm624_vm8 = vweird.f32 %v3608_v55  ;;  %v659_v25 = vand.u32 2147483648, %v4203_v51  ;;  %3615 = vrcp.f32 %v4206_v56  ;;  %vm4221_vm9 = vmor %vm608_vm4, %vm609_vm6 }
  0x5b   : > { %v605_v61 = vsub.f32 1.0, %v604_v33  ;;  %vm4225_vm10 = vcmp.eq.f32.partialorder %v627_v3, 8.507059e+37  ;;  %v630_v4 = vor.u32 1.1754944e-38, %v629_v47  ;;  %vm638_vm11 = vweird.f32 %v4201_v50  ;;  %vm4231_vm12 = vmor %vm623_vm3, %vm624_vm8 }
  0x5c   : > { %v620_v49 = vsub.f32 1.0, %v619_v59  ;;  %vm4235_vm13 = vcmp.eq.f32.partialorder %v642_v6, 8.507059e+37  ;;  %vm653_vm14 = vweird.f32 %v4203_v51  ;;  %3617 = vrcp.f32 %v4212_v60 }
  0x5d   : > { %v606_v53 = vmul.f32 %v3606_v52, %v605_v61  ;;  %v3610_v29 = vpop.eup %3609  ;;  %v645_v13 = vor.u32 1.1754944e-38, %v644_v9  ;;  %vm4242_vm15 = vcmp.eq.f32.partialorder %v657_v10, 8.507059e+37  ;;  %v660_v37 = vor.u32 1.1754944e-38, %v659_v25 }
  0x5e   : > { %v621_v27 = vmul.f32 %v3608_v55, %v620_v49  ;;  %v3612_v35 = vpop.eup %3611  ;;  %v634_v15 = vmul.f32 %v3610_v29, %v4201_v50  ;;  %vm639_vm0 = vweird.f32 %v3610_v29  ;;  %vm668_vm7 = vweird.f32 %v4206_v56 }
  0x5f   : > { %v607_v5 = vadd.f32 %v3606_v52, %v606_v53  ;;  %v3614_v14 = vpop.eup %3613  ;;  %v672_v18 = vand.u32 2147483647, %v4206_v56  ;;  %vm4263_vm2 = vmor %vm638_vm11, %vm639_vm0  ;;  %vm683_vm3 = vweird.f32 %v4212_v60  ;;  %v467_v11 = vadd.f32 1.0, %v3612_v35 }
  0x60   : > { %v622_v17 = vadd.f32 %v3608_v55, %v621_v27  ;;  %v635_v34 = vsub.f32 1.0, %v634_v15  ;;  %v649_v7 = vmul.f32 %v3614_v14, %v4203_v51  ;;  %v3616_v46 = vpop.eup %3615  ;;  %vm654_vm1 = vweird.f32 %v3614_v14 }
  0x61   : > { %v611_v0 = vsel %vm4221_vm9, %v3606_v52, %v607_v5  ;;  %v664_v32 = vmul.f32 %v3616_v46, %v4206_v56  ;;  %vm669_vm4 = vweird.f32 %v3616_v46  ;;  %v687_v50 = vand.u32 2147483647, %v4212_v60 }
  0x62   : > { %v616_v38 = vsel %vm4208_vm5, %v615_v20, %v611_v0  ;;  %v626_v43 = vsel %vm4231_vm12, %v3608_v55, %v622_v17  ;;  %v636_v39 = vmul.f32 %v3610_v29, %v635_v34  ;;  %v650_v31 = vsub.f32 1.0, %v649_v7  ;;  %v3618_v36 = vpop.eup %3617  ;;  %vm4273_vm5 = vmor %vm653_vm14, %vm654_vm1 }
  0x63   : > { %v717_v24 = vmul.f32 %v616_v38, %v3953_v42  ;;  %v631_v30 = vsel %vm4225_vm10, %v630_v4, %v626_v43  ;;  %v674_v42 = vand.u32 2147483648, %v4206_v56  ;;  %v665_v21 = vsub.f32 1.0, %v664_v32  ;;  %vm4286_vm8 = vmor %vm668_vm7, %vm669_vm4 }
  0x64   : > { %v718_v19 = vmul.f32 %v631_v30, %v3973_v57  ;;  %v637_v57 = vadd.f32 %v3610_v29, %v636_v39  ;;  %v651_v45 = vmul.f32 %v3614_v14, %v650_v31  ;;  %v679_v48 = vmul.f32 %v3618_v36, %v4212_v60 }
  0x65   : > { %734 = vst [vmem:[#allocation2 + $0xb0] sm:$0xff] %v717_v24  ;;  %vm684_vm6 = vweird.f32 %v3618_v36  ;;  %v689_v52 = vand.u32 2147483648, %v4212_v60  ;;  %3619 = vrcp.f32 %v467_v11  ;;  %v666_v55 = vmul.f32 %v3616_v46, %v665_v21 }
  0x66   : > { %735 = vst [vmem:[#allocation2 + $0xc8] sm:$0xff] %v718_v19  ;;  %v641_v54 = vsel %vm4263_vm2, %v3610_v29, %v637_v57  ;;  %v652_v3 = vadd.f32 %v3614_v14, %v651_v45  ;;  %v680_v33 = vsub.f32 1.0, %v679_v48  ;;  %vm673_vm9 = vcmp.eq.f32.partialorder %v672_v18, 8.507059e+37  ;;  %vm685_vm10 = vmor %vm683_vm3, %vm684_vm6 }
  0x67   : > { %v646_v47 = vsel %vm4235_vm13, %v645_v13, %v641_v54  ;;  %v675_v41 = vor.u32 1.1754944e-38, %v674_v42  ;;  %v667_v6 = vadd.f32 %v3616_v46, %v666_v55  ;;  %v690_v56 = vor.u32 1.1754944e-38, %v689_v52 }
  0x68   : > { %v719_v59 = vmul.f32 %v646_v47, %v3976_v58  ;;  %v656_v61 = vsel %vm4273_vm5, %v3614_v14, %v652_v3  ;;  %v681_v49 = vmul.f32 %v3618_v36, %v680_v33  ;;  %vm688_vm11 = vcmp.eq.f32.partialorder %v687_v50, 8.507059e+37 }
  0x69   : > { %v661_v9 = vsel %vm4242_vm15, %v660_v37, %v656_v61  ;;  %v671_v53 = vsel %vm4286_vm8, %v3616_v46, %v667_v6  ;;  %vm698_vm12 = vweird.f32 %v467_v11  ;;  %v704_v60 = vand.u32 2147483648, %v467_v11 }
  0x6a   : > { %736 = vst [vmem:[#allocation2 + $0xd0] sm:$0xff] %v719_v59  ;;  %v720_v10 = vmul.f32 %v661_v9, %v4132_v44  ;;  %v682_v58 = vadd.f32 %v3618_v36, %v681_v49  ;;  %v676_v25 = vsel %vm673_vm9, %v675_v41, %v671_v53  ;;  %v702_v5 = vand.u32 2147483647, %v467_v11 }
  0x6b   : > { %v3620_v20 = vpop.eup %3619  ;;  %v721_v26 = vmul.f32 %v676_v25, %v4152_v23  ;;  %v705_v16 = vor.u32 1.1754944e-38, %v704_v60 }
  0x6c   : > { %737 = vst [vmem:[#allocation2 + $0xe8] sm:$0xff] %v720_v10  ;;  %v686_v27 = vsel %vm685_vm10, %v3618_v36, %v682_v58  ;;  %v694_v12 = vmul.f32 %v3620_v20, %v467_v11  ;;  %vm699_vm13 = vweird.f32 %v3620_v20  ;;  %vm703_vm15 = vcmp.eq.f32.partialorder %v702_v5, 8.507059e+37 }
  0x6d   : > { %v691_v4 = vsel %vm688_vm11, %v690_v56, %v686_v27  ;;  %738 = vst [vmem:[#allocation2 + $0xf0] sm:$0xff] %v721_v26  ;;  %vm700_vm14 = vmor %vm698_vm12, %vm699_vm13 }
  0x6e   : > { %v722_v29 = vmul.f32 %v691_v4, %v4173_v8  ;;  %v695_v44 = vsub.f32 1.0, %v694_v12 }
  0x70   : > { %739 = vst [vmem:[#allocation2 + $0x108] sm:$0xff] %v722_v29  ;;  %v696_v62 = vmul.f32 %v3620_v20, %v695_v44 }
  0x72   : > { %v697_v35 = vadd.f32 %v3620_v20, %v696_v62 }
  0x74   : > { %v701_v17 = vsel %vm700_vm14, %v3620_v20, %v697_v35  ;;  %744 = sbr.rel (%p2946_p0) target bundleno = 158 (0x9e), region = 44 }
  0x75   : > { %v706_v23 = vsel %vm703_vm15, %v705_v16, %v701_v17 }
  0x76   : > { %v723_v15 = vmul.f32 %v706_v23, %v4192_v28 }
  0x78   : > { %740 = vst [vmem:[#allocation2 + $0x110] sm:$0xff] %v723_v15 }
  0x79   : > { %v748_v8 = vld [vmem:[%s747_s27] sm:$0xff]  ;;  %v749_v13 = vld [vmem:[%s747_s27 + $0x8] sm:$0xff] }
  0x7a   : > { %v750_v63 = vmul.f32 %v3867_v1, %v748_v8  ;;  %v751_v14 = vmul.f32 %v3867_v1, %v749_v13 }
  0x7c   : > { %v752_v0 = vadd.f32 %v3875_v2, %v750_v63  ;;  %v753_v28 = vadd.f32 %v3875_v2, %v751_v14 }
  0x7e   : > { %v2949_v37 = vmul.f32 -1.442695, %v752_v0  ;;  %v2950_v38 = vmul.f32 -1.442695, %v753_v28 }
  0x80   : > { %3621 = vpow2.f32 %v2949_v37 }
  0x81   : > { %3623 = vpow2.f32 %v2950_v38 }
  0x86   : > { %v3622_v43 = vpop.eup %3621 }
  0x87   : > { %v3624_v34 = vpop.eup %3623  ;;  %v760_v7 = vadd.f32 1.0, %v3622_v43 }
  0x88   : > { %v761_v46 = vadd.f32 1.0, %v3624_v34 }
  0x89   : > { %3625 = vrcp.f32 %v760_v7  ;;  %vm767_vm0 = vweird.f32 %v760_v7  ;;  %v773_v19 = vand.u32 2147483648, %v760_v7  ;;  %v771_v32 = vand.u32 2147483647, %v760_v7 }
  0x8a   : > { %3627 = vrcp.f32 %v761_v46  ;;  %v788_v36 = vand.u32 2147483648, %v761_v46  ;;  %vm782_vm1 = vweird.f32 %v761_v46  ;;  %v786_v42 = vand.u32 2147483647, %v761_v46 }
  0x8b   : > { %v774_v57 = vor.u32 1.1754944e-38, %v773_v19  ;;  %vm772_vm3 = vcmp.eq.f32.partialorder %v771_v32, 8.507059e+37 }
  0x8c   : > { %v789_v48 = vor.u32 1.1754944e-38, %v788_v36  ;;  %vm787_vm6 = vcmp.eq.f32.partialorder %v786_v42, 8.507059e+37 }
  0x8f   : > { %v3626_v24 = vpop.eup %3625 }
  0x90   : > { %v3628_v30 = vpop.eup %3627  ;;  %v763_v18 = vmul.f32 %v3626_v24, %v760_v7  ;;  %vm768_vm7 = vweird.f32 %v3626_v24 }
  0x91   : > { %v778_v39 = vmul.f32 %v3628_v30, %v761_v46  ;;  %vm783_vm2 = vweird.f32 %v3628_v30  ;;  %vm769_vm4 = vmor %vm767_vm0, %vm768_vm7 }
  0x92   : > { %v764_v31 = vsub.f32 1.0, %v763_v18  ;;  %vm784_vm5 = vmor %vm782_vm1, %vm783_vm2 }
  0x93   : > { %v779_v40 = vsub.f32 1.0, %v778_v39 }
  0x94   : > { %v765_v11 = vmul.f32 %v3626_v24, %v764_v31 }
  0x95   : > { %v780_v45 = vmul.f32 %v3628_v30, %v779_v40 }
  0x96   : > { %v766_v21 = vadd.f32 %v3626_v24, %v765_v11 }
  0x97   : > { %v781_v22 = vadd.f32 %v3628_v30, %v780_v45 }
  0x98   : > { %v770_v50 = vsel %vm769_vm4, %v3626_v24, %v766_v21 }
  0x99   : > { %v775_v52 = vsel %vm772_vm3, %v774_v57, %v770_v50  ;;  %v785_v54 = vsel %vm784_vm5, %v3628_v30, %v781_v22 }
  0x9a   : > { %v792_v3 = vmul.f32 %v775_v52, %v752_v0  ;;  %v790_v55 = vsel %vm787_vm6, %v789_v48, %v785_v54 }
  0x9b   : > { %v793_v33 = vmul.f32 %v790_v55, %v753_v28 }
  0x9c   : > { %794 = vst [vmem:[#allocation2 + $0x8] sm:$0xff] %v792_v3 }
  0x9d   : > { %795 = vst [vmem:[#allocation2 + $0x10] sm:$0xff] %v793_v33 }
  0x9e PF: > { %p2951_p1 = scmp.ge.s32.totalorder %s3715_s21, 1 }
  0xa0   : > { %799 = sbr.rel (%p2951_p1) target bundleno = 202 (0xca), region = 48 }
  0xa5   : > { %v2954_v47 = vld [vmem:[%s3873_s8 + $0x80] sm:$0xff]  ;;  %v2955_v51 = vld [vmem:[%s3873_s8 + $0x88] sm:$0xff] }
  0xa6   : > { %v805_v41 = vmul.f32 %v3867_v1, %v2954_v47  ;;  %v806_v59 = vmul.f32 %v3867_v1, %v2955_v51 }
  0xa8   : > { %v807_v61 = vadd.f32 %v3875_v2, %v805_v41  ;;  %v808_v6 = vadd.f32 %v3875_v2, %v806_v59 }
  0xaa   : > { %v2956_v49 = vmul.f32 -1.442695, %v807_v61  ;;  %v2957_v9 = vmul.f32 -1.442695, %v808_v6 }
  0xac   : > { %3629 = vpow2.f32 %v2956_v49 }
  0xad   : > { %3631 = vpow2.f32 %v2957_v9 }
  0xb2   : > { %v3630_v56 = vpop.eup %3629 }
  0xb3   : > { %v3632_v10 = vpop.eup %3631  ;;  %v815_v53 = vadd.f32 1.0, %v3630_v56 }
  0xb4   : > { %v816_v58 = vadd.f32 1.0, %v3632_v10 }
  0xb5   : > { %3633 = vrcp.f32 %v815_v53  ;;  %vm822_vm8 = vweird.f32 %v815_v53  ;;  %v828_v27 = vand.u32 2147483648, %v815_v53  ;;  %v826_v4 = vand.u32 2147483647, %v815_v53 }
  0xb6   : > { %3635 = vrcp.f32 %v816_v58  ;;  %v843_v2 = vand.u32 2147483648, %v816_v58  ;;  %vm837_vm10 = vweird.f32 %v816_v58  ;;  %v841_v29 = vand.u32 2147483647, %v816_v58 }
  0xb7   : > { %v829_v5 = vor.u32 1.1754944e-38, %v828_v27  ;;  %vm827_vm13 = vcmp.eq.f32.partialorder %v826_v4, 8.507059e+37 }
  0xb8   : > { %v844_v35 = vor.u32 1.1754944e-38, %v843_v2  ;;  %vm842_vm15 = vcmp.eq.f32.partialorder %v841_v29, 8.507059e+37 }
  0xbb   : > { %v3634_v20 = vpop.eup %3633 }
  0xbc   : > { %v3636_v25 = vpop.eup %3635  ;;  %v818_v26 = vmul.f32 %v3634_v20, %v815_v53  ;;  %vm823_vm9 = vweird.f32 %v3634_v20 }
  0xbd   : > { %v833_v1 = vmul.f32 %v3636_v25, %v816_v58  ;;  %vm838_vm11 = vweird.f32 %v3636_v25  ;;  %vm824_vm12 = vmor %vm822_vm8, %vm823_vm9 }
  0xbe   : > { %v819_v12 = vsub.f32 1.0, %v818_v26  ;;  %vm839_vm14 = vmor %vm837_vm10, %vm838_vm11 }
  0xbf   : > { %v834_v60 = vsub.f32 1.0, %v833_v1 }
  0xc0   : > { %v820_v44 = vmul.f32 %v3634_v20, %v819_v12 }
  0xc1   : > { %v835_v62 = vmul.f32 %v3636_v25, %v834_v60 }
  0xc2   : > { %v821_v16 = vadd.f32 %v3634_v20, %v820_v44 }
  0xc3   : > { %v836_v17 = vadd.f32 %v3636_v25, %v835_v62 }
  0xc4   : > { %v825_v23 = vsel %vm824_vm12, %v3634_v20, %v821_v16 }
  0xc5   : > { %v830_v15 = vsel %vm827_vm13, %v829_v5, %v825_v23  ;;  %v840_v8 = vsel %vm839_vm14, %v3636_v25, %v836_v17 }
  0xc6   : > { %v847_v13 = vmul.f32 %v830_v15, %v807_v61  ;;  %v845_v63 = vsel %vm842_vm15, %v844_v35, %v840_v8 }
  0xc7   : > { %v848_v14 = vmul.f32 %v845_v63, %v808_v6 }
  0xc8   : > { %850 = vst [vmem:[#allocation2 + $0x128] sm:$0xff] %v847_v13 }
  0xc9   : > { %851 = vst [vmem:[#allocation2 + $0x130] sm:$0xff] %v848_v14 }
  0xca PF: > { %v3391_v0 = vld [vmem:[%s4802_s3 + $0x38] sm:$0xff]  ;;  %v3390_v28 = vld [vmem:[%s4802_s3 + $0x30] sm:$0xff]  ;;  %v3389_v37 = vld [vmem:[%s4802_s3 + $0x28] sm:$0xff]  ;;  %s3377_s10 = sshll.u32 %s3719_s22, 5  ;;  %s2790_s22 = sshll.u32 %s4305_s12, 4  ;;  %s2791_s22 = int_to_ptr.vmem [resolvable:$true] %s2790_s22 }
  0xcb   : > { %3457 = vmatpush.bf16.msra.mxu1 %v3391_v0  ;;  %3458 = vmatpush.bf16.msra.mxu2 %v3391_v0  ;;  %v3388_v38 = vld [vmem:[%s4802_s3 + $0x20] sm:$0xff]  ;;  %v3387_v43 = vld [vmem:[%s4802_s3 + $0x18] sm:$0xff]  ;;  %v3386_v34 = vld [vmem:[%s4802_s3 + $0x10] sm:$0xff]  ;;  %s4867_s29 = sand.u32 1, %s3707_s19   ;;  %s3657_s14 = scalar_lea.hbm %s4804_s5, 512 }
  0xcc   : > { %3459 = vmatpush.bf16.msra.mxu3 %v3391_v0  ;;  %1012 = vmatpush.bf16.msra.mxu0 %v3391_v0  ;;  %v872_v7 = vld [vmem:[#allocation2 + $0x47] sm:$0xff]  ;;  %v873_v46 = vld [vmem:[#allocation2 + $0x4f] sm:$0xff]  ;;  %v3407_v41 = vld [vmem:[%s4802_s3 + $0xb8] sm:$0xff]  ;;  %s2775_s15 = scalar_lea.sflag [#allocation4], %s4867_s29 }
  0xcd   : > { %v876_v24 = vld [vmem:[#allocation2 + $0x87] sm:$0xff]  ;;  %v877_v30 = vld [vmem:[#allocation2 + $0x8f] sm:$0xff]  ;;  %v888_v32 = vpack.c.bf16 %v872_v7, %v872_v7  ;;  %v889_v36 = vpack.c.bf16 %v873_v46, %v873_v46  ;;  %v3399_v59 = vld [vmem:[%s4802_s3 + $0x78] sm:$0xff] }
  0xce   : > { %v880_v18 = vld [vmem:[#allocation2 + $0xc7] sm:$0xff]  ;;  %v881_v19 = vld [vmem:[#allocation2 + $0xcf] sm:$0xff]  ;;  %v892_v40 = vpack.c.bf16 %v876_v24, %v876_v24  ;;  %v893_v42 = vpack.c.bf16 %v877_v30, %v877_v30  ;;  %v3415_v56 = vld [vmem:[%s4802_s3 + $0xf8] sm:$0xff] }
  0xcf   : > { %3460 = vmatpush.bf16.msra.mxu1 %v3390_v28  ;;  %3461 = vmatpush.bf16.msra.mxu2 %v3390_v28  ;;  %v868_v39 = vld [vmem:[#allocation2 + $0x7] sm:$0xff]  ;;  %v869_v31 = vld [vmem:[#allocation2 + $0xf] sm:$0xff]  ;;  %v896_v11 = vpack.c.bf16 %v880_v18, %v880_v18  ;;  %v897_v45 = vpack.c.bf16 %v881_v19, %v881_v19  ;;  %v936_v22 = vunpack.c.l.b16 %v888_v32  ;;  %v937_v50 = vunpack.c.l.b16 %v889_v36  ;;  %v3423_v10 = vld [vmem:[%s4802_s3 + $0x138] sm:$0xff] }
  0xd0   : > { %3462 = vmatpush.bf16.msra.mxu3 %v3390_v28  ;;  %1013 = vmatpush.bf16.msra.mxu0 %v3390_v28  ;;  %v3385_v57 = vld [vmem:[%s4802_s3 + $0x8] sm:$0xff]  ;;  %v884_v21 = vpack.c.bf16 %v868_v39, %v868_v39  ;;  %v885_v48 = vpack.c.bf16 %v869_v31, %v869_v31  ;;  %v940_v52 = vunpack.c.l.b16 %v892_v40  ;;  %v941_v54 = vunpack.c.l.b16 %v893_v42  ;;  %v3384_v3 = vld [vmem:[%s4802_s3] sm:$0xff]  ;;  %v3406_v53 = vld [vmem:[%s4802_s3 + $0xb0] sm:$0xff] }
  0xd1   : > { %v944_v55 = vunpack.c.l.b16 %v896_v11  ;;  %v945_v33 = vunpack.c.l.b16 %v897_v45  ;;  %v4351_v61 = vpack.c.b16 %v937_v50, %v936_v22  ;;  %v3398_v58 = vld [vmem:[%s4802_s3 + $0x70] sm:$0xff]  ;;  %v874_v26 = vld [vmem:[#allocation2 + $0x67] sm:$0xff]  ;;  %v3403_v39 = vld [vmem:[%s4802_s3 + $0x98] sm:$0xff] }
  0xd2   : > { %v932_v47 = vunpack.c.l.b16 %v884_v21  ;;  %v933_v51 = vunpack.c.l.b16 %v885_v48  ;;  %v4353_v6 = vpack.c.b16 %v941_v54, %v940_v52  ;;  %v3414_v20 = vld [vmem:[%s4802_s3 + $0xf0] sm:$0xff]  ;;  %v878_v1 = vld [vmem:[#allocation2 + $0xa7] sm:$0xff]  ;;  %v890_v62 = vpack.c.bf16 %v874_v26, %v874_v26  ;;  %v3395_v31 = vld [vmem:[%s4802_s3 + $0x58] sm:$0xff] }
  0xd3   : > { %3463 = vmatpush.bf16.msra.mxu1 %v3389_v37  ;;  %3464 = vmatpush.bf16.msra.mxu2 %v3389_v37  ;;  %v4355_v49 = vpack.c.b16 %v945_v33, %v944_v55  ;;  %v3422_v25 = vld [vmem:[%s4802_s3 + $0x130] sm:$0xff]  ;;  %v882_v4 = vld [vmem:[#allocation2 + $0xe7] sm:$0xff]  ;;  %v894_v35 = vpack.c.bf16 %v878_v1, %v878_v1  ;;  %v3411_v11 = vld [vmem:[%s4802_s3 + $0xd8] sm:$0xff] }
  0xd4   : > { %3465 = vmatpush.bf16.msra.mxu3 %v3389_v37  ;;  %1014 = vmatpush.bf16.msra.mxu0 %v3389_v37  ;;  %v948_v9 = vpack.c.b16 %v933_v51, %v932_v47  ;;  %v875_v27 = vld [vmem:[#allocation2 + $0x6f] sm:$0xff]  ;;  %v870_v60 = vld [vmem:[#allocation2 + $0x27] sm:$0xff]  ;;  %v898_v23 = vpack.c.bf16 %v882_v4, %v882_v4  ;;  %v938_v37 = vunpack.c.l.b16 %v890_v62 }
  0xd5   : > { %v879_v12 = vld [vmem:[#allocation2 + $0xaf] sm:$0xff]  ;;  %v891_v16 = vpack.c.bf16 %v875_v27, %v875_v27  ;;  %v886_v8 = vpack.c.bf16 %v870_v60, %v870_v60  ;;  %v3404_v0 = vld [vmem:[%s4802_s3 + $0xa0] sm:$0xff]  ;;  %v3431_v60 = vld [vmem:[%s4802_s3 + $0x178] sm:$0xff] }
  0xd6   : > { %v883_v2 = vld [vmem:[#allocation2 + $0xef] sm:$0xff]  ;;  %v895_v17 = vpack.c.bf16 %v879_v12, %v879_v12  ;;  %v3396_v28 = vld [vmem:[%s4802_s3 + $0x60] sm:$0xff]  ;;  %v946_v7 = vunpack.c.l.b16 %v898_v23 }
  0xd7   : > { %3466 = vmatpush.bf16.msra.mxu1 %v3388_v38  ;;  %3467 = vmatpush.bf16.msra.mxu2 %v3388_v38  ;;  %v871_v29 = vld [vmem:[#allocation2 + $0x2f] sm:$0xff]  ;;  %v899_v15 = vpack.c.bf16 %v883_v2, %v883_v2  ;;  %v934_v24 = vunpack.c.l.b16 %v886_v8  ;;  %v3412_v18 = vld [vmem:[%s4802_s3 + $0xe0] sm:$0xff]  ;;  %v3439_v2 = vld [vmem:[%s4802_s3 + $0x1b8] sm:$0xff] }
  0xd8   : > { %3468 = vmatpush.bf16.msra.mxu3 %v3388_v38  ;;  %1015 = vmatpush.bf16.msra.mxu0 %v3388_v38  ;;  %v3405_v44 = vld [vmem:[%s4802_s3 + $0xa8] sm:$0xff]  ;;  %v887_v13 = vpack.c.bf16 %v871_v29, %v871_v29  ;;  %v939_v38 = vunpack.c.l.b16 %v891_v16  ;;  %v3420_v19 = vld [vmem:[%s4802_s3 + $0x120] sm:$0xff]  ;;  %v3402_v45 = vld [vmem:[%s4802_s3 + $0x90] sm:$0xff] }
  0xd9   : > { %v3397_v5 = vld [vmem:[%s4802_s3 + $0x68] sm:$0xff]  ;;  %v947_v46 = vunpack.c.l.b16 %v899_v15  ;;  %v3394_v21 = vld [vmem:[%s4802_s3 + $0x50] sm:$0xff]  ;;  %v3392_v26 = vld [vmem:[%s4802_s3 + $0x40] sm:$0xff] }
  0xda   : > { %v3413_v63 = vld [vmem:[%s4802_s3 + $0xe8] sm:$0xff]  ;;  %v935_v30 = vunpack.c.l.b16 %v887_v13  ;;  %v4408_v32 = vpack.c.b16 %v939_v38, %v938_v37  ;;  %v3410_v48 = vld [vmem:[%s4802_s3 + $0xd0] sm:$0xff]  ;;  %v3416_v62 = vld [vmem:[%s4802_s3 + $0x100] sm:$0xff] }
  0xdb   : > { %3469 = vmatpush.bf16.msra.mxu1 %v3387_v43  ;;  %3470 = vmatpush.bf16.msra.mxu2 %v3387_v43  ;;  %v3421_v14 = vld [vmem:[%s4802_s3 + $0x128] sm:$0xff]  ;;  %v4412_v40 = vpack.c.b16 %v947_v46, %v946_v7  ;;  %v1078_v50 = vld [vmem:[#allocation2 + $0x10] sm:$0xff]  ;;  %v3447_v16 = vld [vmem:[%s4802_s3 + $0x1f8] sm:$0xff] }
  0xdc   : > { %3471 = vmatpush.bf16.msra.mxu3 %v3387_v43  ;;  %1016 = vmatpush.bf16.msra.mxu0 %v3387_v43  ;;  %v942_v43 = vunpack.c.l.b16 %v894_v35  ;;  %v4414_v42 = vpack.c.b16 %v935_v30, %v934_v24  ;;  %v1077_v22 = vld [vmem:[#allocation2 + $0x8] sm:$0xff]  ;;  %v1288_v54 = vld [vmem:[#allocation2 + $0x11] sm:$0xff] }
  0xdd   : > { %v1287_v52 = vld [vmem:[#allocation2 + $0x9] sm:$0xff]  ;;  %v3455_v35 = vld [vmem:[%s4802_s3 + $0x238] sm:$0xff] }
  0xde   : > { %v1707_v55 = vld [vmem:[#allocation2 + $0x28] sm:$0xff]  ;;  %v1708_v33 = vld [vmem:[#allocation2 + $0x30] sm:$0xff] }
  0xdf   : > { %3472 = vmatpush.bf16.msra.mxu1 %v3386_v34  ;;  %3473 = vmatpush.bf16.msra.mxu2 %v3386_v34  ;;  %v3401_v47 = vld [vmem:[%s4802_s3 + $0x88] sm:$0xff]  ;;  %v3438_v8 = vld [vmem:[%s4802_s3 + $0x1b0] sm:$0xff] }
  0xe0   : > { %3474 = vmatpush.bf16.msra.mxu3 %v3386_v34  ;;  %1017 = vmatpush.bf16.msra.mxu0 %v3386_v34  ;;  %v943_v34 = vunpack.c.l.b16 %v895_v17  ;;  %v3393_v51 = vld [vmem:[%s4802_s3 + $0x48] sm:$0xff]  ;;  %v3430_v13 = vld [vmem:[%s4802_s3 + $0x170] sm:$0xff] }
  0xe1   : > { %v1709_v37 = vld [vmem:[#allocation2 + $0x48] sm:$0xff]  ;;  %v1710_v38 = vld [vmem:[#allocation2 + $0x50] sm:$0xff] }
  0xe2   : > { %v4410_v36 = vpack.c.b16 %v943_v34, %v942_v43  ;;  %v3437_v43 = vld [vmem:[%s4802_s3 + $0x1a8] sm:$0xff] }
  0xe3   : > { %3475 = vmatpush.bf16.msra.mxu1 %v3385_v57  ;;  %3476 = vmatpush.bf16.msra.mxu2 %v3385_v57  ;;  %v3429_v34 = vld [vmem:[%s4802_s3 + $0x168] sm:$0xff] }
  0xe4   : > { %3477 = vmatpush.bf16.msra.mxu3 %v3385_v57  ;;  %1018 = vmatpush.bf16.msra.mxu0 %v3385_v57  ;;  %v3419_v57 = vld [vmem:[%s4802_s3 + $0x118] sm:$0xff]  ;;  %v3445_v7 = vld [vmem:[%s4802_s3 + $0x1e8] sm:$0xff] }
  0xe5   : > { %v3453_v46 = vld [vmem:[%s4802_s3 + $0x228] sm:$0xff] }
  0xe7   : > { %3478 = vmatpush.bf16.msra.mxu1 %v3384_v3  ;;  %3479 = vmatpush.bf16.msra.mxu2 %v3384_v3 }
  0xe8   : > { %3480 = vmatpush.bf16.msra.mxu3 %v3384_v3  ;;  %1019 = vmatpush.bf16.msra.mxu0 %v3384_v3  ;;  %v3418_v3 = vld [vmem:[%s4802_s3 + $0x110] sm:$0xff] }
  0xea   : > { %1030 = vmatmul.bf16.vlgmr.msra.gmra.mxu1 %v4351_v61  ;;  %1040 = vmatmul.bf16.vlgmr.msra.gmra.mxu2 %v4353_v6 }
  0xeb   : > { %1432 = vmatpush.bf16.msrb.mxu2 %v3407_v41  ;;  %1222 = vmatpush.bf16.msrb.mxu1 %v3399_v59  ;;  %v1093_v41 = vpack.c.bf16 %v1077_v22, %v1077_v22  ;;  %v1094_v59 = vpack.c.bf16 %v1078_v50, %v1078_v50  ;;  %v3436_v22 = vld [vmem:[%s4802_s3 + $0x1a0] sm:$0xff] }
  0xec   : > { %1050 = vmatmul.bf16.vlgmr.msra.gmra.mxu3 %v4355_v49  ;;  %1020 = vmatmul.bf16.vlgmr.msra.gmra.mxu0 %v948_v9  ;;  %v1303_v9 = vpack.c.bf16 %v1287_v52, %v1287_v52  ;;  %v3444_v50 = vld [vmem:[%s4802_s3 + $0x1e0] sm:$0xff] }
  0xed   : > { %1642 = vmatpush.bf16.msrb.mxu3 %v3415_v56  ;;  %1852 = vmatpush.bf16.msrb.mxu0 %v3423_v10  ;;  %v1304_v56 = vpack.c.bf16 %v1288_v54, %v1288_v54  ;;  %v1723_v10 = vpack.c.bf16 %v1707_v55, %v1707_v55  ;;  %v1142_v27 = vunpack.c.l.b16 %v1093_v41  ;;  %v1143_v1 = vunpack.c.l.b16 %v1094_v59  ;;  %v3428_v52 = vld [vmem:[%s4802_s3 + $0x160] sm:$0xff]  ;;  %v1711_v54 = vld [vmem:[#allocation2 + $0x68] sm:$0xff] }
  0xee   : > { %v1352_v12 = vunpack.c.l.b16 %v1303_v9 }
  0xef   : > { %1433 = vmatpush.bf16.msrb.mxu2 %v3406_v53  ;;  %1223 = vmatpush.bf16.msrb.mxu1 %v3398_v58  ;;  %v1724_v53 = vpack.c.bf16 %v1708_v33, %v1708_v33  ;;  %v3409_v58 = vld [vmem:[%s4802_s3 + $0xc8] sm:$0xff]  ;;  %v1353_v4 = vunpack.c.l.b16 %v1304_v56  ;;  %v1772_v29 = vunpack.c.l.b16 %v1723_v10  ;;  %v1158_v17 = vpack.c.b16 %v1143_v1, %v1142_v27  ;;  %v3427_v27 = vld [vmem:[%s4802_s3 + $0x158] sm:$0xff] }
  0xf0   : > { %v1713_v1 = vld [vmem:[#allocation2 + $0x88] sm:$0xff] }
  0xf1   : > { %1643 = vmatpush.bf16.msrb.mxu3 %v3414_v20  ;;  %1853 = vmatpush.bf16.msrb.mxu0 %v3422_v25  ;;  %v3417_v20 = vld [vmem:[%s4802_s3 + $0x108] sm:$0xff]  ;;  %v3400_v25 = vld [vmem:[%s4802_s3 + $0x80] sm:$0xff]  ;;  %v1368_v23 = vpack.c.b16 %v1353_v4, %v1352_v12  ;;  %v1714_v12 = vld [vmem:[#allocation2 + $0x90] sm:$0xff] }
  0xf3   : > { %1434 = vmatpush.bf16.msrb.mxu2 %v3405_v44  ;;  %1224 = vmatpush.bf16.msrb.mxu1 %v3397_v5  ;;  %v1773_v44 = vunpack.c.l.b16 %v1724_v53  ;;  %v3408_v5 = vld [vmem:[%s4802_s3 + $0xc0] sm:$0xff] }
  0xf5   : > { %1644 = vmatpush.bf16.msrb.mxu3 %v3413_v63  ;;  %1854 = vmatpush.bf16.msrb.mxu0 %v3421_v14  ;;  %v1788_v15 = vpack.c.b16 %v1773_v44, %v1772_v29  ;;  %v3446_v63 = vld [vmem:[%s4802_s3 + $0x1f0] sm:$0xff]  ;;  %v1730_v29 = vpack.c.bf16 %v1714_v12, %v1714_v12  ;;  %v3448_v12 = vld [vmem:[%s4802_s3 + $0x200] sm:$0xff] }
  0xf6   : > { %v3454_v14 = vld [vmem:[%s4802_s3 + $0x230] sm:$0xff] }
  0xf7   : > { %1435 = vmatpush.bf16.msrb.mxu2 %v3404_v0  ;;  %1225 = vmatpush.bf16.msrb.mxu1 %v3396_v28  ;;  %v1289_v0 = vld [vmem:[#allocation2 + $0x29] sm:$0xff]  ;;  %v1290_v28 = vld [vmem:[#allocation2 + $0x31] sm:$0xff] }
  0xf8   : > { %v1305_v24 = vpack.c.bf16 %v1289_v0, %v1289_v0  ;;  %v1306_v30 = vpack.c.bf16 %v1290_v28, %v1290_v28  ;;  %v1716_v0 = vld [vmem:[#allocation2 + $0xb0] sm:$0xff] }
  0xf9   : > { %1645 = vmatpush.bf16.msrb.mxu3 %v3412_v18  ;;  %1855 = vmatpush.bf16.msrb.mxu0 %v3420_v19  ;;  %v1725_v18 = vpack.c.bf16 %v1709_v37, %v1709_v37  ;;  %v1726_v19 = vpack.c.bf16 %v1710_v38, %v1710_v38 }
  0xfa   : > { %1035 = vmatmul.bf16.gmra.mxu1 %v4408_v32  ;;  %1045 = vmatmul.bf16.gmra.mxu2 %v4410_v36 }
  0xfb   : > { %1436 = vmatpush.bf16.msrb.mxu2 %v3403_v39  ;;  %1226 = vmatpush.bf16.msrb.mxu1 %v3395_v31  ;;  %v1354_v39 = vunpack.c.l.b16 %v1305_v24  ;;  %v1355_v31 = vunpack.c.l.b16 %v1306_v30 }
  0xfc   : > { %1055 = vmatmul.bf16.gmra.mxu3 %v4412_v40  ;;  %1025 = vmatmul.bf16.gmra.mxu0 %v4414_v42 }
  0xfd   : > { %1646 = vmatpush.bf16.msrb.mxu3 %v3411_v11  ;;  %1856 = vmatpush.bf16.msrb.mxu0 %v3419_v57  ;;  %v1775_v11 = vunpack.c.l.b16 %v1726_v19  ;;  %v4499_v57 = vpack.c.b16 %v1355_v31, %v1354_v39  ;;  %v1297_v19 = vld [vmem:[#allocation2 + $0xa9] sm:$0xff]  ;;  %v1298_v39 = vld [vmem:[#allocation2 + $0xb1] sm:$0xff] }
  0xfe   : > { %v3433_v31 = vld [vmem:[%s4802_s3 + $0x188] sm:$0xff] }
  0xff   : > { %1437 = vmatpush.bf16.msrb.mxu2 %v3402_v45  ;;  %1227 = vmatpush.bf16.msrb.mxu1 %v3394_v21  ;;  %v1291_v21 = vld [vmem:[#allocation2 + $0x49] sm:$0xff] }
 0x100   : > { %v1307_v55 = vpack.c.bf16 %v1291_v21, %v1291_v21  ;;  %v1718_v21 = vld [vmem:[#allocation2 + $0xd0] sm:$0xff] }
 0x101   : > { %1647 = vmatpush.bf16.msrb.mxu3 %v3410_v48  ;;  %1857 = vmatpush.bf16.msrb.mxu0 %v3418_v3  ;;  %v1292_v48 = vld [vmem:[#allocation2 + $0x51] sm:$0xff] }
 0x102   : > { %v1712_v3 = vld [vmem:[#allocation2 + $0x70] sm:$0xff]  ;;  %v1308_v33 = vpack.c.bf16 %v1292_v48, %v1292_v48  ;;  %v1356_v41 = vunpack.c.l.b16 %v1307_v55  ;;  %v1313_v48 = vpack.c.bf16 %v1297_v19, %v1297_v19 }
 0x103   : > { %1438 = vmatpush.bf16.msrb.mxu2 %v3401_v47  ;;  %1228 = vmatpush.bf16.msrb.mxu1 %v3393_v51  ;;  %v1727_v47 = vpack.c.bf16 %v1711_v54, %v1711_v54  ;;  %v1728_v51 = vpack.c.bf16 %v1712_v3, %v1712_v3  ;;  %v3449_v54 = vld [vmem:[%s4802_s3 + $0x208] sm:$0xff] }
 0x104   : > { %v1357_v59 = vunpack.c.l.b16 %v1308_v33  ;;  %v1362_v3 = vunpack.c.l.b16 %v1313_v48 }
 0x105   : > { %1648 = vmatpush.bf16.msrb.mxu3 %v3409_v58  ;;  %1858 = vmatpush.bf16.msrb.mxu0 %v3417_v20  ;;  %v1776_v9 = vunpack.c.l.b16 %v1727_v47  ;;  %v1777_v56 = vunpack.c.l.b16 %v1728_v51  ;;  %v1293_v58 = vld [vmem:[#allocation2 + $0x69] sm:$0xff]  ;;  %v1294_v20 = vld [vmem:[#allocation2 + $0x71] sm:$0xff] }
 0x106   : > { %v4518_v10 = vpack.c.b16 %v1357_v59, %v1356_v41  ;;  %v1309_v4 = vpack.c.bf16 %v1293_v58, %v1293_v58  ;;  %v1299_v41 = vld [vmem:[#allocation2 + $0xc9] sm:$0xff]  ;;  %v1300_v59 = vld [vmem:[#allocation2 + $0xd1] sm:$0xff] }
 0x107   : > { %1439 = vmatpush.bf16.msrb.mxu2 %v3400_v25  ;;  %1229 = vmatpush.bf16.msrb.mxu1 %v3392_v26  ;;  %v4520_v53 = vpack.c.b16 %v1777_v56, %v1776_v9  ;;  %v3435_v25 = vld [vmem:[%s4802_s3 + $0x198] sm:$0xff]  ;;  %v3432_v9 = vld [vmem:[%s4802_s3 + $0x180] sm:$0xff]  ;;  %v1719_v58 = vld [vmem:[#allocation2 + $0xe8] sm:$0xff] }
 0x108   : > { %v3443_v26 = vld [vmem:[%s4802_s3 + $0x1d8] sm:$0xff]  ;;  %v1358_v44 = vunpack.c.l.b16 %v1309_v4  ;;  %v3440_v56 = vld [vmem:[%s4802_s3 + $0x1c0] sm:$0xff] }
 0x109   : > { %1649 = vmatpush.bf16.msrb.mxu3 %v3408_v5  ;;  %1859 = vmatpush.bf16.msrb.mxu0 %v3416_v62 }
 0x10a   : > { %1230 = vmatmul.bf16.vlgmr.msrb.gmra.mxu1 %v1158_v17  ;;  %1440 = vmatmul.bf16.vlgmr.msrb.gmra.mxu2 %v1368_v23  ;;  %v1295_v23 = vld [vmem:[#allocation2 + $0x89] sm:$0xff] }
 0x10b   : > { %2273 = vmatpush.bf16.msra.mxu2 %v3439_v2  ;;  %2062 = vmatpush.bf16.msra.mxu1 %v3431_v60  ;;  %v1310_v2 = vpack.c.bf16 %v1294_v20, %v1294_v20  ;;  %v1729_v60 = vpack.c.bf16 %v1713_v1, %v1713_v1  ;;  %v1311_v28 = vpack.c.bf16 %v1295_v23, %v1295_v23  ;;  %v1720_v20 = vld [vmem:[#allocation2 + $0xf0] sm:$0xff] }
 0x10c   : > { %1650 = vmatmul.bf16.vlgmr.msrb.gmra.mxu3 %v4414_v42  ;;  %1860 = vmatmul.bf16.vlgmr.msrb.gmra.mxu0 %v1788_v15  ;;  %v1774_v42 = vunpack.c.l.b16 %v1725_v18  ;;  %v1736_v1 = vpack.c.bf16 %v1720_v20, %v1720_v20  ;;  %v1302_v23 = vld [vmem:[#allocation2 + $0xf1] sm:$0xff]  ;;  %v852_v20 = vld [vmem:[%s3881_s23] sm:$0xff] }
 0x10d   : > { %2483 = vmatpush.bf16.msra.mxu3 %v3447_v16  ;;  %2693 = vmatpush.bf16.msra.mxu0 %v3455_v35  ;;  %v1359_v5 = vunpack.c.l.b16 %v1310_v2  ;;  %v1778_v62 = vunpack.c.l.b16 %v1729_v60  ;;  %v1779_v16 = vunpack.c.l.b16 %v1730_v29 }
 0x10e   : > { %v4501_v45 = vpack.c.b16 %v1775_v11, %v1774_v42  ;;  %v3441_v42 = vld [vmem:[%s4802_s3 + $0x1c8] sm:$0xff]  ;;  %v1785_v60 = vunpack.c.l.b16 %v1736_v1 }
 0x10f   : > { %2274 = vmatpush.bf16.msra.mxu2 %v3438_v8  ;;  %2063 = vmatpush.bf16.msra.mxu1 %v3430_v13  ;;  %v4538_v35 = vpack.c.b16 %v1359_v5, %v1358_v44  ;;  %v4540_v17 = vpack.c.b16 %v1779_v16, %v1778_v62  ;;  %v3434_v8 = vld [vmem:[%s4802_s3 + $0x190] sm:$0xff]  ;;  %v1717_v11 = vld [vmem:[#allocation2 + $0xc8] sm:$0xff] }
 0x110   : > { %v3442_v13 = vld [vmem:[%s4802_s3 + $0x1d0] sm:$0xff] }
 0x111   : > { %2484 = vmatpush.bf16.msra.mxu3 %v3446_v63  ;;  %2694 = vmatpush.bf16.msra.mxu0 %v3454_v14  ;;  %v3426_v63 = vld [vmem:[%s4802_s3 + $0x150] sm:$0xff]  ;;  %v1715_v14 = vld [vmem:[#allocation2 + $0xa8] sm:$0xff] }
 0x112   : > { %v1731_v38 = vpack.c.bf16 %v1715_v14, %v1715_v14  ;;  %v1301_v16 = vld [vmem:[#allocation2 + $0xe9] sm:$0xff] }
 0x113   : > { %2275 = vmatpush.bf16.msra.mxu2 %v3437_v43  ;;  %2064 = vmatpush.bf16.msra.mxu1 %v3429_v34  ;;  %v1732_v43 = vpack.c.bf16 %v1716_v0, %v1716_v0  ;;  %v1360_v34 = vunpack.c.l.b16 %v1311_v28  ;;  %v1318_v28 = vpack.c.bf16 %v1302_v23, %v1302_v23 }
 0x115   : > { %2485 = vmatpush.bf16.msra.mxu3 %v3445_v7  ;;  %2695 = vmatpush.bf16.msra.mxu0 %v3453_v46  ;;  %v1780_v46 = vunpack.c.l.b16 %v1731_v38  ;;  %v1781_v24 = vunpack.c.l.b16 %v1732_v43 }
 0x117   : > { %2276 = vmatpush.bf16.msra.mxu2 %v3436_v22  ;;  %2065 = vmatpush.bf16.msra.mxu1 %v3428_v52  ;;  %v4560_v18 = vpack.c.b16 %v1781_v24, %v1780_v46  ;;  %v1314_v22 = vpack.c.bf16 %v1298_v39, %v1298_v39  ;;  %v1734_v52 = vpack.c.bf16 %v1718_v21, %v1718_v21  ;;  %v1367_v24 = vunpack.c.l.b16 %v1318_v28 }
 0x119   : > { %2486 = vmatpush.bf16.msra.mxu3 %v3444_v50  ;;  %v1733_v50 = vpack.c.bf16 %v1717_v11, %v1717_v11  ;;  %v1783_v33 = vunpack.c.l.b16 %v1734_v52 }
 0x11a   : > { %1235 = vmatmul.bf16.gmra.mxu1 %v1788_v15  ;;  %1445 = vmatmul.bf16.gmra.mxu2 %v4499_v57  ;;  %v1296_v15 = vld [vmem:[#allocation2 + $0x91] sm:$0xff] }
 0x11b   : > { %2277 = vmatpush.bf16.msra.mxu2 %v3435_v25  ;;  %2066 = vmatpush.bf16.msra.mxu1 %v3427_v27  ;;  %v1312_v37 = vpack.c.bf16 %v1296_v15, %v1296_v15  ;;  %v1782_v55 = vunpack.c.l.b16 %v1733_v50  ;;  %v1315_v25 = vpack.c.bf16 %v1299_v41, %v1299_v41  ;;  %v1735_v27 = vpack.c.bf16 %v1719_v58, %v1719_v58  ;;  %v1511_v15 = vld [vmem:[#allocation2 + $0x107] sm:$0xff] }
 0x11c   : > { %1655 = vmatmul.bf16.gmra.mxu3 %v4351_v61  ;;  %1865 = vmatmul.bf16.gmra.mxu0 %v4501_v45  ;;  %v3452_v61 = vld [vmem:[%s4802_s3 + $0x220] sm:$0xff]  ;;  %v1527_v38 = vpack.c.bf16 %v1511_v15, %v1511_v15 }
 0x11d   : > { %2696 = vmatpush.bf16.msra.mxu0 %v3452_v61  ;;  %2487 = vmatpush.bf16.msra.mxu3 %v3443_v26  ;;  %v1361_v7 = vunpack.c.l.b16 %v1312_v37  ;;  %v1363_v61 = vunpack.c.l.b16 %v1314_v22  ;;  %v4580_v51 = vpack.c.b16 %v1783_v33, %v1782_v55  ;;  %v1316_v26 = vpack.c.bf16 %v1300_v59, %v1300_v59 }
 0x11e   : > { %v1784_v2 = vunpack.c.l.b16 %v1735_v27  ;;  %v1576_v19 = vunpack.c.l.b16 %v1527_v38 }
 0x11f   : > { %2278 = vmatpush.bf16.msra.mxu2 %v3434_v8  ;;  %2067 = vmatpush.bf16.msra.mxu1 %v3426_v63  ;;  %v4558_v30 = vpack.c.b16 %v1361_v7, %v1360_v34  ;;  %v4578_v47 = vpack.c.b16 %v1363_v61, %v1362_v3  ;;  %v1365_v4 = vunpack.c.l.b16 %v1316_v26  ;;  %v1512_v8 = vld [vmem:[#allocation2 + $0x10f] sm:$0xff] }
 0x120   : > { %v4602_v5 = vpack.c.b16 %v1785_v60, %v1784_v2  ;;  %v1722_v63 = vld [vmem:[#allocation2 + $0x110] sm:$0xff]  ;;  %v1528_v43 = vpack.c.bf16 %v1512_v8, %v1512_v8  ;;  %v2130_v2 = vld [vmem:[#allocation2 + $0x67] sm:$0xff] }
 0x121   : > { %2488 = vmatpush.bf16.msra.mxu3 %v3442_v13  ;;  %v1721_v13 = vld [vmem:[#allocation2 + $0x108] sm:$0xff]  ;;  %v2146_v8 = vpack.c.bf16 %v2130_v2, %v2130_v2 }
 0x122   : > { %v1737_v34 = vpack.c.bf16 %v1721_v13, %v1721_v13  ;;  %v1577_v39 = vunpack.c.l.b16 %v1528_v43  ;;  %v2129_v3 = vld [vmem:[#allocation2 + $0x4f] sm:$0xff] }
 0x123   : > { %2279 = vmatpush.bf16.msra.mxu2 %v3433_v31  ;;  %v2145_v41 = vpack.c.bf16 %v2129_v3, %v2129_v3  ;;  %v2131_v60 = vld [vmem:[#allocation2 + $0x6f] sm:$0xff] }
 0x124   : > { %v1786_v31 = vunpack.c.l.b16 %v1737_v34  ;;  %v4622_v50 = vpack.c.b16 %v1577_v39, %v1576_v19  ;;  %v2147_v13 = vpack.c.bf16 %v2131_v60, %v2131_v60 }
 0x125   : > { %2489 = vmatpush.bf16.msra.mxu3 %v3441_v42  ;;  %v2194_v58 = vunpack.c.l.b16 %v2145_v41  ;;  %v2132_v41 = vld [vmem:[#allocation2 + $0x87] sm:$0xff] }
 0x126   : > { %v2196_v43 = vunpack.c.l.b16 %v2147_v13 }
 0x127   : > { %2280 = vmatpush.bf16.msra.mxu2 %v3432_v9 }
 0x129   : > { %2490 = vmatpush.bf16.msra.mxu3 %v3440_v56 }
 0x12a   : > { %1240 = vmatmul.bf16.gmra.mxu1 %v4501_v45  ;;  %1450 = vmatmul.bf16.gmra.mxu2 %v4518_v10 }
 0x12c   : > { %1660 = vmatmul.bf16.gmra.mxu3 %v4408_v32  ;;  %1870 = vmatmul.bf16.gmra.mxu0 %v4520_v53  ;;  %v3451_v32 = vld [vmem:[%s4802_s3 + $0x218] sm:$0xff] }
 0x12d   : > { %2697 = vmatpush.bf16.msra.mxu0 %v3451_v32  ;;  %v1364_v32 = vunpack.c.l.b16 %v1315_v25 }
 0x12f   : > { %v4598_v29 = vpack.c.b16 %v1365_v4, %v1364_v32  ;;  %v853_v4 = vld [vmem:[%s3881_s23 + $0x8] sm:$0xff] }
 0x13a   : > { %1245 = vmatmul.bf16.gmra.mxu1 %v4520_v53  ;;  %1455 = vmatmul.bf16.gmra.mxu2 %v4538_v35 }
 0x13c   : > { %1665 = vmatmul.bf16.gmra.mxu3 %v4353_v6  ;;  %1875 = vmatmul.bf16.gmra.mxu0 %v4540_v17  ;;  %v3450_v6 = vld [vmem:[%s4802_s3 + $0x210] sm:$0xff] }
 0x13d   : > { %2698 = vmatpush.bf16.msra.mxu0 %v3450_v6  ;;  %v1317_v6 = vpack.c.bf16 %v1301_v16, %v1301_v16 }
 0x13f   : > { %v1366_v46 = vunpack.c.l.b16 %v1317_v6 }
 0x141   : > { %2699 = vmatpush.bf16.msra.mxu0 %v3449_v54  ;;  %v4618_v48 = vpack.c.b16 %v1367_v24, %v1366_v46  ;;  %v2128_v54 = vld [vmem:[#allocation2 + $0x47] sm:$0xff] }
 0x142   : > { %v2144_v33 = vpack.c.bf16 %v2128_v54, %v2128_v54 }
 0x144   : > { %v2193_v56 = vunpack.c.l.b16 %v2144_v33  ;;  %v855_v33 = vld [vmem:[%s3881_s23 + $0x18] sm:$0xff] }
 0x145   : > { %2700 = vmatpush.bf16.msra.mxu0 %v3448_v12 }
 0x146   : > { %v2209_v1 = vpack.c.b16 %v2194_v58, %v2193_v56 }
 0x14a   : > { %1250 = vmatmul.bf16.gmra.mxu1 %v4540_v17  ;;  %1460 = vmatmul.bf16.gmra.mxu2 %v4558_v30 }
 0x14c   : > { %1670 = vmatmul.bf16.gmra.mxu3 %v4410_v36  ;;  %1880 = vmatmul.bf16.gmra.mxu0 %v4560_v18  ;;  %v3425_v36 = vld [vmem:[%s4802_s3 + $0x148] sm:$0xff] }
 0x14d   : > { %2068 = vmatpush.bf16.msra.mxu1 %v3425_v36 }
 0x15a   : > { %1255 = vmatmul.bf16.gmra.mxu1 %v4560_v18  ;;  %1465 = vmatmul.bf16.gmra.mxu2 %v4578_v47 }
 0x15c   : > { %1675 = vmatmul.bf16.gmra.mxu3 %v4355_v49  ;;  %1885 = vmatmul.bf16.gmra.mxu0 %v4580_v51  ;;  %v3424_v49 = vld [vmem:[%s4802_s3 + $0x140] sm:$0xff] }
 0x15d   : > { %2069 = vmatpush.bf16.msra.mxu1 %v3424_v49 }
 0x167   : > { %v4600_v44 = vpop.f32.mrf.mxu1 }
 0x169   : > { %v1021_v62 = vpop.f32.mrf.mxu0 }
 0x16a   : > { %1260 = vmatmul.bf16.gmra.mxu1 %v4580_v51  ;;  %1470 = vmatmul.bf16.gmra.mxu2 %v4598_v29  ;;  %v1061_v26 = vadd.f32 %v1021_v62, %v852_v20 }
 0x16c   : > { %1680 = vmatmul.bf16.gmra.mxu3 %v4412_v40  ;;  %1890 = vmatmul.bf16.gmra.mxu0 %v4602_v5  ;;  %v1738_v40 = vpack.c.bf16 %v1722_v63, %v1722_v63 }
 0x16d   : > { %v4608_v14 = vpop.f32.mrf.mxu2 }
 0x16e   : > { %v1787_v42 = vunpack.c.l.b16 %v1738_v40 }
 0x16f   : > { %v4610_v0 = vpop.f32.mrf.mxu3  ;;  %v4612_v37 = vpop.f32.mrf.mxu1 }
 0x170   : > { %v4624_v52 = vpack.c.b16 %v1787_v42, %v1786_v31 }
 0x171   : > { %v1023_v7 = vpop.f32.mrf.mxu0 }
 0x172   : > { %v1062_v23 = vadd.f32 %v1023_v7, %v853_v4 }
 0x175   : > { %v4614_v11 = vpop.f32.mrf.mxu2 }
 0x177   : > { %v4616_v21 = vpop.f32.mrf.mxu3  ;;  %v4620_v22 = vpop.f32.mrf.mxu1 }
 0x179   : > { %v1026_v36 = vpop.f32.mrf.mxu0 }
 0x17a   : > { %1265 = vmatmul.bf16.gmra.mxu1 %v4602_v5  ;;  %1475 = vmatmul.bf16.gmra.mxu2 %v4618_v48 }
 0x17c   : > { %1685 = vmatmul.bf16.gmra.mxu3 %v4622_v50  ;;  %1895 = vmatmul.bf16.gmra.mxu0 %v4624_v52 }
 0x17d   : > { %v4630_v61 = vpop.f32.mrf.mxu2 }
 0x17f   : > { %v4632_v55 = vpop.f32.mrf.mxu3  ;;  %v4634_v59 = vpop.f32.mrf.mxu1 }
 0x181   : > { %v1028_v9 = vpop.f32.mrf.mxu0 }
 0x182   : > { %v1064_v58 = vadd.f32 %v1028_v9, %v855_v33 }
 0x185   : > { %v4637_v25 = vpop.f32.mrf.mxu2 }
 0x187   : > { %v4639_v27 = vpop.f32.mrf.mxu3  ;;  %v1231_v49 = vpop.f32.mrf.mxu1 }
 0x188   : > { %v1271_v12 = vadd.f32 %v1231_v49, %v1061_v26 }
 0x189   : > { %v1861_v32 = vpop.f32.mrf.mxu0 }
 0x18a   : > { %2070 = vmatmul.bf16.vlgmr.msra.gmra.mxu1 %v4499_v57  ;;  %2281 = vmatmul.bf16.vlgmr.msra.gmra.mxu2 %v2209_v1  ;;  %v2195_v57 = vunpack.c.l.b16 %v2146_v8  ;;  %v2148_v1 = vpack.c.bf16 %v2132_v41, %v2132_v41  ;;  %v858_v41 = vld [vmem:[%s3881_s23 + $0x30] sm:$0xff] }
 0x18c   : > { %2491 = vmatmul.bf16.vlgmr.msra.gmra.mxu3 %v4501_v45  ;;  %2701 = vmatmul.bf16.vlgmr.msra.gmra.mxu0 %v4518_v10  ;;  %v854_v45 = vld [vmem:[%s3881_s23 + $0x10] sm:$0xff]  ;;  %v2210_v39 = vpack.c.b16 %v2196_v43, %v2195_v57  ;;  %v2197_v2 = vunpack.c.l.b16 %v2148_v1  ;;  %v857_v57 = vld [vmem:[%s3881_s23 + $0x28] sm:$0xff] }
 0x18d   : > { %v1441_v16 = vpop.f32.mrf.mxu2  ;;  %v1063_v46 = vadd.f32 %v1026_v36, %v854_v45  ;;  %v2133_v36 = vld [vmem:[#allocation2 + $0x8f] sm:$0xff]  ;;  %v2134_v43 = vld [vmem:[#allocation2 + $0xa7] sm:$0xff] }
 0x18e   : > { %v1481_v62 = vadd.f32 %v1441_v16, %v1271_v12  ;;  %v2149_v49 = vpack.c.bf16 %v2133_v36, %v2133_v36 }
 0x18f   : > { %v1651_v15 = vpop.f32.mrf.mxu3  ;;  %v1233_v63 = vpop.f32.mrf.mxu1 }
 0x190   : > { %v1691_v6 = vadd.f32 %v1651_v15, %v1481_v62  ;;  %v1272_v28 = vadd.f32 %v1233_v63, %v1062_v23  ;;  %v2198_v60 = vunpack.c.l.b16 %v2149_v49 }
 0x191   : > { %v1863_v38 = vpop.f32.mrf.mxu0 }
 0x192   : > { %v4645_v34 = vadd.f32 %v1861_v32, %v1691_v6  ;;  %v2211_v9 = vpack.c.b16 %v2198_v60, %v2197_v2 }
 0x195   : > { %v1443_v40 = vpop.f32.mrf.mxu2 }
 0x196   : > { %v1482_v24 = vadd.f32 %v1443_v40, %v1272_v28  ;;  %v1066_v40 = vadd.f32 %v4612_v37, %v857_v57 }
 0x197   : > { %v1653_v19 = vpop.f32.mrf.mxu3  ;;  %v1236_v7 = vpop.f32.mrf.mxu1 }
 0x198   : > { %v1692_v31 = vadd.f32 %v1653_v19, %v1482_v24  ;;  %v1273_v42 = vadd.f32 %v1236_v7, %v1063_v46  ;;  %v2150_v19 = vpack.c.bf16 %v2134_v43, %v2134_v43 }
 0x199   : > { %v1866_v54 = vpop.f32.mrf.mxu0 }
 0x19a   : > { %2075 = vmatmul.bf16.gmra.mxu1 %v4518_v10  ;;  %2286 = vmatmul.bf16.gmra.mxu2 %v2210_v39  ;;  %v4649_v3 = vadd.f32 %v1863_v38, %v1692_v31 }
 0x19c   : > { %2496 = vmatmul.bf16.gmra.mxu3 %v4520_v53  ;;  %2706 = vmatmul.bf16.gmra.mxu0 %v4538_v35  ;;  %v856_v53 = vld [vmem:[%s3881_s23 + $0x20] sm:$0xff] }
 0x19d   : > { %v1446_v56 = vpop.f32.mrf.mxu2  ;;  %v1065_v62 = vadd.f32 %v4600_v44, %v856_v53  ;;  %v2135_v44 = vld [vmem:[#allocation2 + $0xaf] sm:$0xff] }
 0x19e   : > { %v1483_v20 = vadd.f32 %v1446_v56, %v1273_v42  ;;  %v2151_v39 = vpack.c.bf16 %v2135_v44, %v2135_v44  ;;  %v1067_v56 = vadd.f32 %v4620_v22, %v858_v41  ;;  %v2137_v22 = vld [vmem:[#allocation2 + $0xcf] sm:$0xff] }
 0x19f   : > { %v1656_v26 = vpop.f32.mrf.mxu3  ;;  %v1238_v12 = vpop.f32.mrf.mxu1 }
 0x1a0   : > { %v1693_v32 = vadd.f32 %v1656_v26, %v1483_v20  ;;  %v1274_v10 = vadd.f32 %v1238_v12, %v1064_v58  ;;  %v2200_v33 = vunpack.c.l.b16 %v2151_v39 }
 0x1a1   : > { %v1868_v4 = vpop.f32.mrf.mxu0 }
 0x1a2   : > { %v4654_v16 = vadd.f32 %v1866_v54, %v1693_v32  ;;  %v2199_v54 = vunpack.c.l.b16 %v2150_v19 }
 0x1a4   : > { %v2212_v37 = vpack.c.b16 %v2200_v33, %v2199_v54 }
 0x1a5   : > { %v1448_v23 = vpop.f32.mrf.mxu2 }
 0x1a6   : > { %v1484_v15 = vadd.f32 %v1448_v23, %v1274_v10  ;;  %v859_v10 = vld [vmem:[%s3881_s23 + $0x38] sm:$0xff] }
 0x1a7   : > { %v1658_v8 = vpop.f32.mrf.mxu3  ;;  %v1241_v13 = vpop.f32.mrf.mxu1  ;;  %v1068_v60 = vadd.f32 %v4634_v59, %v859_v10 }
 0x1a8   : > { %v1694_v63 = vadd.f32 %v1658_v8, %v1484_v15  ;;  %v1275_v6 = vadd.f32 %v1241_v13, %v1065_v62  ;;  %v2153_v15 = vpack.c.bf16 %v2137_v22, %v2137_v22 }
 0x1a9   : > { %v1871_v28 = vpop.f32.mrf.mxu0 }
 0x1aa   : > { %2080 = vmatmul.bf16.gmra.mxu1 %v4538_v35  ;;  %2291 = vmatmul.bf16.gmra.mxu2 %v2211_v9  ;;  %v4659_v38 = vadd.f32 %v1868_v4, %v1694_v63  ;;  %v2136_v4 = vld [vmem:[#allocation2 + $0xc7] sm:$0xff] }
 0x1ab   : > { %v2152_v62 = vpack.c.bf16 %v2136_v4, %v2136_v4 }
 0x1ac   : > { %2501 = vmatmul.bf16.gmra.mxu3 %v4540_v17  ;;  %2711 = vmatmul.bf16.gmra.mxu0 %v4558_v30 }
 0x1ad   : > { %v1451_v45 = vpop.f32.mrf.mxu2  ;;  %v2201_v63 = vunpack.c.l.b16 %v2152_v62  ;;  %v863_v62 = vld [vmem:[%s3881_s23 + $0x58] sm:$0xff] }
 0x1ae   : > { %v1485_v46 = vadd.f32 %v1451_v45, %v1275_v6  ;;  %v2202_v6 = vunpack.c.l.b16 %v2153_v15  ;;  %v2560_v15 = vld [vmem:[#allocation2 + $0x109] sm:$0xff] }
 0x1af   : > { %v1661_v24 = vpop.f32.mrf.mxu3  ;;  %v1243_v7 = vpop.f32.mrf.mxu1 }
 0x1b0   : > { %v1695_v35 = vadd.f32 %v1661_v24, %v1485_v46  ;;  %v1276_v31 = vadd.f32 %v1243_v7, %v1066_v40  ;;  %v2213_v59 = vpack.c.b16 %v2202_v6, %v2201_v63  ;;  %v861_v7 = vld [vmem:[%s3881_s23 + $0x48] sm:$0xff]  ;;  %v2576_v6 = vpack.c.bf16 %v2560_v15, %v2560_v15 }
 0x1b1   : > { %v1873_v42 = vpop.f32.mrf.mxu0 }
 0x1b2   : > { %v4665_v17 = vadd.f32 %v1871_v28, %v1695_v35  ;;  %v860_v28 = vld [vmem:[%s3881_s23 + $0x40] sm:$0xff] }
 0x1b3   : > { %v1069_v43 = vadd.f32 %v4608_v14, %v860_v28  ;;  %v2138_v35 = vld [vmem:[#allocation2 + $0xe7] sm:$0xff]  ;;  %v2139_v14 = vld [vmem:[#allocation2 + $0xef] sm:$0xff] }
 0x1b4   : > { %v2154_v41 = vpack.c.bf16 %v2138_v35, %v2138_v35 }
 0x1b5   : > { %v1453_v36 = vpop.f32.mrf.mxu2 }
 0x1b6   : > { %v1486_v58 = vadd.f32 %v1453_v36, %v1276_v31  ;;  %v2155_v36 = vpack.c.bf16 %v2139_v14, %v2139_v14 }
 0x1b7   : > { %v1663_v20 = vpop.f32.mrf.mxu3  ;;  %v1246_v26 = vpop.f32.mrf.mxu1 }
 0x1b8   : > { %v1696_v1 = vadd.f32 %v1663_v20, %v1486_v58  ;;  %v1277_v49 = vadd.f32 %v1246_v26, %v1067_v56  ;;  %v2204_v26 = vunpack.c.l.b16 %v2155_v36  ;;  %v2353_v36 = vld [vmem:[#allocation2 + $0x130] sm:$0xff] }
 0x1b9   : > { %v1876_v12 = vpop.f32.mrf.mxu0 }
 0x1ba   : > { %2085 = vmatmul.bf16.gmra.mxu1 %v4558_v30  ;;  %2296 = vmatmul.bf16.gmra.mxu2 %v2212_v37  ;;  %v4670_v32 = vadd.f32 %v1873_v42, %v1696_v1  ;;  %v1070_v42 = vadd.f32 %v4614_v11, %v861_v7  ;;  %v2203_v37 = vunpack.c.l.b16 %v2154_v41  ;;  %v862_v1 = vld [vmem:[%s3881_s23 + $0x50] sm:$0xff] }
 0x1bb   : > { %v2143_v41 = vld [vmem:[#allocation2 + $0x12f] sm:$0xff] }
 0x1bc   : > { %2506 = vmatmul.bf16.gmra.mxu3 %v4560_v18  ;;  %2716 = vmatmul.bf16.gmra.mxu0 %v4578_v47  ;;  %v2214_v11 = vpack.c.b16 %v2204_v26, %v2203_v37 }
 0x1bd   : > { %v1456_v2 = vpop.f32.mrf.mxu2 }
 0x1be   : > { %v1487_v53 = vadd.f32 %v1456_v2, %v1277_v49 }
 0x1bf   : > { %v1666_v23 = vpop.f32.mrf.mxu3  ;;  %v1248_v8 = vpop.f32.mrf.mxu1 }
 0x1c0   : > { %v1697_v30 = vadd.f32 %v1666_v23, %v1487_v53  ;;  %v1278_v9 = vadd.f32 %v1248_v8, %v1068_v60 }
 0x1c1   : > { %v1878_v13 = vpop.f32.mrf.mxu0 }
 0x1c2   : > { %v4676_v18 = vadd.f32 %v1876_v12, %v1697_v30  ;;  %v1071_v12 = vadd.f32 %v4630_v61, %v862_v1  ;;  %v2561_v61 = vld [vmem:[#allocation2 + $0x111] sm:$0xff]  ;;  %v1072_v30 = vadd.f32 %v4637_v25, %v863_v62  ;;  %v2159_v1 = vpack.c.bf16 %v2143_v41, %v2143_v41 }
 0x1c3   : > { %v2577_v28 = vpack.c.bf16 %v2561_v61, %v2561_v61  ;;  %v866_v62 = vld [vmem:[%s3881_s23 + $0x70] sm:$0xff] }
 0x1c5   : > { %v1458_v57 = vpop.f32.mrf.mxu2 }
 0x1c6   : > { %v1488_v44 = vadd.f32 %v1458_v57, %v1278_v9 }
 0x1c7   : > { %v1668_v45 = vpop.f32.mrf.mxu3  ;;  %v1251_v40 = vpop.f32.mrf.mxu1 }
 0x1c8   : > { %v1698_v46 = vadd.f32 %v1668_v45, %v1488_v44  ;;  %v1279_v24 = vadd.f32 %v1251_v40, %v1069_v43  ;;  %v864_v45 = vld [vmem:[%s3881_s23 + $0x60] sm:$0xff] }
 0x1c9   : > { %v1881_v19 = vpop.f32.mrf.mxu0 }
 0x1ca   : > { %2090 = vmatmul.bf16.gmra.mxu1 %v4578_v47  ;;  %2301 = vmatmul.bf16.gmra.mxu2 %v2213_v59  ;;  %v4681_v39 = vadd.f32 %v1878_v13, %v1698_v46  ;;  %v2626_v59 = vunpack.c.l.b16 %v2577_v28  ;;  %v1073_v46 = vadd.f32 %v4610_v0, %v864_v45  ;;  %v2352_v0 = vld [vmem:[#allocation2 + $0x128] sm:$0xff] }
 0x1cc   : > { %2511 = vmatmul.bf16.gmra.mxu3 %v4580_v51  ;;  %2721 = vmatmul.bf16.gmra.mxu0 %v4598_v29 }
 0x1cd   : > { %v1461_v31 = vpop.f32.mrf.mxu2 }
 0x1ce   : > { %v1489_v54 = vadd.f32 %v1461_v31, %v1279_v24 }
 0x1cf   : > { %v1671_v33 = vpop.f32.mrf.mxu3  ;;  %v1253_v56 = vpop.f32.mrf.mxu1 }
 0x1d0   : > { %v1699_v47 = vadd.f32 %v1671_v33, %v1489_v54  ;;  %v1280_v58 = vadd.f32 %v1253_v56, %v1070_v42  ;;  %v865_v42 = vld [vmem:[%s3881_s23 + $0x68] sm:$0xff] }
 0x1d1   : > { %v1883_v20 = vpop.f32.mrf.mxu0  ;;  %v2142_v33 = vld [vmem:[#allocation2 + $0x127] sm:$0xff] }
 0x1d2   : > { %v4687_v51 = vadd.f32 %v1881_v19, %v1699_v47  ;;  %v2562_v56 = vld [vmem:[#allocation2 + $0x129] sm:$0xff]  ;;  %v2563_v47 = vld [vmem:[#allocation2 + $0x131] sm:$0xff] }
 0x1d5   : > { %v1463_v49 = vpop.f32.mrf.mxu2 }
 0x1d6   : > { %v1490_v10 = vadd.f32 %v1463_v49, %v1280_v58  ;;  %v2368_v49 = vpack.c.bf16 %v2352_v0, %v2352_v0 }
 0x1d7   : > { %v1673_v4 = vpop.f32.mrf.mxu3  ;;  %v1256_v22 = vpop.f32.mrf.mxu1 }
 0x1d8   : > { %v1700_v2 = vadd.f32 %v1673_v4, %v1490_v10  ;;  %v1281_v60 = vadd.f32 %v1256_v22, %v1071_v12  ;;  %v2369_v12 = vpack.c.bf16 %v2353_v36, %v2353_v36  ;;  %v2578_v10 = vpack.c.bf16 %v2562_v56, %v2562_v56 }
 0x1d9   : > { %v1886_v53 = vpop.f32.mrf.mxu0  ;;  %v2417_v15 = vunpack.c.l.b16 %v2368_v49 }
 0x1da   : > { %2095 = vmatmul.bf16.gmra.mxu1 %v4598_v29  ;;  %2306 = vmatmul.bf16.gmra.mxu2 %v2214_v11  ;;  %v4692_v23 = vadd.f32 %v1883_v20, %v1700_v2  ;;  %v1074_v20 = vadd.f32 %v4616_v21, %v865_v42  ;;  %v2418_v21 = vunpack.c.l.b16 %v2369_v12  ;;  %v2627_v61 = vunpack.c.l.b16 %v2578_v10 }
 0x1dc   : > { %2516 = vmatmul.bf16.gmra.mxu3 %v4602_v5  ;;  %2726 = vmatmul.bf16.gmra.mxu0 %v4618_v48  ;;  %v2625_v5 = vunpack.c.l.b16 %v2576_v6 }
 0x1dd   : > { %v1466_v8 = vpop.f32.mrf.mxu2 }
 0x1de   : > { %v1491_v9 = vadd.f32 %v1466_v8, %v1281_v60  ;;  %v2635_v7 = vpack.c.b16 %v2626_v59, %v2625_v5  ;;  %v2208_v60 = vunpack.c.l.b16 %v2159_v1 }
 0x1df   : > { %v1676_v13 = vpop.f32.mrf.mxu3  ;;  %v1258_v63 = vpop.f32.mrf.mxu1 }
 0x1e0   : > { %v1701_v29 = vadd.f32 %v1676_v13, %v1491_v9  ;;  %v1282_v57 = vadd.f32 %v1258_v63, %v1072_v30  ;;  %v1075_v9 = vadd.f32 %v4632_v55, %v866_v62 }
 0x1e1   : > { %v1888_v43 = vpop.f32.mrf.mxu0 }
 0x1e2   : > { %v4698_v44 = vadd.f32 %v1886_v53, %v1701_v29  ;;  %v2426_v29 = vpack.c.b16 %v2418_v21, %v2417_v15 }
 0x1e5   : > { %v1468_v40 = vpop.f32.mrf.mxu2 }
 0x1e6   : > { %v1492_v24 = vadd.f32 %v1468_v40, %v1282_v57  ;;  %v867_v40 = vld [vmem:[%s3881_s23 + $0x78] sm:$0xff]  ;;  %s3456_s23 = sshll.u32 %s3715_s21, 4 }
 0x1e7   : > { %v1678_v19 = vpop.f32.mrf.mxu3  ;;  %v1261_v25 = vpop.f32.mrf.mxu1  ;;  %s2787_s17 = sadd.s32 %s3456_s23, %s3377_s10 }
 0x1e8   : > { %v1702_v35 = vadd.f32 %v1678_v19, %v1492_v24  ;;  %v1283_v14 = vadd.f32 %v1261_v25, %v1073_v46  ;;  %v1076_v24 = vadd.f32 %v4639_v27, %v867_v40  ;;  %s3378_s26 = sshll.u32 %s2787_s17, 3 }
 0x1e9   : > { %v1891_v31 = vpop.f32.mrf.mxu0  ;;  %s2789_s21 = scalar_lea.hbm %s4804_s5, %s3378_s26 }
 0x1ea   : > { %2100 = vmatmul.bf16.gmra.mxu1 %v4618_v48  ;;  %2311 = vmatmul.bf16.gmra.mxu2 %v4622_v50  ;;  %v4705_v54 = vadd.f32 %v1888_v43, %v1702_v35  ;;  %v2158_v48 = vpack.c.bf16 %v2142_v33, %v2142_v33  ;;  %s2792_s28 = sshll.u32 %s2789_s21, 4  ;;  %s2793_s28 = int_to_ptr.hbm [resolvable:$true] %s2792_s28 }
 0x1eb   : > { %s3651_s16 = sshra.s32 %s2793_s28, 4  ;;  %s3652_s16 = int_to_ptr.hbm [resolvable:$true] %s3651_s16 }
 0x1ec   : > { %2521 = vmatmul.bf16.gmra.mxu3 %v4624_v52  ;;  %2731 = vmatmul.bf16.gmra.mxu0 %v2635_v7  ;;  %v2579_v52 = vpack.c.bf16 %v2563_v47, %v2563_v47  ;;  %v2207_v2 = vunpack.c.l.b16 %v2158_v48  ;;  %s3653_s27 = scalar_lea.hbm %s3652_s16, 128  ;;  %p3658_p6 = scmp.lt.s32.totalorder %s3652_s16, %s4804_s5 }
 0x1ed   : > { %v1471_v58 = vpop.f32.mrf.mxu2  ;;  %p3654_p2 = scmp.ne.s32.totalorder %s3652_s16, %s3653_s27  ;;  %p3659_p7 = scmp.lt.s32.totalorder %s3657_s14, %s3653_s27 }
 0x1ee   : > { %v1493_v37 = vadd.f32 %v1471_v58, %v1283_v14  ;;  %v2628_v8 = vunpack.c.l.b16 %v2579_v52  ;;  %v2216_v6 = vpack.c.b16 %v2208_v60, %v2207_v2 }
 0x1ef   : > { %v1681_v26 = vpop.f32.mrf.mxu3  ;;  %v1263_v50 = vpop.f32.mrf.mxu1  ;;  %p3655_p4 = pnand %p3654_p2, %p3817_p3  ;;  %p3660_p9 = por %p3659_p7, %p3658_p6 }
 0x1f0   : > { %v1703_v4 = vadd.f32 %v1681_v26, %v1493_v37  ;;  %v1284_v11 = vadd.f32 %v1263_v50, %v1074_v20  ;;  %v2636_v57 = vpack.c.b16 %v2628_v8, %v2627_v61 }
 0x1f1   : > { %v1893_v22 = vpop.f32.mrf.mxu0  ;;  %p3656_p5 = pneg %p3655_p4 }
 0x1f2   : > { %v4709_v53 = vadd.f32 %v1891_v31, %v1703_v4 }
 0x1f3   : > { %p3661_p10 = pnand %p3660_p9, %p3656_p5 }
 0x1f5   : > { %v1473_v30 = vpop.f32.mrf.mxu2 }
 0x1f6   : > { %v1494_v13 = vadd.f32 %v1473_v30, %v1284_v11 }
 0x1f7   : > { %v1683_v63 = vpop.f32.mrf.mxu3  ;;  %v1266_v28 = vpop.f32.mrf.mxu1 }
 0x1f8   : > { %v1704_v43 = vadd.f32 %v1683_v63, %v1494_v13  ;;  %v1285_v45 = vadd.f32 %v1266_v28, %v1075_v9 }
 0x1f9   : > { %v1896_v5 = vpop.f32.mrf.mxu0 }
 0x1fa   : > { %2105 = vmatmul.bf16.gmra.mxu1 %v2635_v7  ;;  %2316 = vmatmul.bf16.gmra.mxu2 %v2216_v6  ;;  %v4713_v59 = vadd.f32 %v1893_v22, %v1704_v43 }
 0x1fc   : > { %2526 = vmatmul.bf16.gmra.mxu3 %v2426_v29  ;;  %2736 = vmatmul.bf16.gmra.mxu0 %v2636_v57 }
 0x1fd   : > { %v1476_v46 = vpop.f32.mrf.mxu2 }
 0x1fe   : > { %v1495_v55 = vadd.f32 %v1476_v46, %v1285_v45 }
 0x1ff   : > { %v1686_v19 = vpop.f32.mrf.mxu3  ;;  %v1268_v25 = vpop.f32.mrf.mxu1 }
 0x200   : > { %v1705_v35 = vadd.f32 %v1686_v19, %v1495_v55  ;;  %v1286_v14 = vadd.f32 %v1268_v25, %v1076_v24 }
 0x201   : > { %v1898_v31 = vpop.f32.mrf.mxu0 }
 0x202   : > { %v4717_v42 = vadd.f32 %v1896_v5, %v1705_v35 }
 0x205   : > { %v1478_v33 = vpop.f32.mrf.mxu2 }
 0x206   : > { %v1496_v7 = vadd.f32 %v1478_v33, %v1286_v14 }
 0x207   : > { %v1688_v41 = vpop.f32.mrf.mxu3  ;;  %v2071_v0 = vpop.f32.mrf.mxu1 }
 0x208   : > { %v1706_v36 = vadd.f32 %v1688_v41, %v1496_v7  ;;  %v2111_v58 = vadd.f32 %v2071_v0, %v4645_v34 }
 0x209   : > { %v2702_v56 = vpop.f32.mrf.mxu0 }
 0x20a   : > { %v4719_v47 = vadd.f32 %v1898_v31, %v1706_v36 }
 0x20d   : > { %v2282_v27 = vpop.f32.mrf.mxu2 }
 0x20e   : > { %v2322_v20 = vadd.f32 %v2282_v27, %v2111_v58 }
 0x20f   : > { %v2492_v37 = vpop.f32.mrf.mxu3  ;;  %v2073_v26 = vpop.f32.mrf.mxu1 }
 0x210   : > { %v2532_v48 = vadd.f32 %v2492_v37, %v2322_v20  ;;  %v2112_v49 = vadd.f32 %v2073_v26, %v4649_v3 }
 0x211   : > { %v2704_v1 = vpop.f32.mrf.mxu0 }
 0x212   : > { %v2742_v50 = vadd.f32 %v2702_v56, %v2532_v48 }
 0x214   : > { %2758 = vst [vmem:[%s4305_s12] sm:$0xff] %v2742_v50 }
 0x215   : > { %v2284_v12 = vpop.f32.mrf.mxu2 }
 0x216   : > { %v2323_v10 = vadd.f32 %v2284_v12, %v2112_v49 }
 0x217   : > { %v2494_v52 = vpop.f32.mrf.mxu3  ;;  %v2076_v4 = vpop.f32.mrf.mxu1 }
 0x218   : > { %v2533_v11 = vadd.f32 %v2494_v52, %v2323_v10  ;;  %v2113_v34 = vadd.f32 %v2076_v4, %v4654_v16 }
 0x219   : > { %v2707_v22 = vpop.f32.mrf.mxu0 }
 0x21a   : > { %v2743_v2 = vadd.f32 %v2704_v1, %v2533_v11 }
 0x21c   : > { %2759 = vst [vmem:[%s4305_s12 + $0x8] sm:$0xff] %v2743_v2 }
 0x21d   : > { %v2287_v60 = vpop.f32.mrf.mxu2 }
 0x21e   : > { %v2324_v62 = vadd.f32 %v2287_v60, %v2113_v34 }
 0x21f   : > { %v2497_v15 = vpop.f32.mrf.mxu3  ;;  %v2078_v21 = vpop.f32.mrf.mxu1 }
 0x220   : > { %v2534_v61 = vadd.f32 %v2497_v15, %v2324_v62  ;;  %v2114_v3 = vadd.f32 %v2078_v21, %v4659_v38 }
 0x221   : > { %v2709_v8 = vpop.f32.mrf.mxu0 }
 0x222   : > { %v2744_v30 = vadd.f32 %v2707_v22, %v2534_v61 }
 0x224   : > { %2760 = vst [vmem:[%s4305_s12 + $0x10] sm:$0xff] %v2744_v30 }
 0x225   : > { %v2289_v9 = vpop.f32.mrf.mxu2 }
 0x226   : > { %v2325_v13 = vadd.f32 %v2289_v9, %v2114_v3 }
 0x227   : > { %v2499_v63 = vpop.f32.mrf.mxu3  ;;  %v2081_v6 = vpop.f32.mrf.mxu1 }
 0x228   : > { %v2535_v28 = vadd.f32 %v2499_v63, %v2325_v13  ;;  %v2115_v16 = vadd.f32 %v2081_v6, %v4665_v17 }
 0x229   : > { %v2712_v29 = vpop.f32.mrf.mxu0 }
 0x22a   : > { %v2745_v57 = vadd.f32 %v2709_v8, %v2535_v28 }
 0x22c   : > { %2761 = vst [vmem:[%s4305_s12 + $0x18] sm:$0xff] %v2745_v57 }
 0x22d   : > { %v2292_v43 = vpop.f32.mrf.mxu2 }
 0x22e   : > { %v2326_v45 = vadd.f32 %v2292_v43, %v2115_v16 }
 0x22f   : > { %v2502_v5 = vpop.f32.mrf.mxu3  ;;  %v2083_v40 = vpop.f32.mrf.mxu1 }
 0x230   : > { %v2536_v46 = vadd.f32 %v2502_v5, %v2326_v45  ;;  %v2116_v38 = vadd.f32 %v2083_v40, %v4670_v32 }
 0x231   : > { %v2714_v24 = vpop.f32.mrf.mxu0 }
 0x232   : > { %v2746_v55 = vadd.f32 %v2712_v29, %v2536_v46 }
 0x234   : > { %2762 = vst [vmem:[%s4305_s12 + $0x20] sm:$0xff] %v2746_v55 }
 0x235   : > { %v2294_v19 = vpop.f32.mrf.mxu2 }
 0x236   : > { %v2327_v25 = vadd.f32 %v2294_v19, %v2116_v38 }
 0x237   : > { %v2504_v35 = vpop.f32.mrf.mxu3  ;;  %v2086_v14 = vpop.f32.mrf.mxu1 }
 0x238   : > { %v2537_v31 = vadd.f32 %v2504_v35, %v2327_v25  ;;  %v2117_v17 = vadd.f32 %v2086_v14, %v4676_v18 }
 0x239   : > { %v2717_v33 = vpop.f32.mrf.mxu0 }
 0x23a   : > { %v2747_v7 = vadd.f32 %v2714_v24, %v2537_v31 }
 0x23c   : > { %2763 = vst [vmem:[%s4305_s12 + $0x28] sm:$0xff] %v2747_v7 }
 0x23d   : > { %v2297_v41 = vpop.f32.mrf.mxu2 }
 0x23e   : > { %v2328_v0 = vadd.f32 %v2297_v41, %v2117_v17 }
 0x23f   : > { %v2507_v36 = vpop.f32.mrf.mxu3  ;;  %v2088_v56 = vpop.f32.mrf.mxu1 }
 0x240   : > { %v2538_v58 = vadd.f32 %v2507_v36, %v2328_v0  ;;  %v2118_v32 = vadd.f32 %v2088_v56, %v4681_v39 }
 0x241   : > { %v2719_v27 = vpop.f32.mrf.mxu0 }
 0x242   : > { %v2748_v20 = vadd.f32 %v2717_v33, %v2538_v58 }
 0x244   : > { %2764 = vst [vmem:[%s4305_s12 + $0x30] sm:$0xff] %v2748_v20 }
 0x245   : > { %v2299_v37 = vpop.f32.mrf.mxu2 }
 0x246   : > { %v2329_v26 = vadd.f32 %v2299_v37, %v2118_v32 }
 0x247   : > { %v2509_v48 = vpop.f32.mrf.mxu3  ;;  %v2091_v1 = vpop.f32.mrf.mxu1 }
 0x248   : > { %v2539_v50 = vadd.f32 %v2509_v48, %v2329_v26  ;;  %v2119_v18 = vadd.f32 %v2091_v1, %v4687_v51 }
 0x249   : > { %v2722_v49 = vpop.f32.mrf.mxu0 }
 0x24a   : > { %v2749_v12 = vadd.f32 %v2719_v27, %v2539_v50 }
 0x24c   : > { %2765 = vst [vmem:[%s4305_s12 + $0x38] sm:$0xff] %v2749_v12 }
 0x24d   : > { %v2302_v10 = vpop.f32.mrf.mxu2 }
 0x24e   : > { %v2330_v52 = vadd.f32 %v2302_v10, %v2119_v18 }
 0x24f   : > { %v2512_v4 = vpop.f32.mrf.mxu3  ;;  %v2093_v11 = vpop.f32.mrf.mxu1 }
 0x250   : > { %v2540_v22 = vadd.f32 %v2512_v4, %v2330_v52  ;;  %v2120_v39 = vadd.f32 %v2093_v11, %v4692_v23 }
 0x251   : > { %v2724_v2 = vpop.f32.mrf.mxu0 }
 0x252   : > { %v2750_v34 = vadd.f32 %v2722_v49, %v2540_v22 }
 0x254   : > { %2766 = vst [vmem:[%s4305_s12 + $0x40] sm:$0xff] %v2750_v34 }
 0x255   : > { %v2304_v60 = vpop.f32.mrf.mxu2 }
 0x256   : > { %v2331_v62 = vadd.f32 %v2304_v60, %v2120_v39 }
 0x257   : > { %v2514_v15 = vpop.f32.mrf.mxu3  ;;  %v2096_v21 = vpop.f32.mrf.mxu1 }
 0x258   : > { %v2541_v61 = vadd.f32 %v2514_v15, %v2331_v62  ;;  %v2121_v51 = vadd.f32 %v2096_v21, %v4698_v44 }
 0x259   : > { %v2727_v8 = vpop.f32.mrf.mxu0 }
 0x25a   : > { %v2751_v30 = vadd.f32 %v2724_v2, %v2541_v61 }
 0x25c   : > { %2767 = vst [vmem:[%s4305_s12 + $0x48] sm:$0xff] %v2751_v30 }
 0x25d   : > { %v2307_v3 = vpop.f32.mrf.mxu2 }
 0x25e   : > { %v2332_v9 = vadd.f32 %v2307_v3, %v2121_v51 }
 0x25f   : > { %v2517_v13 = vpop.f32.mrf.mxu3  ;;  %v2098_v63 = vpop.f32.mrf.mxu1 }
 0x260   : > { %v2542_v6 = vadd.f32 %v2517_v13, %v2332_v9  ;;  %v2122_v23 = vadd.f32 %v2098_v63, %v4705_v54 }
 0x261   : > { %v2729_v28 = vpop.f32.mrf.mxu0 }
 0x262   : > { %v2752_v29 = vadd.f32 %v2727_v8, %v2542_v6 }
 0x264   : > { %2768 = vst [vmem:[%s4305_s12 + $0x50] sm:$0xff] %v2752_v29 }
 0x265   : > { %v2309_v57 = vpop.f32.mrf.mxu2 }
 0x266   : > { %v2333_v16 = vadd.f32 %v2309_v57, %v2122_v23 }
 0x267   : > { %v2519_v43 = vpop.f32.mrf.mxu3  ;;  %v2101_v45 = vpop.f32.mrf.mxu1 }
 0x268   : > { %v2543_v5 = vadd.f32 %v2519_v43, %v2333_v16  ;;  %v2123_v44 = vadd.f32 %v2101_v45, %v4709_v53 }
 0x269   : > { %v2732_v46 = vpop.f32.mrf.mxu0 }
 0x26a   : > { %v2753_v40 = vadd.f32 %v2729_v28, %v2543_v5 }
 0x26c   : > { %2769 = vst [vmem:[%s4305_s12 + $0x58] sm:$0xff] %v2753_v40 }
 0x26d   : > { %v2312_v24 = vpop.f32.mrf.mxu2 }
 0x26e   : > { %v2334_v55 = vadd.f32 %v2312_v24, %v2123_v44 }
 0x26f   : > { %v2522_v38 = vpop.f32.mrf.mxu3  ;;  %v2103_v19 = vpop.f32.mrf.mxu1 }
 0x270   : > { %v2544_v25 = vadd.f32 %v2522_v38, %v2334_v55  ;;  %v2124_v35 = vadd.f32 %v2103_v19, %v4713_v59 }
 0x271   : > { %v2734_v14 = vpop.f32.mrf.mxu0 }
 0x272   : > { %v2754_v54 = vadd.f32 %v2732_v46, %v2544_v25 }
 0x274   : > { %2770 = vst [vmem:[%s4305_s12 + $0x60] sm:$0xff] %v2754_v54 }
 0x275   : > { %v2314_v31 = vpop.f32.mrf.mxu2 }
 0x276   : > { %v2335_v33 = vadd.f32 %v2314_v31, %v2124_v35 }
 0x277   : > { %v2524_v7 = vpop.f32.mrf.mxu3  ;;  %v2106_v17 = vpop.f32.mrf.mxu1 }
 0x278   : > { %v2545_v41 = vadd.f32 %v2524_v7, %v2335_v33  ;;  %v2125_v0 = vadd.f32 %v2106_v17, %v4717_v42 }
 0x279   : > { %v2737_v27 = vpop.f32.mrf.mxu0 }
 0x27a   : > { %v2755_v53 = vadd.f32 %v2734_v14, %v2545_v41 }
 0x27c   : > { %2771 = vst [vmem:[%s4305_s12 + $0x68] sm:$0xff] %v2755_v53 }
 0x27d   : > { %v2317_v36 = vpop.f32.mrf.mxu2 }
 0x27e   : > { %v2336_v56 = vadd.f32 %v2317_v36, %v2125_v0 }
 0x27f   : > { %v2527_v58 = vpop.f32.mrf.mxu3  ;;  %v2108_v20 = vpop.f32.mrf.mxu1 }
 0x280   : > { %v2546_v59 = vadd.f32 %v2527_v58, %v2336_v56  ;;  %v2126_v37 = vadd.f32 %v2108_v20, %v4719_v47 }
 0x281   : > { %v2739_v50 = vpop.f32.mrf.mxu0 }
 0x282   : > { %v2756_v32 = vadd.f32 %v2737_v27, %v2546_v59 }
 0x284   : > { %2772 = vst [vmem:[%s4305_s12 + $0x70] sm:$0xff] %v2756_v32 }
 0x285   : > { %v2319_v26 = vpop.f32.mrf.mxu2 }
 0x286   : > { %v2337_v42 = vadd.f32 %v2319_v26, %v2126_v37 }
 0x287   : > { %v2529_v48 = vpop.f32.mrf.mxu3 }
 0x288   : > { %v2547_v1 = vadd.f32 %v2529_v48, %v2337_v42 }
 0x28a   : > { %v2757_v49 = vadd.f32 %v2739_v50, %v2547_v1 }
 0x28c   : > { %2773 = vst [vmem:[%s4305_s12 + $0x78] sm:$0xff] %v2757_v49 }
 0x28d   : > { %3664 = shalt.err (!%p3661_p10)
}
 0x28e   : > { %s3734_s12 = smov 128   ;;  %s3735_s10 = smov 8  }
 0x28f   : > { %3481 = dma.vmem_to_hbm [thread:$0]  (%p3817_p3), %s2791_s22, 2048, %s2793_s28, %s2775_s15, %s3734_s12, %s3734_s12, %s3735_s10  }
 0x290 PF: > { %p3487_p11 = scmp.ge.s32.totalorder %s3731_s25, 2  ;;  %s2807_s17 = sand.u32 1, %s3703_s18  }
 0x291   : > { %s2808_s26 = scalar_lea.sflag [#allocation4], %s2807_s17 }
 0x292   : > { %p3484_p12 = pnand %p3487_p11, %p3826_p8 }
 0x294   : > { %p3485_p13 = pneg %p3484_p12 }
 0x296   : > { %3698 = dma.done.wait (%p3485_p13), %s2808_s26, 2048  }
 0x297   : > { %3700 = vsyncadd (%p3485_p13), %s2808_s26, 4294965248  ;;  %s18_s25 = sadd.s32 1, %s3731_s25   ;;  %s4868_s21 = sld [smem:[#allocation6_spill]] }
 0x298   : > { %p15_p0 = scmp.ge.s32.totalorder %s18_s25, 6   ;;  %s4869_s22 = sld [smem:[#allocation7_spill]] }
 0x299   : > { %s4870_s23 = sld [smem:[#allocation8_spill]]  ;;  %s4872_s18 = smov %s3707_s19 }
 0x29a   : > { %s4871_s24 = sld [smem:[#allocation9_spill]]  ;;  %s4873_s19 = smov %s3711_s20 }
 0x29b   : > { %s4874_s20 = smov %s3835_s11  ;;  %17 = sbr.rel (!%p15_p0) target bundleno = 5 (0x5), region = 106 }
 0x2a0   :  { %2814 = vsyncpa [#allocation4], 1 }
 0x2a1   :  { %2816 = vsyncpa [#allocation4 + $0x1], 1 }

</bundles_post_ra>
